<compile_context>
chip_gen: v5e
topology: v5e:2x2
jax: 0.10.0
libtpu: 0.0.40
codegen_flags: <defaults>
</compile_context>

<pallas_src>
import functools

import jax
import jax.numpy as jnp
import numpy as np
from jax.experimental import pallas as pl
from jax.experimental.pallas import tpu as pltpu

# Keep the pure-JAX reference at full f32 matmul precision so it matches the
# kernel's explicit HIGHEST-precision dots at the 1e-4 tolerance.
jax.config.update("jax_default_matmul_precision", "highest")


# ----------------------------------------------------------------------------
# Fused kernel: all LSTM layers + FC head, everything resident in VMEM/vregs.
# ----------------------------------------------------------------------------
def _fused_kernel(*refs, num_layers, T, B, H):
    # refs layout: x2d, [wih_t, whh_t, b] * num_layers, fc1_wt, fc1_b, fc2_wt, fc2_b,
    #              out3, hn, cn
    n_in = 1 + 3 * num_layers + 4
    in_refs = refs[:n_in]
    out_ref, hn_ref, cn_ref = refs[n_in:n_in + 3]

    idx = 0
    x_ref = in_refs[idx]; idx += 1
    layer_refs = []
    for _ in range(num_layers):
        layer_refs.append(in_refs[idx:idx + 3]); idx += 3
    fc1_wt_ref, fc1_b_ref, fc2_wt_ref, fc2_b_ref = in_refs[idx:idx + 4]

    f32 = jnp.float32
    HIGHEST = jax.lax.Precision.HIGHEST

    # --- Hoisted input projection for layer 0: one MXU matmul over the whole
    # sequence, bias (b_ih + b_hh) folded in.  Only the h-dependent matmul stays on
    # the recurrent critical path.
    gx0 = jnp.dot(x_ref[...], layer_refs[0][0][...],
                  preferred_element_type=f32, precision=HIGHEST) + layer_refs[0][2][...]
    # Pre-extract the per-timestep rows once; these static slices depend only on gx0,
    # so the scheduler keeps them off the recurrent dependency chain.
    gx0_t = [gx0[t * B:(t + 1) * B, :] for t in range(T)]

    # Weights / biases loaded once (a few KB total -> they live in vregs).
    whh = [lr[1][...] for lr in layer_refs]                  # (H, 4H) per layer
    wih = [None] + [lr[0][...] for lr in layer_refs[1:]]     # (H, 4H) for l >= 1
    bias = [None] + [lr[2][...] for lr in layer_refs[1:]]    # (1, 4H) for l >= 1
    fc1_wt, fc1_b = fc1_wt_ref[...], fc1_b_ref[...]
    fc2_wt, fc2_b = fc2_wt_ref[...], fc2_b_ref[...]          # lane-padded to 128 cols

    def cell(gates, c_prev):
        # Gate columns are pre-permuted to (i, f, o, g): one sigmoid over 3H lanes,
        # one tanh over H lanes (half the transcendental work of sigmoid+tanh on 4H).
        sig = jax.nn.sigmoid(gates[:, :3 * H])
        g_g = jnp.tanh(gates[:, 3 * H:])
        i_g, f_g, o_g = sig[:, :H], sig[:, H:2 * H], sig[:, 2 * H:3 * H]
        c_new = f_g * c_prev + i_g * g_g
        h_new = o_g * jnp.tanh(c_new)
        return h_new, c_new

    h = [jnp.zeros((B, H), f32) for _ in range(num_layers)]
    c = [jnp.zeros((B, H), f32) for _ in range(num_layers)]

    # --- Wavefront over (layer, time): step s updates cell (l, t = s - l) for every
    # live layer.  Every live layer reads only end-of-step-(s-1) state (old lists),
    # so the per-step matmuls are mutually independent and pipeline in the MXU; the
    # serial chain is T + L - 1 steps instead of L * T.
    # TODO(synk): for large T, run this as lax.fori_loop(..., unroll=True) over chunks
    # instead of a fully unrolled trace-time loop.
    # TODO(synk): hold whh in MXU weight registers across steps via
    # pltpu.matmul_push_rhs / matmul_acc_lhs / matmul_pop if RHS re-streaming ever
    # dominates the tiny per-step matmul latency.
    # TODO(synk): if tolerance is relaxed, cast the non-recurrent matmuls (input
    # projection, FC head) to bf16 with f32 accumulation.
    for s in range(T + num_layers - 1):
        new_h, new_c = list(h), list(c)
        for l in range(num_layers):
            t = s - l
            if t < 0 or t >= T:
                continue
            if l == 0:
                gates = gx0_t[t] + jnp.dot(h[0], whh[0],
                                           preferred_element_type=f32,
                                           precision=HIGHEST)
            else:
                # h[l-1] still holds layer l-1's output for timestep t (produced at
                # wavefront step s-1; updates go into new_h, so reads stay consistent).
                gates = (jnp.dot(h[l - 1], wih[l], preferred_element_type=f32,
                                 precision=HIGHEST)
                         + jnp.dot(h[l], whh[l], preferred_element_type=f32,
                                   precision=HIGHEST)
                         + bias[l])
            h_new, c_new = cell(gates, c[l])
            new_h[l], new_c[l] = h_new, c_new
            if l == num_layers - 1:
                # FC head applied the moment the top layer emits h_t.  It is
                # independent of the next recurrence step, so it overlaps with it,
                # and the store is one dense (B, 128) block per timestep into its own
                # tile (no masked read-modify-write stores, no (T*B, H) scratch).
                hid = jnp.maximum(
                    jnp.dot(h_new, fc1_wt, preferred_element_type=f32,
                            precision=HIGHEST) + fc1_b, 0.0)
                out_t = jnp.dot(hid, fc2_wt, preferred_element_type=f32,
                                precision=HIGHEST) + fc2_b
                out_ref[t] = out_t.astype(out_ref.dtype)
        h, c = new_h, new_c

    # Final states written exactly once per layer.
    for l in range(num_layers):
        hn_ref[l] = h[l]
        cn_ref[l] = c[l]


# ----------------------------------------------------------------------------
# One-time parameter preprocessing (layout work done once, not per forward).
# ----------------------------------------------------------------------------
def prepare_params(params):
    H = params["fc1_w"].shape[0]
    O = params["fc2_w"].shape[0]
    # PyTorch packs the gates as rows [i; f; g; o] of w_ih / w_hh.  After transposing,
    # permute the columns to [i | f | o | g] so the kernel applies sigmoid to one
    # contiguous 3H slab and tanh to the trailing H slab.
    perm = np.concatenate([np.arange(0, 2 * H),        # i, f
                           np.arange(3 * H, 4 * H),    # o
                           np.arange(2 * H, 3 * H)])   # g
    layers = []
    for lp in params["lstm"]:
        layers.append({
            "wih_t": jnp.transpose(lp["w_ih"])[:, perm],               # (in, 4H)
            "whh_t": jnp.transpose(lp["w_hh"])[:, perm],               # (H, 4H)
            "b": (lp["b_ih"] + lp["b_hh"])[perm].reshape(1, -1),       # (1, 4H)
        })
    # Lane-dense FC output: pad fc2 to a multiple of 128 output columns so the kernel
    # writes unmasked stores; the wrapper slices back to O.
    O_pad = ((max(O, 1) + 127) // 128) * 128
    fc2_wt = jnp.zeros((H, O_pad), jnp.float32).at[:, :O].set(
        jnp.transpose(params["fc2_w"]))
    fc2_b = jnp.zeros((1, O_pad), jnp.float32).at[0, :O].set(params["fc2_b"])
    return {
        "layers": layers,
        "fc1_wt": jnp.transpose(params["fc1_w"]),                      # (H, H)
        "fc1_b": params["fc1_b"].reshape(1, -1),                       # (1, H)
        "fc2_wt": fc2_wt,                                              # (H, O_pad)
        "fc2_b": fc2_b,                                                # (1, O_pad)
    }


# ----------------------------------------------------------------------------
# Full model forward (one pallas_call).
# ----------------------------------------------------------------------------
def weather_lstm_forward(prepped, x, h0=None, c0=None, *, out_size):
    """x: (B, T, input_size) -> (out (B,T,O), hn (L,B,H), cn (L,B,H)).

    Like the PyTorch forward, the LSTM always starts from zero state (the module
    ignores provided h0/c0 as well), so h0/c0 are accepted but unused.
    """
    del h0, c0
    B, T, _ = x.shape
    L = len(prepped["layers"])
    H = prepped["fc1_wt"].shape[0]
    O_pad = prepped["fc2_wt"].shape[1]

    # Time-major flatten so timestep t occupies rows [t*B, (t+1)*B).
    x2d = jnp.transpose(x, (1, 0, 2)).reshape(T * B, -1)

    inputs = [x2d]
    for lp in prepped["layers"]:
        inputs += [lp["wih_t"], lp["whh_t"], lp["b"]]
    inputs += [prepped["fc1_wt"], prepped["fc1_b"],
               prepped["fc2_wt"], prepped["fc2_b"]]

    kernel = functools.partial(_fused_kernel, num_layers=L, T=T, B=B, H=H)

    # Gridless call: all operands total a few tens of KB, far below VMEM on
    # v5e/v6e/v7x, so no tiling or pipelining is needed and the whole recurrence
    # stays resident on-chip.
    # TODO(synk): at realistic batch sizes add a leading grid axis over batch with
    # dimension_semantics=("parallel",) so v7x's two TensorCores split the batch.
    # TODO(synk): at large T*B/H chunk the hoisted input projection over time (or keep
    # it in bf16) so the (T*B, 4H) slab fits v7x's 64 MiB VMEM; raise vmem_limit_bytes.
    out3, hn, cn = pl.pallas_call(
        kernel,
        out_shape=(jax.ShapeDtypeStruct((T, B, O_pad), jnp.float32),
                   jax.ShapeDtypeStruct((L, B, H), jnp.float32),
                   jax.ShapeDtypeStruct((L, B, H), jnp.float32)),
        compiler_params=pltpu.CompilerParams(vmem_limit_bytes=32 * 1024 * 1024),
    )(*inputs)

    out = jnp.transpose(out3[:, :, :out_size], (1, 0, 2))   # back to (B, T, O)
    return out, hn, cn


# ----------------------------------------------------------------------------
# Deterministic parameter init (PyTorch-style uniform(-1/sqrt(H), 1/sqrt(H))).
# ----------------------------------------------------------------------------
def init_params(key, input_size, hidden_size, num_layers, output_size):
    scale = 1.0 / np.sqrt(hidden_size)
    params = {"lstm": []}
    for l in range(num_layers):
        in_sz = input_size if l == 0 else hidden_size
        key, k1, k2, k3, k4 = jax.random.split(key, 5)
        params["lstm"].append({
            "w_ih": jax.random.uniform(k1, (4 * hidden_size, in_sz),
                                       jnp.float32, -scale, scale),
            "w_hh": jax.random.uniform(k2, (4 * hidden_size, hidden_size),
                                       jnp.float32, -scale, scale),
            "b_ih": jax.random.uniform(k3, (4 * hidden_size,),
                                       jnp.float32, -scale, scale),
            "b_hh": jax.random.uniform(k4, (4 * hidden_size,),
                                       jnp.float32, -scale, scale),
        })
    key, k1, k2, k3, k4 = jax.random.split(key, 5)
    params["fc1_w"] = jax.random.uniform(k1, (hidden_size, hidden_size),
                                         jnp.float32, -scale, scale)
    params["fc1_b"] = jax.random.uniform(k2, (hidden_size,),
                                         jnp.float32, -scale, scale)
    params["fc2_w"] = jax.random.uniform(k3, (output_size, hidden_size),
                                         jnp.float32, -scale, scale)
    params["fc2_b"] = jax.random.uniform(k4, (output_size,),
                                         jnp.float32, -scale, scale)
    return params


# ----------------------------------------------------------------------------
# Pure-JAX reference (correctness check, standard PyTorch gate order).
# ----------------------------------------------------------------------------
def reference_forward(params, x):
    B, T, _ = x.shape
    H = params["fc1_w"].shape[0]

    def cell(carry, x_t, w_ih, w_hh, b_ih, b_hh):
        h, c = carry
        g = x_t @ w_ih.T + h @ w_hh.T + b_ih + b_hh
        i, f, gg, o = jnp.split(g, 4, axis=-1)
        i, f, o = jax.nn.sigmoid(i), jax.nn.sigmoid(f), jax.nn.sigmoid(o)
        gg = jnp.tanh(gg)
        c = f * c + i * gg
        h = o * jnp.tanh(c)
        return (h, c), h

    layer_in = jnp.transpose(x, (1, 0, 2))
    hs, cs = [], []
    for lp in params["lstm"]:
        (hT, cT), ys = jax.lax.scan(
            lambda carry, xt: cell(carry, xt, lp["w_ih"], lp["w_hh"],
                                   lp["b_ih"], lp["b_hh"]),
            (jnp.zeros((B, H)), jnp.zeros((B, H))), layer_in)
        layer_in = ys
        hs.append(hT)
        cs.append(cT)
    out = jnp.maximum(layer_in @ params["fc1_w"].T + params["fc1_b"], 0.0)
    out = out @ params["fc2_w"].T + params["fc2_b"]
    return (jnp.transpose(out, (1, 0, 2)),
            jnp.stack(hs, axis=0), jnp.stack(cs, axis=0))


if __name__ == "__main__":
    INPUT_SIZE, HIDDEN_SIZE, NUM_LAYERS, OUTPUT_SIZE = 4, 32, 2, 4
    BATCH, SEQ = 2, 8

    key = jax.random.PRNGKey(0)
    key, xkey = jax.random.split(key)
    x = jax.random.normal(xkey, (BATCH, SEQ, INPUT_SIZE), jnp.float32)
    params = init_params(key, INPUT_SIZE, HIDDEN_SIZE, NUM_LAYERS, OUTPUT_SIZE)

    # One-time weight layout prep (transposes, gate reorder, padding), then the
    # fused forward.
    prepped = prepare_params(params)
    jax.block_until_ready(jax.tree_util.tree_leaves(prepped))

    fwd = jax.jit(functools.partial(weather_lstm_forward, out_size=OUTPUT_SIZE))
    out, hn, cn = fwd(prepped, x)
    jax.block_until_ready((out, hn, cn))

    # Sanity check against the pure-JAX reference.
    ro, rh, rc = reference_forward(params, x)
    np.testing.assert_allclose(np.asarray(out), np.asarray(ro), atol=1e-4, rtol=1e-4)
    np.testing.assert_allclose(np.asarray(hn), np.asarray(rh), atol=1e-4, rtol=1e-4)
    np.testing.assert_allclose(np.asarray(cn), np.asarray(rc), atol=1e-4, rtol=1e-4)

    assert out.shape == (BATCH, SEQ, OUTPUT_SIZE)
    assert hn.shape == (NUM_LAYERS, BATCH, HIDDEN_SIZE)
    assert cn.shape == (NUM_LAYERS, BATCH, HIDDEN_SIZE)
    print("KERNEL_OK")
</pallas_src>

<mosaic_0001>
module attributes {stable_mosaic.version = 11 : i64} {
  func.func @_fused_kernel(%arg0: memref<16x4xf32, #tpu.memory_space<vmem>>, %arg1: memref<4x128xf32, #tpu.memory_space<vmem>>, %arg2: memref<32x128xf32, #tpu.memory_space<vmem>>, %arg3: memref<1x128xf32, #tpu.memory_space<vmem>>, %arg4: memref<32x128xf32, #tpu.memory_space<vmem>>, %arg5: memref<32x128xf32, #tpu.memory_space<vmem>>, %arg6: memref<1x128xf32, #tpu.memory_space<vmem>>, %arg7: memref<32x32xf32, #tpu.memory_space<vmem>>, %arg8: memref<1x32xf32, #tpu.memory_space<vmem>>, %arg9: memref<32x128xf32, #tpu.memory_space<vmem>>, %arg10: memref<1x128xf32, #tpu.memory_space<vmem>>, %arg11: memref<8x2x128xf32, #tpu.memory_space<vmem>>, %arg12: memref<2x2x32xf32, #tpu.memory_space<vmem>>, %arg13: memref<2x2x32xf32, #tpu.memory_space<vmem>>) attributes {dimension_semantics = [], scalar_prefetch = 0 : i64, scratch_operands = 0 : i64, tpu.core_type = #tpu.core_type<tc>} {
    %c0 = arith.constant 0 : index
    %c0_0 = arith.constant 0 : index
    %0 = vector.load %arg0[%c0, %c0_0] : memref<16x4xf32, #tpu.memory_space<vmem>>, vector<16x4xf32>
    %c0_1 = arith.constant 0 : index
    %c0_2 = arith.constant 0 : index
    %1 = vector.load %arg1[%c0_1, %c0_2] : memref<4x128xf32, #tpu.memory_space<vmem>>, vector<4x128xf32>
    %cst = arith.constant dense<0.000000e+00> : vector<16x128xf32>
    %2 = tpu.matmul %0, %1, %cst {dimension_numbers = #tpu.dot_dimension_numbers<[1], [0], [0], [1], [0, 0, 1, 1], [], []>, precision = #tpu.contract_precision<fp32>} : vector<16x4xf32>, vector<4x128xf32>, vector<16x128xf32> -> vector<16x128xf32>
    %c0_3 = arith.constant 0 : index
    %c0_4 = arith.constant 0 : index
    %3 = vector.load %arg3[%c0_3, %c0_4] : memref<1x128xf32, #tpu.memory_space<vmem>>, vector<1x128xf32>
    %4 = vector.broadcast %3 : vector<1x128xf32> to vector<16x128xf32>
    %5 = arith.addf %2, %4 : vector<16x128xf32>
    %6 = vector.extract_strided_slice %5 {offsets = [0, 0], sizes = [2, 128], strides = [1, 1]} : vector<16x128xf32> to vector<2x128xf32>
    %7 = vector.extract_strided_slice %5 {offsets = [2, 0], sizes = [2, 128], strides = [1, 1]} : vector<16x128xf32> to vector<2x128xf32>
    %8 = vector.extract_strided_slice %5 {offsets = [4, 0], sizes = [2, 128], strides = [1, 1]} : vector<16x128xf32> to vector<2x128xf32>
    %9 = vector.extract_strided_slice %5 {offsets = [6, 0], sizes = [2, 128], strides = [1, 1]} : vector<16x128xf32> to vector<2x128xf32>
    %10 = vector.extract_strided_slice %5 {offsets = [8, 0], sizes = [2, 128], strides = [1, 1]} : vector<16x128xf32> to vector<2x128xf32>
    %11 = vector.extract_strided_slice %5 {offsets = [10, 0], sizes = [2, 128], strides = [1, 1]} : vector<16x128xf32> to vector<2x128xf32>
    %12 = vector.extract_strided_slice %5 {offsets = [12, 0], sizes = [2, 128], strides = [1, 1]} : vector<16x128xf32> to vector<2x128xf32>
    %13 = vector.extract_strided_slice %5 {offsets = [14, 0], sizes = [2, 128], strides = [1, 1]} : vector<16x128xf32> to vector<2x128xf32>
    %c0_5 = arith.constant 0 : index
    %c0_6 = arith.constant 0 : index
    %14 = vector.load %arg2[%c0_5, %c0_6] : memref<32x128xf32, #tpu.memory_space<vmem>>, vector<32x128xf32>
    %c0_7 = arith.constant 0 : index
    %c0_8 = arith.constant 0 : index
    %15 = vector.load %arg5[%c0_7, %c0_8] : memref<32x128xf32, #tpu.memory_space<vmem>>, vector<32x128xf32>
    %c0_9 = arith.constant 0 : index
    %c0_10 = arith.constant 0 : index
    %16 = vector.load %arg4[%c0_9, %c0_10] : memref<32x128xf32, #tpu.memory_space<vmem>>, vector<32x128xf32>
    %c0_11 = arith.constant 0 : index
    %c0_12 = arith.constant 0 : index
    %17 = vector.load %arg6[%c0_11, %c0_12] : memref<1x128xf32, #tpu.memory_space<vmem>>, vector<1x128xf32>
    %c0_13 = arith.constant 0 : index
    %c0_14 = arith.constant 0 : index
    %18 = vector.load %arg7[%c0_13, %c0_14] : memref<32x32xf32, #tpu.memory_space<vmem>>, vector<32x32xf32>
    %c0_15 = arith.constant 0 : index
    %c0_16 = arith.constant 0 : index
    %19 = vector.load %arg8[%c0_15, %c0_16] : memref<1x32xf32, #tpu.memory_space<vmem>>, vector<1x32xf32>
    %c0_17 = arith.constant 0 : index
    %c0_18 = arith.constant 0 : index
    %20 = vector.load %arg9[%c0_17, %c0_18] : memref<32x128xf32, #tpu.memory_space<vmem>>, vector<32x128xf32>
    %c0_19 = arith.constant 0 : index
    %c0_20 = arith.constant 0 : index
    %21 = vector.load %arg10[%c0_19, %c0_20] : memref<1x128xf32, #tpu.memory_space<vmem>>, vector<1x128xf32>
    %cst_21 = arith.constant 0.000000e+00 : f32
    %22 = vector.broadcast %cst_21 : f32 to vector<2x32xf32>
    %cst_22 = arith.constant 0.000000e+00 : f32
    %23 = vector.broadcast %cst_22 : f32 to vector<2x32xf32>
    %cst_23 = arith.constant 0.000000e+00 : f32
    %24 = vector.broadcast %cst_23 : f32 to vector<2x32xf32>
    %cst_24 = arith.constant 0.000000e+00 : f32
    %25 = vector.broadcast %cst_24 : f32 to vector<2x32xf32>
    %cst_25 = arith.constant dense<0.000000e+00> : vector<2x128xf32>
    %26 = tpu.matmul %22, %14, %cst_25 {dimension_numbers = #tpu.dot_dimension_numbers<[1], [0], [0], [1], [0, 0, 1, 1], [], []>, precision = #tpu.contract_precision<fp32>} : vector<2x32xf32>, vector<32x128xf32>, vector<2x128xf32> -> vector<2x128xf32>
    %27 = arith.addf %6, %26 : vector<2x128xf32>
    %28 = vector.extract_strided_slice %27 {offsets = [0, 0], sizes = [2, 96], strides = [1, 1]} : vector<2x128xf32> to vector<2x96xf32>
    %29 = arith.negf %28 : vector<2x96xf32>
    %30 = math.exp %29 : vector<2x96xf32>
    %cst_26 = arith.constant 1.000000e+00 : f32
    %31 = vector.broadcast %cst_26 : f32 to vector<2x96xf32>
    %32 = arith.addf %31, %30 : vector<2x96xf32>
    %33 = arith.divf %31, %32 : vector<2x96xf32>
    %34 = vector.extract_strided_slice %27 {offsets = [0, 96], sizes = [2, 32], strides = [1, 1]} : vector<2x128xf32> to vector<2x32xf32>
    %35 = math.tanh %34 : vector<2x32xf32>
    %36 = vector.extract_strided_slice %33 {offsets = [0, 0], sizes = [2, 32], strides = [1, 1]} : vector<2x96xf32> to vector<2x32xf32>
    %37 = vector.extract_strided_slice %33 {offsets = [0, 32], sizes = [2, 32], strides = [1, 1]} : vector<2x96xf32> to vector<2x32xf32>
    %38 = vector.extract_strided_slice %33 {offsets = [0, 64], sizes = [2, 32], strides = [1, 1]} : vector<2x96xf32> to vector<2x32xf32>
    %39 = arith.mulf %37, %24 : vector<2x32xf32>
    %40 = arith.mulf %36, %35 : vector<2x32xf32>
    %41 = arith.addf %39, %40 : vector<2x32xf32>
    %42 = math.tanh %41 : vector<2x32xf32>
    %43 = arith.mulf %38, %42 : vector<2x32xf32>
    %cst_27 = arith.constant dense<0.000000e+00> : vector<2x128xf32>
    %44 = tpu.matmul %43, %14, %cst_27 {dimension_numbers = #tpu.dot_dimension_numbers<[1], [0], [0], [1], [0, 0, 1, 1], [], []>, precision = #tpu.contract_precision<fp32>} : vector<2x32xf32>, vector<32x128xf32>, vector<2x128xf32> -> vector<2x128xf32>
    %45 = arith.addf %7, %44 : vector<2x128xf32>
    %46 = vector.extract_strided_slice %45 {offsets = [0, 0], sizes = [2, 96], strides = [1, 1]} : vector<2x128xf32> to vector<2x96xf32>
    %47 = arith.negf %46 : vector<2x96xf32>
    %48 = math.exp %47 : vector<2x96xf32>
    %cst_28 = arith.constant 1.000000e+00 : f32
    %49 = vector.broadcast %cst_28 : f32 to vector<2x96xf32>
    %50 = arith.addf %49, %48 : vector<2x96xf32>
    %51 = arith.divf %49, %50 : vector<2x96xf32>
    %52 = vector.extract_strided_slice %45 {offsets = [0, 96], sizes = [2, 32], strides = [1, 1]} : vector<2x128xf32> to vector<2x32xf32>
    %53 = math.tanh %52 : vector<2x32xf32>
    %54 = vector.extract_strided_slice %51 {offsets = [0, 0], sizes = [2, 32], strides = [1, 1]} : vector<2x96xf32> to vector<2x32xf32>
    %55 = vector.extract_strided_slice %51 {offsets = [0, 32], sizes = [2, 32], strides = [1, 1]} : vector<2x96xf32> to vector<2x32xf32>
    %56 = vector.extract_strided_slice %51 {offsets = [0, 64], sizes = [2, 32], strides = [1, 1]} : vector<2x96xf32> to vector<2x32xf32>
    %57 = arith.mulf %55, %41 : vector<2x32xf32>
    %58 = arith.mulf %54, %53 : vector<2x32xf32>
    %59 = arith.addf %57, %58 : vector<2x32xf32>
    %60 = math.tanh %59 : vector<2x32xf32>
    %61 = arith.mulf %56, %60 : vector<2x32xf32>
    %cst_29 = arith.constant dense<0.000000e+00> : vector<2x128xf32>
    %62 = tpu.matmul %43, %16, %cst_29 {dimension_numbers = #tpu.dot_dimension_numbers<[1], [0], [0], [1], [0, 0, 1, 1], [], []>, precision = #tpu.contract_precision<fp32>} : vector<2x32xf32>, vector<32x128xf32>, vector<2x128xf32> -> vector<2x128xf32>
    %cst_30 = arith.constant dense<0.000000e+00> : vector<2x128xf32>
    %63 = tpu.matmul %23, %15, %cst_30 {dimension_numbers = #tpu.dot_dimension_numbers<[1], [0], [0], [1], [0, 0, 1, 1], [], []>, precision = #tpu.contract_precision<fp32>} : vector<2x32xf32>, vector<32x128xf32>, vector<2x128xf32> -> vector<2x128xf32>
    %64 = arith.addf %62, %63 : vector<2x128xf32>
    %65 = vector.broadcast %17 : vector<1x128xf32> to vector<2x128xf32>
    %66 = arith.addf %64, %65 : vector<2x128xf32>
    %67 = vector.extract_strided_slice %66 {offsets = [0, 0], sizes = [2, 96], strides = [1, 1]} : vector<2x128xf32> to vector<2x96xf32>
    %68 = arith.negf %67 : vector<2x96xf32>
    %69 = math.exp %68 : vector<2x96xf32>
    %cst_31 = arith.constant 1.000000e+00 : f32
    %70 = vector.broadcast %cst_31 : f32 to vector<2x96xf32>
    %71 = arith.addf %70, %69 : vector<2x96xf32>
    %72 = arith.divf %70, %71 : vector<2x96xf32>
    %73 = vector.extract_strided_slice %66 {offsets = [0, 96], sizes = [2, 32], strides = [1, 1]} : vector<2x128xf32> to vector<2x32xf32>
    %74 = math.tanh %73 : vector<2x32xf32>
    %75 = vector.extract_strided_slice %72 {offsets = [0, 0], sizes = [2, 32], strides = [1, 1]} : vector<2x96xf32> to vector<2x32xf32>
    %76 = vector.extract_strided_slice %72 {offsets = [0, 32], sizes = [2, 32], strides = [1, 1]} : vector<2x96xf32> to vector<2x32xf32>
    %77 = vector.extract_strided_slice %72 {offsets = [0, 64], sizes = [2, 32], strides = [1, 1]} : vector<2x96xf32> to vector<2x32xf32>
    %78 = arith.mulf %76, %25 : vector<2x32xf32>
    %79 = arith.mulf %75, %74 : vector<2x32xf32>
    %80 = arith.addf %78, %79 : vector<2x32xf32>
    %81 = math.tanh %80 : vector<2x32xf32>
    %82 = arith.mulf %77, %81 : vector<2x32xf32>
    %cst_32 = arith.constant dense<0.000000e+00> : vector<2x32xf32>
    %83 = tpu.matmul %82, %18, %cst_32 {dimension_numbers = #tpu.dot_dimension_numbers<[1], [0], [0], [1], [0, 0, 1, 1], [], []>, precision = #tpu.contract_precision<fp32>} : vector<2x32xf32>, vector<32x32xf32>, vector<2x32xf32> -> vector<2x32xf32>
    %84 = vector.broadcast %19 : vector<1x32xf32> to vector<2x32xf32>
    %85 = arith.addf %83, %84 : vector<2x32xf32>
    %cst_33 = arith.constant 0.000000e+00 : f32
    %86 = vector.broadcast %cst_33 : f32 to vector<2x32xf32>
    %87 = arith.maximumf %85, %86 : vector<2x32xf32>
    %cst_34 = arith.constant dense<0.000000e+00> : vector<2x128xf32>
    %88 = tpu.matmul %87, %20, %cst_34 {dimension_numbers = #tpu.dot_dimension_numbers<[1], [0], [0], [1], [0, 0, 1, 1], [], []>, precision = #tpu.contract_precision<fp32>} : vector<2x32xf32>, vector<32x128xf32>, vector<2x128xf32> -> vector<2x128xf32>
    %89 = vector.broadcast %21 : vector<1x128xf32> to vector<2x128xf32>
    %90 = arith.addf %88, %89 : vector<2x128xf32>
    %c0_35 = arith.constant 0 : index
    %c0_36 = arith.constant 0 : index
    %c0_37 = arith.constant 0 : index
    %91 = vector.load %arg11[%c0_35, %c0_36, %c0_37] : memref<8x2x128xf32, #tpu.memory_space<vmem>>, vector<1x2x128xf32>
    %92 = vector.shape_cast %91 : vector<1x2x128xf32> to vector<2x128xf32>
    %93 = vector.shape_cast %90 : vector<2x128xf32> to vector<1x2x128xf32>
    tpu.vector_store %arg11[%c0_35, %c0_36, %c0_37], %93 {strides = array<i32>} : memref<8x2x128xf32, #tpu.memory_space<vmem>>, vector<1x2x128xf32>,
    %cst_38 = arith.constant dense<0.000000e+00> : vector<2x128xf32>
    %94 = tpu.matmul %61, %14, %cst_38 {dimension_numbers = #tpu.dot_dimension_numbers<[1], [0], [0], [1], [0, 0, 1, 1], [], []>, precision = #tpu.contract_precision<fp32>} : vector<2x32xf32>, vector<32x128xf32>, vector<2x128xf32> -> vector<2x128xf32>
    %95 = arith.addf %8, %94 : vector<2x128xf32>
    %96 = vector.extract_strided_slice %95 {offsets = [0, 0], sizes = [2, 96], strides = [1, 1]} : vector<2x128xf32> to vector<2x96xf32>
    %97 = arith.negf %96 : vector<2x96xf32>
    %98 = math.exp %97 : vector<2x96xf32>
    %cst_39 = arith.constant 1.000000e+00 : f32
    %99 = vector.broadcast %cst_39 : f32 to vector<2x96xf32>
    %100 = arith.addf %99, %98 : vector<2x96xf32>
    %101 = arith.divf %99, %100 : vector<2x96xf32>
    %102 = vector.extract_strided_slice %95 {offsets = [0, 96], sizes = [2, 32], strides = [1, 1]} : vector<2x128xf32> to vector<2x32xf32>
    %103 = math.tanh %102 : vector<2x32xf32>
    %104 = vector.extract_strided_slice %101 {offsets = [0, 0], sizes = [2, 32], strides = [1, 1]} : vector<2x96xf32> to vector<2x32xf32>
    %105 = vector.extract_strided_slice %101 {offsets = [0, 32], sizes = [2, 32], strides = [1, 1]} : vector<2x96xf32> to vector<2x32xf32>
    %106 = vector.extract_strided_slice %101 {offsets = [0, 64], sizes = [2, 32], strides = [1, 1]} : vector<2x96xf32> to vector<2x32xf32>
    %107 = arith.mulf %105, %59 : vector<2x32xf32>
    %108 = arith.mulf %104, %103 : vector<2x32xf32>
    %109 = arith.addf %107, %108 : vector<2x32xf32>
    %110 = math.tanh %109 : vector<2x32xf32>
    %111 = arith.mulf %106, %110 : vector<2x32xf32>
    %cst_40 = arith.constant dense<0.000000e+00> : vector<2x128xf32>
    %112 = tpu.matmul %61, %16, %cst_40 {dimension_numbers = #tpu.dot_dimension_numbers<[1], [0], [0], [1], [0, 0, 1, 1], [], []>, precision = #tpu.contract_precision<fp32>} : vector<2x32xf32>, vector<32x128xf32>, vector<2x128xf32> -> vector<2x128xf32>
    %cst_41 = arith.constant dense<0.000000e+00> : vector<2x128xf32>
    %113 = tpu.matmul %82, %15, %cst_41 {dimension_numbers = #tpu.dot_dimension_numbers<[1], [0], [0], [1], [0, 0, 1, 1], [], []>, precision = #tpu.contract_precision<fp32>} : vector<2x32xf32>, vector<32x128xf32>, vector<2x128xf32> -> vector<2x128xf32>
    %114 = arith.addf %112, %113 : vector<2x128xf32>
    %115 = vector.broadcast %17 : vector<1x128xf32> to vector<2x128xf32>
    %116 = arith.addf %114, %115 : vector<2x128xf32>
    %117 = vector.extract_strided_slice %116 {offsets = [0, 0], sizes = [2, 96], strides = [1, 1]} : vector<2x128xf32> to vector<2x96xf32>
    %118 = arith.negf %117 : vector<2x96xf32>
    %119 = math.exp %118 : vector<2x96xf32>
    %cst_42 = arith.constant 1.000000e+00 : f32
    %120 = vector.broadcast %cst_42 : f32 to vector<2x96xf32>
    %121 = arith.addf %120, %119 : vector<2x96xf32>
    %122 = arith.divf %120, %121 : vector<2x96xf32>
    %123 = vector.extract_strided_slice %116 {offsets = [0, 96], sizes = [2, 32], strides = [1, 1]} : vector<2x128xf32> to vector<2x32xf32>
    %124 = math.tanh %123 : vector<2x32xf32>
    %125 = vector.extract_strided_slice %122 {offsets = [0, 0], sizes = [2, 32], strides = [1, 1]} : vector<2x96xf32> to vector<2x32xf32>
    %126 = vector.extract_strided_slice %122 {offsets = [0, 32], sizes = [2, 32], strides = [1, 1]} : vector<2x96xf32> to vector<2x32xf32>
    %127 = vector.extract_strided_slice %122 {offsets = [0, 64], sizes = [2, 32], strides = [1, 1]} : vector<2x96xf32> to vector<2x32xf32>
    %128 = arith.mulf %126, %80 : vector<2x32xf32>
    %129 = arith.mulf %125, %124 : vector<2x32xf32>
    %130 = arith.addf %128, %129 : vector<2x32xf32>
    %131 = math.tanh %130 : vector<2x32xf32>
    %132 = arith.mulf %127, %131 : vector<2x32xf32>
    %cst_43 = arith.constant dense<0.000000e+00> : vector<2x32xf32>
    %133 = tpu.matmul %132, %18, %cst_43 {dimension_numbers = #tpu.dot_dimension_numbers<[1], [0], [0], [1], [0, 0, 1, 1], [], []>, precision = #tpu.contract_precision<fp32>} : vector<2x32xf32>, vector<32x32xf32>, vector<2x32xf32> -> vector<2x32xf32>
    %134 = vector.broadcast %19 : vector<1x32xf32> to vector<2x32xf32>
    %135 = arith.addf %133, %134 : vector<2x32xf32>
    %cst_44 = arith.constant 0.000000e+00 : f32
    %136 = vector.broadcast %cst_44 : f32 to vector<2x32xf32>
    %137 = arith.maximumf %135, %136 : vector<2x32xf32>
    %cst_45 = arith.constant dense<0.000000e+00> : vector<2x128xf32>
    %138 = tpu.matmul %137, %20, %cst_45 {dimension_numbers = #tpu.dot_dimension_numbers<[1], [0], [0], [1], [0, 0, 1, 1], [], []>, precision = #tpu.contract_precision<fp32>} : vector<2x32xf32>, vector<32x128xf32>, vector<2x128xf32> -> vector<2x128xf32>
    %139 = vector.broadcast %21 : vector<1x128xf32> to vector<2x128xf32>
    %140 = arith.addf %138, %139 : vector<2x128xf32>
    %c1 = arith.constant 1 : index
    %c0_46 = arith.constant 0 : index
    %c0_47 = arith.constant 0 : index
    %141 = vector.load %arg11[%c1, %c0_46, %c0_47] : memref<8x2x128xf32, #tpu.memory_space<vmem>>, vector<1x2x128xf32>
    %142 = vector.shape_cast %141 : vector<1x2x128xf32> to vector<2x128xf32>
    %143 = vector.shape_cast %140 : vector<2x128xf32> to vector<1x2x128xf32>
    tpu.vector_store %arg11[%c1, %c0_46, %c0_47], %143 {strides = array<i32>} : memref<8x2x128xf32, #tpu.memory_space<vmem>>, vector<1x2x128xf32>,
    %cst_48 = arith.constant dense<0.000000e+00> : vector<2x128xf32>
    %144 = tpu.matmul %111, %14, %cst_48 {dimension_numbers = #tpu.dot_dimension_numbers<[1], [0], [0], [1], [0, 0, 1, 1], [], []>, precision = #tpu.contract_precision<fp32>} : vector<2x32xf32>, vector<32x128xf32>, vector<2x128xf32> -> vector<2x128xf32>
    %145 = arith.addf %9, %144 : vector<2x128xf32>
    %146 = vector.extract_strided_slice %145 {offsets = [0, 0], sizes = [2, 96], strides = [1, 1]} : vector<2x128xf32> to vector<2x96xf32>
    %147 = arith.negf %146 : vector<2x96xf32>
    %148 = math.exp %147 : vector<2x96xf32>
    %cst_49 = arith.constant 1.000000e+00 : f32
    %149 = vector.broadcast %cst_49 : f32 to vector<2x96xf32>
    %150 = arith.addf %149, %148 : vector<2x96xf32>
    %151 = arith.divf %149, %150 : vector<2x96xf32>
    %152 = vector.extract_strided_slice %145 {offsets = [0, 96], sizes = [2, 32], strides = [1, 1]} : vector<2x128xf32> to vector<2x32xf32>
    %153 = math.tanh %152 : vector<2x32xf32>
    %154 = vector.extract_strided_slice %151 {offsets = [0, 0], sizes = [2, 32], strides = [1, 1]} : vector<2x96xf32> to vector<2x32xf32>
    %155 = vector.extract_strided_slice %151 {offsets = [0, 32], sizes = [2, 32], strides = [1, 1]} : vector<2x96xf32> to vector<2x32xf32>
    %156 = vector.extract_strided_slice %151 {offsets = [0, 64], sizes = [2, 32], strides = [1, 1]} : vector<2x96xf32> to vector<2x32xf32>
    %157 = arith.mulf %155, %109 : vector<2x32xf32>
    %158 = arith.mulf %154, %153 : vector<2x32xf32>
    %159 = arith.addf %157, %158 : vector<2x32xf32>
    %160 = math.tanh %159 : vector<2x32xf32>
    %161 = arith.mulf %156, %160 : vector<2x32xf32>
    %cst_50 = arith.constant dense<0.000000e+00> : vector<2x128xf32>
    %162 = tpu.matmul %111, %16, %cst_50 {dimension_numbers = #tpu.dot_dimension_numbers<[1], [0], [0], [1], [0, 0, 1, 1], [], []>, precision = #tpu.contract_precision<fp32>} : vector<2x32xf32>, vector<32x128xf32>, vector<2x128xf32> -> vector<2x128xf32>
    %cst_51 = arith.constant dense<0.000000e+00> : vector<2x128xf32>
    %163 = tpu.matmul %132, %15, %cst_51 {dimension_numbers = #tpu.dot_dimension_numbers<[1], [0], [0], [1], [0, 0, 1, 1], [], []>, precision = #tpu.contract_precision<fp32>} : vector<2x32xf32>, vector<32x128xf32>, vector<2x128xf32> -> vector<2x128xf32>
    %164 = arith.addf %162, %163 : vector<2x128xf32>
    %165 = vector.broadcast %17 : vector<1x128xf32> to vector<2x128xf32>
    %166 = arith.addf %164, %165 : vector<2x128xf32>
    %167 = vector.extract_strided_slice %166 {offsets = [0, 0], sizes = [2, 96], strides = [1, 1]} : vector<2x128xf32> to vector<2x96xf32>
    %168 = arith.negf %167 : vector<2x96xf32>
    %169 = math.exp %168 : vector<2x96xf32>
    %cst_52 = arith.constant 1.000000e+00 : f32
    %170 = vector.broadcast %cst_52 : f32 to vector<2x96xf32>
    %171 = arith.addf %170, %169 : vector<2x96xf32>
    %172 = arith.divf %170, %171 : vector<2x96xf32>
    %173 = vector.extract_strided_slice %166 {offsets = [0, 96], sizes = [2, 32], strides = [1, 1]} : vector<2x128xf32> to vector<2x32xf32>
    %174 = math.tanh %173 : vector<2x32xf32>
    %175 = vector.extract_strided_slice %172 {offsets = [0, 0], sizes = [2, 32], strides = [1, 1]} : vector<2x96xf32> to vector<2x32xf32>
    %176 = vector.extract_strided_slice %172 {offsets = [0, 32], sizes = [2, 32], strides = [1, 1]} : vector<2x96xf32> to vector<2x32xf32>
    %177 = vector.extract_strided_slice %172 {offsets = [0, 64], sizes = [2, 32], strides = [1, 1]} : vector<2x96xf32> to vector<2x32xf32>
    %178 = arith.mulf %176, %130 : vector<2x32xf32>
    %179 = arith.mulf %175, %174 : vector<2x32xf32>
    %180 = arith.addf %178, %179 : vector<2x32xf32>
    %181 = math.tanh %180 : vector<2x32xf32>
    %182 = arith.mulf %177, %181 : vector<2x32xf32>
    %cst_53 = arith.constant dense<0.000000e+00> : vector<2x32xf32>
    %183 = tpu.matmul %182, %18, %cst_53 {dimension_numbers = #tpu.dot_dimension_numbers<[1], [0], [0], [1], [0, 0, 1, 1], [], []>, precision = #tpu.contract_precision<fp32>} : vector<2x32xf32>, vector<32x32xf32>, vector<2x32xf32> -> vector<2x32xf32>
    %184 = vector.broadcast %19 : vector<1x32xf32> to vector<2x32xf32>
    %185 = arith.addf %183, %184 : vector<2x32xf32>
    %cst_54 = arith.constant 0.000000e+00 : f32
    %186 = vector.broadcast %cst_54 : f32 to vector<2x32xf32>
    %187 = arith.maximumf %185, %186 : vector<2x32xf32>
    %cst_55 = arith.constant dense<0.000000e+00> : vector<2x128xf32>
    %188 = tpu.matmul %187, %20, %cst_55 {dimension_numbers = #tpu.dot_dimension_numbers<[1], [0], [0], [1], [0, 0, 1, 1], [], []>, precision = #tpu.contract_precision<fp32>} : vector<2x32xf32>, vector<32x128xf32>, vector<2x128xf32> -> vector<2x128xf32>
    %189 = vector.broadcast %21 : vector<1x128xf32> to vector<2x128xf32>
    %190 = arith.addf %188, %189 : vector<2x128xf32>
    %c2 = arith.constant 2 : index
    %c0_56 = arith.constant 0 : index
    %c0_57 = arith.constant 0 : index
    %191 = vector.load %arg11[%c2, %c0_56, %c0_57] : memref<8x2x128xf32, #tpu.memory_space<vmem>>, vector<1x2x128xf32>
    %192 = vector.shape_cast %191 : vector<1x2x128xf32> to vector<2x128xf32>
    %193 = vector.shape_cast %190 : vector<2x128xf32> to vector<1x2x128xf32>
    tpu.vector_store %arg11[%c2, %c0_56, %c0_57], %193 {strides = array<i32>} : memref<8x2x128xf32, #tpu.memory_space<vmem>>, vector<1x2x128xf32>,
    %cst_58 = arith.constant dense<0.000000e+00> : vector<2x128xf32>
    %194 = tpu.matmul %161, %14, %cst_58 {dimension_numbers = #tpu.dot_dimension_numbers<[1], [0], [0], [1], [0, 0, 1, 1], [], []>, precision = #tpu.contract_precision<fp32>} : vector<2x32xf32>, vector<32x128xf32>, vector<2x128xf32> -> vector<2x128xf32>
    %195 = arith.addf %10, %194 : vector<2x128xf32>
    %196 = vector.extract_strided_slice %195 {offsets = [0, 0], sizes = [2, 96], strides = [1, 1]} : vector<2x128xf32> to vector<2x96xf32>
    %197 = arith.negf %196 : vector<2x96xf32>
    %198 = math.exp %197 : vector<2x96xf32>
    %cst_59 = arith.constant 1.000000e+00 : f32
    %199 = vector.broadcast %cst_59 : f32 to vector<2x96xf32>
    %200 = arith.addf %199, %198 : vector<2x96xf32>
    %201 = arith.divf %199, %200 : vector<2x96xf32>
    %202 = vector.extract_strided_slice %195 {offsets = [0, 96], sizes = [2, 32], strides = [1, 1]} : vector<2x128xf32> to vector<2x32xf32>
    %203 = math.tanh %202 : vector<2x32xf32>
    %204 = vector.extract_strided_slice %201 {offsets = [0, 0], sizes = [2, 32], strides = [1, 1]} : vector<2x96xf32> to vector<2x32xf32>
    %205 = vector.extract_strided_slice %201 {offsets = [0, 32], sizes = [2, 32], strides = [1, 1]} : vector<2x96xf32> to vector<2x32xf32>
    %206 = vector.extract_strided_slice %201 {offsets = [0, 64], sizes = [2, 32], strides = [1, 1]} : vector<2x96xf32> to vector<2x32xf32>
    %207 = arith.mulf %205, %159 : vector<2x32xf32>
    %208 = arith.mulf %204, %203 : vector<2x32xf32>
    %209 = arith.addf %207, %208 : vector<2x32xf32>
    %210 = math.tanh %209 : vector<2x32xf32>
    %211 = arith.mulf %206, %210 : vector<2x32xf32>
    %cst_60 = arith.constant dense<0.000000e+00> : vector<2x128xf32>
    %212 = tpu.matmul %161, %16, %cst_60 {dimension_numbers = #tpu.dot_dimension_numbers<[1], [0], [0], [1], [0, 0, 1, 1], [], []>, precision = #tpu.contract_precision<fp32>} : vector<2x32xf32>, vector<32x128xf32>, vector<2x128xf32> -> vector<2x128xf32>
    %cst_61 = arith.constant dense<0.000000e+00> : vector<2x128xf32>
    %213 = tpu.matmul %182, %15, %cst_61 {dimension_numbers = #tpu.dot_dimension_numbers<[1], [0], [0], [1], [0, 0, 1, 1], [], []>, precision = #tpu.contract_precision<fp32>} : vector<2x32xf32>, vector<32x128xf32>, vector<2x128xf32> -> vector<2x128xf32>
    %214 = arith.addf %212, %213 : vector<2x128xf32>
    %215 = vector.broadcast %17 : vector<1x128xf32> to vector<2x128xf32>
    %216 = arith.addf %214, %215 : vector<2x128xf32>
    %217 = vector.extract_strided_slice %216 {offsets = [0, 0], sizes = [2, 96], strides = [1, 1]} : vector<2x128xf32> to vector<2x96xf32>
    %218 = arith.negf %217 : vector<2x96xf32>
    %219 = math.exp %218 : vector<2x96xf32>
    %cst_62 = arith.constant 1.000000e+00 : f32
    %220 = vector.broadcast %cst_62 : f32 to vector<2x96xf32>
    %221 = arith.addf %220, %219 : vector<2x96xf32>
    %222 = arith.divf %220, %221 : vector<2x96xf32>
    %223 = vector.extract_strided_slice %216 {offsets = [0, 96], sizes = [2, 32], strides = [1, 1]} : vector<2x128xf32> to vector<2x32xf32>
    %224 = math.tanh %223 : vector<2x32xf32>
    %225 = vector.extract_strided_slice %222 {offsets = [0, 0], sizes = [2, 32], strides = [1, 1]} : vector<2x96xf32> to vector<2x32xf32>
    %226 = vector.extract_strided_slice %222 {offsets = [0, 32], sizes = [2, 32], strides = [1, 1]} : vector<2x96xf32> to vector<2x32xf32>
    %227 = vector.extract_strided_slice %222 {offsets = [0, 64], sizes = [2, 32], strides = [1, 1]} : vector<2x96xf32> to vector<2x32xf32>
    %228 = arith.mulf %226, %180 : vector<2x32xf32>
    %229 = arith.mulf %225, %224 : vector<2x32xf32>
    %230 = arith.addf %228, %229 : vector<2x32xf32>
    %231 = math.tanh %230 : vector<2x32xf32>
    %232 = arith.mulf %227, %231 : vector<2x32xf32>
    %cst_63 = arith.constant dense<0.000000e+00> : vector<2x32xf32>
    %233 = tpu.matmul %232, %18, %cst_63 {dimension_numbers = #tpu.dot_dimension_numbers<[1], [0], [0], [1], [0, 0, 1, 1], [], []>, precision = #tpu.contract_precision<fp32>} : vector<2x32xf32>, vector<32x32xf32>, vector<2x32xf32> -> vector<2x32xf32>
    %234 = vector.broadcast %19 : vector<1x32xf32> to vector<2x32xf32>
    %235 = arith.addf %233, %234 : vector<2x32xf32>
    %cst_64 = arith.constant 0.000000e+00 : f32
    %236 = vector.broadcast %cst_64 : f32 to vector<2x32xf32>
    %237 = arith.maximumf %235, %236 : vector<2x32xf32>
    %cst_65 = arith.constant dense<0.000000e+00> : vector<2x128xf32>
    %238 = tpu.matmul %237, %20, %cst_65 {dimension_numbers = #tpu.dot_dimension_numbers<[1], [0], [0], [1], [0, 0, 1, 1], [], []>, precision = #tpu.contract_precision<fp32>} : vector<2x32xf32>, vector<32x128xf32>, vector<2x128xf32> -> vector<2x128xf32>
    %239 = vector.broadcast %21 : vector<1x128xf32> to vector<2x128xf32>
    %240 = arith.addf %238, %239 : vector<2x128xf32>
    %c3 = arith.constant 3 : index
    %c0_66 = arith.constant 0 : index
    %c0_67 = arith.constant 0 : index
    %241 = vector.load %arg11[%c3, %c0_66, %c0_67] : memref<8x2x128xf32, #tpu.memory_space<vmem>>, vector<1x2x128xf32>
    %242 = vector.shape_cast %241 : vector<1x2x128xf32> to vector<2x128xf32>
    %243 = vector.shape_cast %240 : vector<2x128xf32> to vector<1x2x128xf32>
    tpu.vector_store %arg11[%c3, %c0_66, %c0_67], %243 {strides = array<i32>} : memref<8x2x128xf32, #tpu.memory_space<vmem>>, vector<1x2x128xf32>,
    %cst_68 = arith.constant dense<0.000000e+00> : vector<2x128xf32>
    %244 = tpu.matmul %211, %14, %cst_68 {dimension_numbers = #tpu.dot_dimension_numbers<[1], [0], [0], [1], [0, 0, 1, 1], [], []>, precision = #tpu.contract_precision<fp32>} : vector<2x32xf32>, vector<32x128xf32>, vector<2x128xf32> -> vector<2x128xf32>
    %245 = arith.addf %11, %244 : vector<2x128xf32>
    %246 = vector.extract_strided_slice %245 {offsets = [0, 0], sizes = [2, 96], strides = [1, 1]} : vector<2x128xf32> to vector<2x96xf32>
    %247 = arith.negf %246 : vector<2x96xf32>
    %248 = math.exp %247 : vector<2x96xf32>
    %cst_69 = arith.constant 1.000000e+00 : f32
    %249 = vector.broadcast %cst_69 : f32 to vector<2x96xf32>
    %250 = arith.addf %249, %248 : vector<2x96xf32>
    %251 = arith.divf %249, %250 : vector<2x96xf32>
    %252 = vector.extract_strided_slice %245 {offsets = [0, 96], sizes = [2, 32], strides = [1, 1]} : vector<2x128xf32> to vector<2x32xf32>
    %253 = math.tanh %252 : vector<2x32xf32>
    %254 = vector.extract_strided_slice %251 {offsets = [0, 0], sizes = [2, 32], strides = [1, 1]} : vector<2x96xf32> to vector<2x32xf32>
    %255 = vector.extract_strided_slice %251 {offsets = [0, 32], sizes = [2, 32], strides = [1, 1]} : vector<2x96xf32> to vector<2x32xf32>
    %256 = vector.extract_strided_slice %251 {offsets = [0, 64], sizes = [2, 32], strides = [1, 1]} : vector<2x96xf32> to vector<2x32xf32>
    %257 = arith.mulf %255, %209 : vector<2x32xf32>
    %258 = arith.mulf %254, %253 : vector<2x32xf32>
    %259 = arith.addf %257, %258 : vector<2x32xf32>
    %260 = math.tanh %259 : vector<2x32xf32>
    %261 = arith.mulf %256, %260 : vector<2x32xf32>
    %cst_70 = arith.constant dense<0.000000e+00> : vector<2x128xf32>
    %262 = tpu.matmul %211, %16, %cst_70 {dimension_numbers = #tpu.dot_dimension_numbers<[1], [0], [0], [1], [0, 0, 1, 1], [], []>, precision = #tpu.contract_precision<fp32>} : vector<2x32xf32>, vector<32x128xf32>, vector<2x128xf32> -> vector<2x128xf32>
    %cst_71 = arith.constant dense<0.000000e+00> : vector<2x128xf32>
    %263 = tpu.matmul %232, %15, %cst_71 {dimension_numbers = #tpu.dot_dimension_numbers<[1], [0], [0], [1], [0, 0, 1, 1], [], []>, precision = #tpu.contract_precision<fp32>} : vector<2x32xf32>, vector<32x128xf32>, vector<2x128xf32> -> vector<2x128xf32>
    %264 = arith.addf %262, %263 : vector<2x128xf32>
    %265 = vector.broadcast %17 : vector<1x128xf32> to vector<2x128xf32>
    %266 = arith.addf %264, %265 : vector<2x128xf32>
    %267 = vector.extract_strided_slice %266 {offsets = [0, 0], sizes = [2, 96], strides = [1, 1]} : vector<2x128xf32> to vector<2x96xf32>
    %268 = arith.negf %267 : vector<2x96xf32>
    %269 = math.exp %268 : vector<2x96xf32>
    %cst_72 = arith.constant 1.000000e+00 : f32
    %270 = vector.broadcast %cst_72 : f32 to vector<2x96xf32>
    %271 = arith.addf %270, %269 : vector<2x96xf32>
    %272 = arith.divf %270, %271 : vector<2x96xf32>
    %273 = vector.extract_strided_slice %266 {offsets = [0, 96], sizes = [2, 32], strides = [1, 1]} : vector<2x128xf32> to vector<2x32xf32>
    %274 = math.tanh %273 : vector<2x32xf32>
    %275 = vector.extract_strided_slice %272 {offsets = [0, 0], sizes = [2, 32], strides = [1, 1]} : vector<2x96xf32> to vector<2x32xf32>
    %276 = vector.extract_strided_slice %272 {offsets = [0, 32], sizes = [2, 32], strides = [1, 1]} : vector<2x96xf32> to vector<2x32xf32>
    %277 = vector.extract_strided_slice %272 {offsets = [0, 64], sizes = [2, 32], strides = [1, 1]} : vector<2x96xf32> to vector<2x32xf32>
    %278 = arith.mulf %276, %230 : vector<2x32xf32>
    %279 = arith.mulf %275, %274 : vector<2x32xf32>
    %280 = arith.addf %278, %279 : vector<2x32xf32>
    %281 = math.tanh %280 : vector<2x32xf32>
    %282 = arith.mulf %277, %281 : vector<2x32xf32>
    %cst_73 = arith.constant dense<0.000000e+00> : vector<2x32xf32>
    %283 = tpu.matmul %282, %18, %cst_73 {dimension_numbers = #tpu.dot_dimension_numbers<[1], [0], [0], [1], [0, 0, 1, 1], [], []>, precision = #tpu.contract_precision<fp32>} : vector<2x32xf32>, vector<32x32xf32>, vector<2x32xf32> -> vector<2x32xf32>
    %284 = vector.broadcast %19 : vector<1x32xf32> to vector<2x32xf32>
    %285 = arith.addf %283, %284 : vector<2x32xf32>
    %cst_74 = arith.constant 0.000000e+00 : f32
    %286 = vector.broadcast %cst_74 : f32 to vector<2x32xf32>
    %287 = arith.maximumf %285, %286 : vector<2x32xf32>
    %cst_75 = arith.constant dense<0.000000e+00> : vector<2x128xf32>
    %288 = tpu.matmul %287, %20, %cst_75 {dimension_numbers = #tpu.dot_dimension_numbers<[1], [0], [0], [1], [0, 0, 1, 1], [], []>, precision = #tpu.contract_precision<fp32>} : vector<2x32xf32>, vector<32x128xf32>, vector<2x128xf32> -> vector<2x128xf32>
    %289 = vector.broadcast %21 : vector<1x128xf32> to vector<2x128xf32>
    %290 = arith.addf %288, %289 : vector<2x128xf32>
    %c4 = arith.constant 4 : index
    %c0_76 = arith.constant 0 : index
    %c0_77 = arith.constant 0 : index
    %291 = vector.load %arg11[%c4, %c0_76, %c0_77] : memref<8x2x128xf32, #tpu.memory_space<vmem>>, vector<1x2x128xf32>
    %292 = vector.shape_cast %291 : vector<1x2x128xf32> to vector<2x128xf32>
    %293 = vector.shape_cast %290 : vector<2x128xf32> to vector<1x2x128xf32>
    tpu.vector_store %arg11[%c4, %c0_76, %c0_77], %293 {strides = array<i32>} : memref<8x2x128xf32, #tpu.memory_space<vmem>>, vector<1x2x128xf32>,
    %cst_78 = arith.constant dense<0.000000e+00> : vector<2x128xf32>
    %294 = tpu.matmul %261, %14, %cst_78 {dimension_numbers = #tpu.dot_dimension_numbers<[1], [0], [0], [1], [0, 0, 1, 1], [], []>, precision = #tpu.contract_precision<fp32>} : vector<2x32xf32>, vector<32x128xf32>, vector<2x128xf32> -> vector<2x128xf32>
    %295 = arith.addf %12, %294 : vector<2x128xf32>
    %296 = vector.extract_strided_slice %295 {offsets = [0, 0], sizes = [2, 96], strides = [1, 1]} : vector<2x128xf32> to vector<2x96xf32>
    %297 = arith.negf %296 : vector<2x96xf32>
    %298 = math.exp %297 : vector<2x96xf32>
    %cst_79 = arith.constant 1.000000e+00 : f32
    %299 = vector.broadcast %cst_79 : f32 to vector<2x96xf32>
    %300 = arith.addf %299, %298 : vector<2x96xf32>
    %301 = arith.divf %299, %300 : vector<2x96xf32>
    %302 = vector.extract_strided_slice %295 {offsets = [0, 96], sizes = [2, 32], strides = [1, 1]} : vector<2x128xf32> to vector<2x32xf32>
    %303 = math.tanh %302 : vector<2x32xf32>
    %304 = vector.extract_strided_slice %301 {offsets = [0, 0], sizes = [2, 32], strides = [1, 1]} : vector<2x96xf32> to vector<2x32xf32>
    %305 = vector.extract_strided_slice %301 {offsets = [0, 32], sizes = [2, 32], strides = [1, 1]} : vector<2x96xf32> to vector<2x32xf32>
    %306 = vector.extract_strided_slice %301 {offsets = [0, 64], sizes = [2, 32], strides = [1, 1]} : vector<2x96xf32> to vector<2x32xf32>
    %307 = arith.mulf %305, %259 : vector<2x32xf32>
    %308 = arith.mulf %304, %303 : vector<2x32xf32>
    %309 = arith.addf %307, %308 : vector<2x32xf32>
    %310 = math.tanh %309 : vector<2x32xf32>
    %311 = arith.mulf %306, %310 : vector<2x32xf32>
    %cst_80 = arith.constant dense<0.000000e+00> : vector<2x128xf32>
    %312 = tpu.matmul %261, %16, %cst_80 {dimension_numbers = #tpu.dot_dimension_numbers<[1], [0], [0], [1], [0, 0, 1, 1], [], []>, precision = #tpu.contract_precision<fp32>} : vector<2x32xf32>, vector<32x128xf32>, vector<2x128xf32> -> vector<2x128xf32>
    %cst_81 = arith.constant dense<0.000000e+00> : vector<2x128xf32>
    %313 = tpu.matmul %282, %15, %cst_81 {dimension_numbers = #tpu.dot_dimension_numbers<[1], [0], [0], [1], [0, 0, 1, 1], [], []>, precision = #tpu.contract_precision<fp32>} : vector<2x32xf32>, vector<32x128xf32>, vector<2x128xf32> -> vector<2x128xf32>
    %314 = arith.addf %312, %313 : vector<2x128xf32>
    %315 = vector.broadcast %17 : vector<1x128xf32> to vector<2x128xf32>
    %316 = arith.addf %314, %315 : vector<2x128xf32>
    %317 = vector.extract_strided_slice %316 {offsets = [0, 0], sizes = [2, 96], strides = [1, 1]} : vector<2x128xf32> to vector<2x96xf32>
    %318 = arith.negf %317 : vector<2x96xf32>
    %319 = math.exp %318 : vector<2x96xf32>
    %cst_82 = arith.constant 1.000000e+00 : f32
    %320 = vector.broadcast %cst_82 : f32 to vector<2x96xf32>
    %321 = arith.addf %320, %319 : vector<2x96xf32>
    %322 = arith.divf %320, %321 : vector<2x96xf32>
    %323 = vector.extract_strided_slice %316 {offsets = [0, 96], sizes = [2, 32], strides = [1, 1]} : vector<2x128xf32> to vector<2x32xf32>
    %324 = math.tanh %323 : vector<2x32xf32>
    %325 = vector.extract_strided_slice %322 {offsets = [0, 0], sizes = [2, 32], strides = [1, 1]} : vector<2x96xf32> to vector<2x32xf32>
    %326 = vector.extract_strided_slice %322 {offsets = [0, 32], sizes = [2, 32], strides = [1, 1]} : vector<2x96xf32> to vector<2x32xf32>
    %327 = vector.extract_strided_slice %322 {offsets = [0, 64], sizes = [2, 32], strides = [1, 1]} : vector<2x96xf32> to vector<2x32xf32>
    %328 = arith.mulf %326, %280 : vector<2x32xf32>
    %329 = arith.mulf %325, %324 : vector<2x32xf32>
    %330 = arith.addf %328, %329 : vector<2x32xf32>
    %331 = math.tanh %330 : vector<2x32xf32>
    %332 = arith.mulf %327, %331 : vector<2x32xf32>
    %cst_83 = arith.constant dense<0.000000e+00> : vector<2x32xf32>
    %333 = tpu.matmul %332, %18, %cst_83 {dimension_numbers = #tpu.dot_dimension_numbers<[1], [0], [0], [1], [0, 0, 1, 1], [], []>, precision = #tpu.contract_precision<fp32>} : vector<2x32xf32>, vector<32x32xf32>, vector<2x32xf32> -> vector<2x32xf32>
    %334 = vector.broadcast %19 : vector<1x32xf32> to vector<2x32xf32>
    %335 = arith.addf %333, %334 : vector<2x32xf32>
    %cst_84 = arith.constant 0.000000e+00 : f32
    %336 = vector.broadcast %cst_84 : f32 to vector<2x32xf32>
    %337 = arith.maximumf %335, %336 : vector<2x32xf32>
    %cst_85 = arith.constant dense<0.000000e+00> : vector<2x128xf32>
    %338 = tpu.matmul %337, %20, %cst_85 {dimension_numbers = #tpu.dot_dimension_numbers<[1], [0], [0], [1], [0, 0, 1, 1], [], []>, precision = #tpu.contract_precision<fp32>} : vector<2x32xf32>, vector<32x128xf32>, vector<2x128xf32> -> vector<2x128xf32>
    %339 = vector.broadcast %21 : vector<1x128xf32> to vector<2x128xf32>
    %340 = arith.addf %338, %339 : vector<2x128xf32>
    %c5 = arith.constant 5 : index
    %c0_86 = arith.constant 0 : index
    %c0_87 = arith.constant 0 : index
    %341 = vector.load %arg11[%c5, %c0_86, %c0_87] : memref<8x2x128xf32, #tpu.memory_space<vmem>>, vector<1x2x128xf32>
    %342 = vector.shape_cast %341 : vector<1x2x128xf32> to vector<2x128xf32>
    %343 = vector.shape_cast %340 : vector<2x128xf32> to vector<1x2x128xf32>
    tpu.vector_store %arg11[%c5, %c0_86, %c0_87], %343 {strides = array<i32>} : memref<8x2x128xf32, #tpu.memory_space<vmem>>, vector<1x2x128xf32>,
    %cst_88 = arith.constant dense<0.000000e+00> : vector<2x128xf32>
    %344 = tpu.matmul %311, %14, %cst_88 {dimension_numbers = #tpu.dot_dimension_numbers<[1], [0], [0], [1], [0, 0, 1, 1], [], []>, precision = #tpu.contract_precision<fp32>} : vector<2x32xf32>, vector<32x128xf32>, vector<2x128xf32> -> vector<2x128xf32>
    %345 = arith.addf %13, %344 : vector<2x128xf32>
    %346 = vector.extract_strided_slice %345 {offsets = [0, 0], sizes = [2, 96], strides = [1, 1]} : vector<2x128xf32> to vector<2x96xf32>
    %347 = arith.negf %346 : vector<2x96xf32>
    %348 = math.exp %347 : vector<2x96xf32>
    %cst_89 = arith.constant 1.000000e+00 : f32
    %349 = vector.broadcast %cst_89 : f32 to vector<2x96xf32>
    %350 = arith.addf %349, %348 : vector<2x96xf32>
    %351 = arith.divf %349, %350 : vector<2x96xf32>
    %352 = vector.extract_strided_slice %345 {offsets = [0, 96], sizes = [2, 32], strides = [1, 1]} : vector<2x128xf32> to vector<2x32xf32>
    %353 = math.tanh %352 : vector<2x32xf32>
    %354 = vector.extract_strided_slice %351 {offsets = [0, 0], sizes = [2, 32], strides = [1, 1]} : vector<2x96xf32> to vector<2x32xf32>
    %355 = vector.extract_strided_slice %351 {offsets = [0, 32], sizes = [2, 32], strides = [1, 1]} : vector<2x96xf32> to vector<2x32xf32>
    %356 = vector.extract_strided_slice %351 {offsets = [0, 64], sizes = [2, 32], strides = [1, 1]} : vector<2x96xf32> to vector<2x32xf32>
    %357 = arith.mulf %355, %309 : vector<2x32xf32>
    %358 = arith.mulf %354, %353 : vector<2x32xf32>
    %359 = arith.addf %357, %358 : vector<2x32xf32>
    %360 = math.tanh %359 : vector<2x32xf32>
    %361 = arith.mulf %356, %360 : vector<2x32xf32>
    %cst_90 = arith.constant dense<0.000000e+00> : vector<2x128xf32>
    %362 = tpu.matmul %311, %16, %cst_90 {dimension_numbers = #tpu.dot_dimension_numbers<[1], [0], [0], [1], [0, 0, 1, 1], [], []>, precision = #tpu.contract_precision<fp32>} : vector<2x32xf32>, vector<32x128xf32>, vector<2x128xf32> -> vector<2x128xf32>
    %cst_91 = arith.constant dense<0.000000e+00> : vector<2x128xf32>
    %363 = tpu.matmul %332, %15, %cst_91 {dimension_numbers = #tpu.dot_dimension_numbers<[1], [0], [0], [1], [0, 0, 1, 1], [], []>, precision = #tpu.contract_precision<fp32>} : vector<2x32xf32>, vector<32x128xf32>, vector<2x128xf32> -> vector<2x128xf32>
    %364 = arith.addf %362, %363 : vector<2x128xf32>
    %365 = vector.broadcast %17 : vector<1x128xf32> to vector<2x128xf32>
    %366 = arith.addf %364, %365 : vector<2x128xf32>
    %367 = vector.extract_strided_slice %366 {offsets = [0, 0], sizes = [2, 96], strides = [1, 1]} : vector<2x128xf32> to vector<2x96xf32>
    %368 = arith.negf %367 : vector<2x96xf32>
    %369 = math.exp %368 : vector<2x96xf32>
    %cst_92 = arith.constant 1.000000e+00 : f32
    %370 = vector.broadcast %cst_92 : f32 to vector<2x96xf32>
    %371 = arith.addf %370, %369 : vector<2x96xf32>
    %372 = arith.divf %370, %371 : vector<2x96xf32>
    %373 = vector.extract_strided_slice %366 {offsets = [0, 96], sizes = [2, 32], strides = [1, 1]} : vector<2x128xf32> to vector<2x32xf32>
    %374 = math.tanh %373 : vector<2x32xf32>
    %375 = vector.extract_strided_slice %372 {offsets = [0, 0], sizes = [2, 32], strides = [1, 1]} : vector<2x96xf32> to vector<2x32xf32>
    %376 = vector.extract_strided_slice %372 {offsets = [0, 32], sizes = [2, 32], strides = [1, 1]} : vector<2x96xf32> to vector<2x32xf32>
    %377 = vector.extract_strided_slice %372 {offsets = [0, 64], sizes = [2, 32], strides = [1, 1]} : vector<2x96xf32> to vector<2x32xf32>
    %378 = arith.mulf %376, %330 : vector<2x32xf32>
    %379 = arith.mulf %375, %374 : vector<2x32xf32>
    %380 = arith.addf %378, %379 : vector<2x32xf32>
    %381 = math.tanh %380 : vector<2x32xf32>
    %382 = arith.mulf %377, %381 : vector<2x32xf32>
    %cst_93 = arith.constant dense<0.000000e+00> : vector<2x32xf32>
    %383 = tpu.matmul %382, %18, %cst_93 {dimension_numbers = #tpu.dot_dimension_numbers<[1], [0], [0], [1], [0, 0, 1, 1], [], []>, precision = #tpu.contract_precision<fp32>} : vector<2x32xf32>, vector<32x32xf32>, vector<2x32xf32> -> vector<2x32xf32>
    %384 = vector.broadcast %19 : vector<1x32xf32> to vector<2x32xf32>
    %385 = arith.addf %383, %384 : vector<2x32xf32>
    %cst_94 = arith.constant 0.000000e+00 : f32
    %386 = vector.broadcast %cst_94 : f32 to vector<2x32xf32>
    %387 = arith.maximumf %385, %386 : vector<2x32xf32>
    %cst_95 = arith.constant dense<0.000000e+00> : vector<2x128xf32>
    %388 = tpu.matmul %387, %20, %cst_95 {dimension_numbers = #tpu.dot_dimension_numbers<[1], [0], [0], [1], [0, 0, 1, 1], [], []>, precision = #tpu.contract_precision<fp32>} : vector<2x32xf32>, vector<32x128xf32>, vector<2x128xf32> -> vector<2x128xf32>
    %389 = vector.broadcast %21 : vector<1x128xf32> to vector<2x128xf32>
    %390 = arith.addf %388, %389 : vector<2x128xf32>
    %c6 = arith.constant 6 : index
    %c0_96 = arith.constant 0 : index
    %c0_97 = arith.constant 0 : index
    %391 = vector.load %arg11[%c6, %c0_96, %c0_97] : memref<8x2x128xf32, #tpu.memory_space<vmem>>, vector<1x2x128xf32>
    %392 = vector.shape_cast %391 : vector<1x2x128xf32> to vector<2x128xf32>
    %393 = vector.shape_cast %390 : vector<2x128xf32> to vector<1x2x128xf32>
    tpu.vector_store %arg11[%c6, %c0_96, %c0_97], %393 {strides = array<i32>} : memref<8x2x128xf32, #tpu.memory_space<vmem>>, vector<1x2x128xf32>,
    %cst_98 = arith.constant dense<0.000000e+00> : vector<2x128xf32>
    %394 = tpu.matmul %361, %16, %cst_98 {dimension_numbers = #tpu.dot_dimension_numbers<[1], [0], [0], [1], [0, 0, 1, 1], [], []>, precision = #tpu.contract_precision<fp32>} : vector<2x32xf32>, vector<32x128xf32>, vector<2x128xf32> -> vector<2x128xf32>
    %cst_99 = arith.constant dense<0.000000e+00> : vector<2x128xf32>
    %395 = tpu.matmul %382, %15, %cst_99 {dimension_numbers = #tpu.dot_dimension_numbers<[1], [0], [0], [1], [0, 0, 1, 1], [], []>, precision = #tpu.contract_precision<fp32>} : vector<2x32xf32>, vector<32x128xf32>, vector<2x128xf32> -> vector<2x128xf32>
    %396 = arith.addf %394, %395 : vector<2x128xf32>
    %397 = vector.broadcast %17 : vector<1x128xf32> to vector<2x128xf32>
    %398 = arith.addf %396, %397 : vector<2x128xf32>
    %399 = vector.extract_strided_slice %398 {offsets = [0, 0], sizes = [2, 96], strides = [1, 1]} : vector<2x128xf32> to vector<2x96xf32>
    %400 = arith.negf %399 : vector<2x96xf32>
    %401 = math.exp %400 : vector<2x96xf32>
    %cst_100 = arith.constant 1.000000e+00 : f32
    %402 = vector.broadcast %cst_100 : f32 to vector<2x96xf32>
    %403 = arith.addf %402, %401 : vector<2x96xf32>
    %404 = arith.divf %402, %403 : vector<2x96xf32>
    %405 = vector.extract_strided_slice %398 {offsets = [0, 96], sizes = [2, 32], strides = [1, 1]} : vector<2x128xf32> to vector<2x32xf32>
    %406 = math.tanh %405 : vector<2x32xf32>
    %407 = vector.extract_strided_slice %404 {offsets = [0, 0], sizes = [2, 32], strides = [1, 1]} : vector<2x96xf32> to vector<2x32xf32>
    %408 = vector.extract_strided_slice %404 {offsets = [0, 32], sizes = [2, 32], strides = [1, 1]} : vector<2x96xf32> to vector<2x32xf32>
    %409 = vector.extract_strided_slice %404 {offsets = [0, 64], sizes = [2, 32], strides = [1, 1]} : vector<2x96xf32> to vector<2x32xf32>
    %410 = arith.mulf %408, %380 : vector<2x32xf32>
    %411 = arith.mulf %407, %406 : vector<2x32xf32>
    %412 = arith.addf %410, %411 : vector<2x32xf32>
    %413 = math.tanh %412 : vector<2x32xf32>
    %414 = arith.mulf %409, %413 : vector<2x32xf32>
    %cst_101 = arith.constant dense<0.000000e+00> : vector<2x32xf32>
    %415 = tpu.matmul %414, %18, %cst_101 {dimension_numbers = #tpu.dot_dimension_numbers<[1], [0], [0], [1], [0, 0, 1, 1], [], []>, precision = #tpu.contract_precision<fp32>} : vector<2x32xf32>, vector<32x32xf32>, vector<2x32xf32> -> vector<2x32xf32>
    %416 = vector.broadcast %19 : vector<1x32xf32> to vector<2x32xf32>
    %417 = arith.addf %415, %416 : vector<2x32xf32>
    %cst_102 = arith.constant 0.000000e+00 : f32
    %418 = vector.broadcast %cst_102 : f32 to vector<2x32xf32>
    %419 = arith.maximumf %417, %418 : vector<2x32xf32>
    %cst_103 = arith.constant dense<0.000000e+00> : vector<2x128xf32>
    %420 = tpu.matmul %419, %20, %cst_103 {dimension_numbers = #tpu.dot_dimension_numbers<[1], [0], [0], [1], [0, 0, 1, 1], [], []>, precision = #tpu.contract_precision<fp32>} : vector<2x32xf32>, vector<32x128xf32>, vector<2x128xf32> -> vector<2x128xf32>
    %421 = vector.broadcast %21 : vector<1x128xf32> to vector<2x128xf32>
    %422 = arith.addf %420, %421 : vector<2x128xf32>
    %c7 = arith.constant 7 : index
    %c0_104 = arith.constant 0 : index
    %c0_105 = arith.constant 0 : index
    %423 = vector.load %arg11[%c7, %c0_104, %c0_105] : memref<8x2x128xf32, #tpu.memory_space<vmem>>, vector<1x2x128xf32>
    %424 = vector.shape_cast %423 : vector<1x2x128xf32> to vector<2x128xf32>
    %425 = vector.shape_cast %422 : vector<2x128xf32> to vector<1x2x128xf32>
    tpu.vector_store %arg11[%c7, %c0_104, %c0_105], %425 {strides = array<i32>} : memref<8x2x128xf32, #tpu.memory_space<vmem>>, vector<1x2x128xf32>,
    %c0_106 = arith.constant 0 : index
    %c0_107 = arith.constant 0 : index
    %c0_108 = arith.constant 0 : index
    %426 = vector.load %arg12[%c0_106, %c0_107, %c0_108] : memref<2x2x32xf32, #tpu.memory_space<vmem>>, vector<1x2x32xf32>
    %427 = vector.shape_cast %426 : vector<1x2x32xf32> to vector<2x32xf32>
    %428 = vector.shape_cast %361 : vector<2x32xf32> to vector<1x2x32xf32>
    tpu.vector_store %arg12[%c0_106, %c0_107, %c0_108], %428 {strides = array<i32>} : memref<2x2x32xf32, #tpu.memory_space<vmem>>, vector<1x2x32xf32>,
    %c0_109 = arith.constant 0 : index
    %c0_110 = arith.constant 0 : index
    %c0_111 = arith.constant 0 : index
    %429 = vector.load %arg13[%c0_109, %c0_110, %c0_111] : memref<2x2x32xf32, #tpu.memory_space<vmem>>, vector<1x2x32xf32>
    %430 = vector.shape_cast %429 : vector<1x2x32xf32> to vector<2x32xf32>
    %431 = vector.shape_cast %359 : vector<2x32xf32> to vector<1x2x32xf32>
    tpu.vector_store %arg13[%c0_109, %c0_110, %c0_111], %431 {strides = array<i32>} : memref<2x2x32xf32, #tpu.memory_space<vmem>>, vector<1x2x32xf32>,
    %c1_112 = arith.constant 1 : index
    %c0_113 = arith.constant 0 : index
    %c0_114 = arith.constant 0 : index
    %432 = vector.load %arg12[%c1_112, %c0_113, %c0_114] : memref<2x2x32xf32, #tpu.memory_space<vmem>>, vector<1x2x32xf32>
    %433 = vector.shape_cast %432 : vector<1x2x32xf32> to vector<2x32xf32>
    %434 = vector.shape_cast %414 : vector<2x32xf32> to vector<1x2x32xf32>
    tpu.vector_store %arg12[%c1_112, %c0_113, %c0_114], %434 {strides = array<i32>} : memref<2x2x32xf32, #tpu.memory_space<vmem>>, vector<1x2x32xf32>,
    %c1_115 = arith.constant 1 : index
    %c0_116 = arith.constant 0 : index
    %c0_117 = arith.constant 0 : index
    %435 = vector.load %arg13[%c1_115, %c0_116, %c0_117] : memref<2x2x32xf32, #tpu.memory_space<vmem>>, vector<1x2x32xf32>
    %436 = vector.shape_cast %435 : vector<1x2x32xf32> to vector<2x32xf32>
    %437 = vector.shape_cast %412 : vector<2x32xf32> to vector<1x2x32xf32>
    tpu.vector_store %arg13[%c1_115, %c0_116, %c0_117], %437 {strides = array<i32>} : memref<2x2x32xf32, #tpu.memory_space<vmem>>, vector<1x2x32xf32>,
    return
  }
}

</mosaic_0001>

<bundles_post_ra>
// kernel: weather_lstm_forward.1
= control target key start
LH: loop header
LB: loop body
LE: loop exit
PB: predicated region body
PF: predicated region fallthrough
CT: control target
= control target key end

     0   :  { %19 = vsyncpa [#allocation3], 0  ;;  %s10889_s0 = inlined_call_operand.vmem [shape: f32[16,4], index: 0, kind: input, shape index: {}]   ;;  %s10890_s1 = inlined_call_operand.vmem [shape: f32[4,128], index: 1, kind: input, shape index: {}]   ;;  %s10891_s2 = inlined_call_operand.hbm [shape: f32[32,128], index: 2, kind: input, shape index: {}]   ;;  %s10892_s3 = inlined_call_operand.vmem [shape: f32[1,128], index: 3, kind: input, shape index: {}]   ;;  %s10893_s4 = inlined_call_operand.hbm [shape: f32[32,128], index: 4, kind: input, shape index: {}]   ;;  %s10894_s5 = inlined_call_operand.hbm [shape: f32[32,128], index: 5, kind: input, shape index: {}]   ;;  %s10895_s6 = inlined_call_operand.vmem [shape: f32[1,128], index: 6, kind: input, shape index: {}]   ;;  %s10896_s7 = inlined_call_operand.hbm [shape: f32[32,32], index: 7, kind: input, shape index: {}]   ;;  %s10897_s8 = inlined_call_operand.vmem [shape: f32[1,32], index: 8, kind: input, shape index: {}]   ;;  %s10898_s9 = inlined_call_operand.hbm [shape: f32[32,128], index: 9, kind: input, shape index: {}]   ;;  %s10899_s10 = inlined_call_operand.vmem [shape: f32[1,128], index: 10, kind: input, shape index: {}]   ;;  %s10900_s11 = inlined_call_operand.vmem [shape: f32[8,2,128], index: 11, kind: output, shape index: {0}]   ;;  %s10901_s12 = inlined_call_operand.hbm [shape: f32[2,2,32], index: 12, kind: output, shape index: {1}]   ;;  %s10902_s13 = inlined_call_operand.hbm [shape: f32[2,2,32], index: 13, kind: output, shape index: {2}]  }
   0x1   :  { %20 = vsyncpa [#allocation6], 0 }
   0x2   :  { %21 = vsyncpa [#allocation9], 0 }
   0x3   :  { %22 = vsyncpa [#allocation4], 0 }
   0x4   :  { %23 = vsyncpa [#allocation13], 0  ;;  %s47_s27 = sshll.u32 %s10893_s4, 4  ;;  %s8952_s28 = smov [#allocation5]   ;;  %s48_s27 = int_to_ptr.hbm [resolvable:$true] %s47_s27 }
   0x5   :  { %s49_s29 = sshll.u32 %s8952_s28, 4  ;;  %s75_s15 = sshll.u32 %s10896_s7, 4  ;;  %s50_s29 = int_to_ptr.vmem [resolvable:$true] %s49_s29  ;;  %s76_s15 = int_to_ptr.hbm [resolvable:$true] %s75_s15 }
   0x6   :  { %s8953_s16 = smov 128   ;;  %s8954_s17 = smov 8  }
   0x7   :  { %55 = dma.hbm_to_vmem [thread:$0]  %s48_s27, 512, %s50_s29, [#allocation6], %s8953_s16, %s8953_s16, %s8954_s17  }
   0x8   :  { %s8955_s18 = smov [#allocation8]   ;;  %s32_s22 = sshll.u32 %s10891_s2, 4  ;;  %s33_s22 = int_to_ptr.hbm [resolvable:$true] %s32_s22 }
   0x9   :  { %s77_s19 = sshll.u32 %s8955_s18, 4  ;;  %s60_s24 = sshll.u32 %s10894_s5, 4  ;;  %s78_s19 = int_to_ptr.vmem [resolvable:$true] %s77_s19  ;;  %s61_s24 = int_to_ptr.hbm [resolvable:$true] %s60_s24 }
   0xa   :  { %83 = dma.hbm_to_vmem [thread:$0]  %s76_s15, 512, %s78_s19, [#allocation9], %s8953_s16, %s8953_s16, %s8954_s17  }
   0xb   :  { %s8956_s25 = smov [#allocation2]   ;;  %s8957_s7 = smov [#allocation7]  }
   0xc   :  { %s34_s26 = sshll.u32 %s8956_s25, 4  ;;  %s62_s27 = sshll.u32 %s8957_s7, 4  ;;  %s35_s26 = int_to_ptr.vmem [resolvable:$true] %s34_s26  ;;  %s63_s27 = int_to_ptr.vmem [resolvable:$true] %s62_s27 }
   0xd   :  { %40 = dma.hbm_to_vmem [thread:$0]  %s33_s22, 512, %s35_s26, [#allocation3], %s8953_s16, %s8953_s16, %s8954_s17  }
   0xe   :  { %s90_s30 = sshll.u32 %s10898_s9, 4  ;;  %s8958_s2 = smov [#allocation10]   ;;  %s91_s30 = int_to_ptr.hbm [resolvable:$true] %s90_s30 }
   0xf   :  { %68 = dma.hbm_to_vmem [thread:$0]  %s61_s24, 512, %s63_s27, [#allocation6], %s8953_s16, %s8953_s16, %s8954_s17  }
  0x10   :  { %s92_s14 = sshll.u32 %s8958_s2, 4  ;;  %s93_s14 = int_to_ptr.vmem [resolvable:$true] %s92_s14 }
  0x11   :  { %98 = dma.hbm_to_vmem [thread:$0]  %s91_s30, 512, %s93_s14, [#allocation9], %s8953_s16, %s8953_s16, %s8954_s17  }
  0x12   :  { %8942 = dma.done.wait [#allocation3], 512  }
  0x13   :  { %8943 = vsyncadd [#allocation3], 4294966784 }
  0x14   :  { %8944 = dma.done.wait [#allocation6], 1024  }
  0x15   :  { %8945 = vsyncadd [#allocation6], 4294966272 }
  0x16   :  { %8946 = dma.done.wait [#allocation9], 1024  }
  0x17   :  { %8947 = vsyncadd [#allocation9], 4294966272  ;;  %vm135_vm0 = vcmask 1043456   ;;  %vm128_vm1 = vcmask 31744   ;;  %v123_v0 = vld [vmem:[%s10890_s1] sm:$0xf] }
  0x18   :  { %v121_v1 = vld [vmem:[%s10889_s0] sm:$0xff]  ;;  %v319_v2 = vld [vmem:[#allocation2 + $0x18] sm:$0xff]  ;;  %v137_v3 = vsel %vm135_vm0, %v123_v0, 0  ;;  %v318_v6 = vld [vmem:[#allocation2 + $0x10] sm:$0xff]  ;;  %v8959_v45 = vmov 0.0   ;;  %s8960_s19 = smov 32  }
  0x19   :  { %v130_v4 = vsel %vm128_vm1, %v121_v1, 0  ;;  %v9057_v5 = vand.u32 4294901760, %v319_v2  ;;  %v122_v7 = vld [vmem:[%s10889_s0 + $0x8] sm:$0xff]  ;;  %v154_v9 = vand.u32 4294901760, %v137_v3  ;;  %v9064_v11 = vand.u32 4294901760, %v318_v6  ;;  %v316_v13 = vld [vmem:[#allocation2] sm:$0xff] }
  0x1a   :  { %v317_v8 = vld [vmem:[#allocation2 + $0x8] sm:$0xff]  ;;  %v9062_v10 = vand.u32 4294901760, %v130_v4  ;;  %v133_v12 = vsel %vm128_vm1, %v122_v7, 0  ;;  %v9073_v17 = vand.u32 4294901760, %v316_v13  ;;  %v8632_v54 = vld [vmem:[%s10892_s3] ss:$0 sm:$0xff] }
  0x1b   :  { %v9067_v14 = vsub.f32 %v319_v2, %v9057_v5  ;;  %v9069_v15 = vand.u32 4294901760, %v133_v12  ;;  %v9071_v16 = vand.u32 4294901760, %v317_v8  ;;  %v189_v18 = vsub.f32 %v137_v3, %v154_v9  ;;  %248 = vmatpush.msra.mxu3 %v154_v9  ;;  %155 = vmatpush.msra.mxu0 %v154_v9  ;;  %s8961_s20 = smov 64   ;;  %s8560_s16 = sshll.u32 %s10901_s12, 4  ;;  %s8561_s16 = int_to_ptr.hbm [resolvable:$true] %s8560_s16 }
  0x1c   :  { %v157_v19 = vsub.f32 %v130_v4, %v9062_v10  ;;  %v9077_v20 = vsub.f32 %v318_v6, %v9064_v11  ;;  %v9087_v24 = vsub.f32 %v316_v13, %v9073_v17  ;;  %vm339_vm6 = vcmask 261120   ;;  %s8964_s17 = smov [#allocation12]   ;;  %s8965_s0 = smov 2  }
  0x1d   :  { %v9080_v21 = vand.u32 4294901760, %v9067_v14  ;;  %v165_v22 = vsub.f32 %v133_v12, %v9069_v15  ;;  %v9084_v23 = vsub.f32 %v317_v8, %v9071_v16  ;;  %220 = vmatpush.msra.mxu2 %v189_v18  ;;  %v190_v26 = vand.u32 4294901760, %v189_v18  ;;  %s8573_s22 = sshll.u32 %s10902_s13, 4  ;;  %s8574_s22 = int_to_ptr.hbm [resolvable:$true] %s8573_s22 }
  0x1e   :  { %11084 = vst [vmem:[#allocation19_spill] sm:$0xff] %v9087_v24  ;;  %v158_v25 = vand.u32 4294901760, %v157_v19  ;;  %v9090_v27 = vand.u32 4294901760, %v9077_v20  ;;  %223 = vmatmul.f32.vlgmr.msra.gmra.mxu2 %v157_v19  ;;  %v9098_v30 = vand.u32 4294901760, %v9087_v24 }
  0x1f   :  { %v387_v28 = vsub.f32 %v9067_v14, %v9080_v21  ;;  %v9095_v29 = vand.u32 4294901760, %v9084_v23  ;;  %356 = vmatpush.msrb.mxu2 %v9057_v5  ;;  %v191_v32 = vsub.f32 %v189_v18, %v190_v26  ;;  %v166_v34 = vand.u32 4294901760, %v165_v22  ;;  %280 = vmatpush.msrb.mxu0 %v190_v26 }
  0x20   :  { %252 = vmatmul.f32.vlgmr.msra.gmra.mxu3 %v158_v25  ;;  %v159_v31 = vsub.f32 %v157_v19, %v158_v25  ;;  %v393_v33 = vsub.f32 %v9077_v20, %v9090_v27  ;;  %v405_v37 = vsub.f32 %v9087_v24, %v9098_v30 }
  0x21   :  { %v9103_v35 = vand.u32 4294901760, %v387_v28  ;;  %v399_v36 = vsub.f32 %v9084_v23, %v9095_v29  ;;  %v192_v39 = vand.u32 4294901760, %v191_v32  ;;  %358 = vmatpush.msrb.mxu2 %v9064_v11  ;;  %v167_v42 = vsub.f32 %v165_v22, %v166_v34 }
  0x22   :  { %v160_v38 = vand.u32 4294901760, %v159_v31  ;;  %v9110_v40 = vand.u32 4294901760, %v393_v33  ;;  %v9117_v43 = vand.u32 4294901760, %v405_v37 }
  0x23   :  { %11085 = vst [vmem:[#allocation20_spill] sm:$0xff] %v9103_v35  ;;  %389 = vmatpush.msrb.mxu3 %v9103_v35  ;;  %v9113_v41 = vand.u32 4294901760, %v399_v36  ;;  %193 = vmatpush.msra.mxu1 %v192_v39  ;;  %v168_v44 = vand.u32 4294901760, %v167_v42 }
  0x24   :  { %11086 = vst [vmem:[#allocation21_spill] sm:$0xff] %v9110_v40  ;;  %161 = vmatmul.f32.vlgmr.msra.gmra.mxu0 %v160_v38  ;;  %195 = vmatmul.f32.vlgmr.msra.gmra.mxu1 %v9062_v10 }
  0x25   :  { %11087 = vst [vmem:[#allocation22_spill] sm:$0xff] %v9113_v41  ;;  %395 = vmatpush.msrb.mxu3 %v9110_v40  ;;  %306 = vmatpush.msrb.mxu1 %v154_v9 }
  0x26   :  { %11088 = vst [vmem:[#allocation23_spill] sm:$0xff] %v9117_v43  ;;  %360 = vmatpush.msrb.mxu2 %v9071_v16  ;;  %485 = vmatpush.msra.mxu0 %v9080_v21 }
  0x27   :  { %228 = vmatmul.f32.gmra.mxu2 %v165_v22  ;;  %401 = vmatpush.msrb.mxu3 %v9113_v41 }
  0x28   :  { %258 = vmatmul.f32.gmra.mxu3 %v166_v34  ;;  %362 = vmatpush.msrb.mxu2 %v9073_v17 }
  0x29   :  { %407 = vmatpush.msrb.mxu3 %v9117_v43  ;;  %516 = vmatpush.msra.mxu1 %v9057_v5 }
  0x2a   :  { %427 = vmatpush.msra.mxu2 %v9067_v14  ;;  %489 = vmatpush.msra.mxu0 %v9090_v27 }
  0x2b   :  { %456 = vmatpush.msra.mxu3 %v9057_v5  ;;  %518 = vmatpush.msra.mxu1 %v9064_v11 }
  0x2c   :  { %430 = vmatpush.msra.mxu2 %v9077_v20  ;;  %169 = vmatmul.f32.gmra.mxu0 %v168_v44 }
  0x2d   :  { %458 = vmatpush.msra.mxu3 %v9064_v11  ;;  %199 = vmatmul.f32.gmra.mxu1 %v9069_v15 }
  0x2e   :  { %433 = vmatpush.msra.mxu2 %v9084_v23  ;;  %493 = vmatpush.msra.mxu0 %v9095_v29 }
  0x2f   :  { %460 = vmatpush.msra.mxu3 %v9071_v16  ;;  %368 = vmatmul.f32.vlgmr.msrb.gmra.mxu2 %v8959_v45 }
  0x30   :  { %409 = vmatmul.f32.vlgmr.msrb.gmra.mxu3 %v8959_v45  ;;  %436 = vmatpush.msra.mxu2 %v9087_v24 }
  0x31   :  { %462 = vmatpush.msra.mxu3 %v9073_v17  ;;  %520 = vmatpush.msra.mxu1 %v9071_v16 }
  0x32   :  { %497 = vmatpush.msra.mxu0 %v9098_v30  ;;  %584 = vmatpush.msrb.mxu2 %v9057_v5 }
  0x33   :  { %617 = vmatpush.msrb.mxu3 %v9103_v35  ;;  %522 = vmatpush.msra.mxu1 %v9073_v17 }
  0x34   :  { %282 = vmatmul.f32.vlgmr.msrb.gmra.mxu0 %v9062_v10  ;;  %586 = vmatpush.msrb.mxu2 %v9064_v11 }
  0x35   :  { %308 = vmatmul.f32.vlgmr.msrb.gmra.mxu1 %v9062_v10  ;;  %623 = vmatpush.msrb.mxu3 %v9110_v40 }
  0x36   :  { %655 = vmatpush.msrb.mxu0 %v9067_v14  ;;  %684 = vmatpush.msrb.mxu1 %v9057_v5 }
  0x37   :  { %439 = vmatmul.f32.vlgmr.msra.gmra.mxu2 %v8959_v45  ;;  %629 = vmatpush.msrb.mxu3 %v9113_v41 }
  0x38   :  { %466 = vmatmul.f32.vlgmr.msra.gmra.mxu3 %v8959_v45  ;;  %658 = vmatpush.msrb.mxu0 %v9077_v20 }
  0x39   :  { %635 = vmatpush.msrb.mxu3 %v9117_v43  ;;  %686 = vmatpush.msrb.mxu1 %v9064_v11 }
  0x3a   :  { %661 = vmatpush.msrb.mxu0 %v9084_v23  ;;  %588 = vmatpush.msrb.mxu2 %v9071_v16 }
  0x3b   :  { %744 = vmatpush.msra.mxu3 %v9057_v5  ;;  %688 = vmatpush.msrb.mxu1 %v9071_v16 }
  0x3c   :  { %286 = vmatmul.f32.gmra.mxu0 %v9069_v15  ;;  %590 = vmatpush.msrb.mxu2 %v9073_v17 }
  0x3d   :  { %746 = vmatpush.msra.mxu3 %v9064_v11  ;;  %312 = vmatmul.f32.gmra.mxu1 %v9069_v15 }
  0x3e   :  { %664 = vmatpush.msrb.mxu0 %v9087_v24  ;;  %690 = vmatpush.msrb.mxu1 %v9073_v17 }
  0x3f   :  { %748 = vmatpush.msra.mxu3 %v9071_v16  ;;  %713 = vmatpush.msra.mxu2 %v9080_v21 }
  0x41   :  { %750 = vmatpush.msra.mxu3 %v9073_v17  ;;  %717 = vmatpush.msra.mxu2 %v9090_v27 }
  0x43   :  { %721 = vmatpush.msra.mxu2 %v9095_v29 }
  0x44   :  { %499 = vmatmul.f32.vlgmr.msra.gmra.mxu0 %v8959_v45 }
  0x45   :  { %524 = vmatmul.f32.vlgmr.msra.gmra.mxu1 %v8959_v45  ;;  %725 = vmatpush.msra.mxu2 %v9098_v30 }
  0xa1   :  { %v162_v46 = vpop.f32.mrf.mxu0  ;;  %v224_v47 = vpop.f32.mrf.mxu2 }
  0xa2   :  { %v196_v48 = vpop.f32.mrf.mxu1  ;;  %v163_v56 = vadd.f32 %v8632_v54, %v162_v46 }
  0xa3   :  { %v253_v49 = vpop.f32.mrf.mxu3 }
  0xa4   :  { %v197_v60 = vadd.f32 %v196_v48, %v163_v56  ;;  %v323_v56 = vld [vmem:[#allocation7 + $0x18] sm:$0xff] }
  0xa6   :  { %v225_v62 = vadd.f32 %v224_v47, %v197_v60 }
  0xa8   :  { %v254_v4 = vadd.f32 %v253_v49, %v225_v62  ;;  %v321_v62 = vld [vmem:[#allocation7 + $0x8] sm:$0xff] }
  0xa9   :  { %v9174_v50 = vpop.f32.mrf.mxu0 }
  0xaa   :  { %11089 = vst [vmem:[#allocation24_spill] sm:$0xff] %v9174_v50  ;;  %v9176_v51 = vpop.f32.mrf.mxu2  ;;  %v9178_v52 = vpop.f32.mrf.mxu1 }
  0xab   :  { %11090 = vst [vmem:[#allocation25_spill] sm:$0xff] %v9176_v51  ;;  %v9180_v53 = vpop.f32.mrf.mxu3 }
  0xac   :  { %11091 = vst [vmem:[#allocation26_spill] sm:$0xff] %v9178_v52 }
  0xad   :  { %11092 = vst [vmem:[#allocation27_spill] sm:$0xff] %v9180_v53 }
  0xb1   :  { %v283_v55 = vpop.f32.mrf.mxu0 }
  0xb2   :  { %v369_v57 = vpop.f32.mrf.mxu2  ;;  %v309_v58 = vpop.f32.mrf.mxu1  ;;  %v284_v6 = vadd.f32 %v283_v55, %v254_v4 }
  0xb3   :  { %v410_v59 = vpop.f32.mrf.mxu3 }
  0xb4   :  { %v411_v63 = vadd.f32 %v410_v59, %v369_v57  ;;  %v9189_v12 = vadd.f32 %v309_v58, %v284_v6  ;;  %v9199_v57 = vand.u32 4294901760, %v323_v56  ;;  %v322_v58 = vld [vmem:[#allocation7 + $0x10] sm:$0xff] }
  0xb5   :  { %v9202_v59 = vand.u32 4294901760, %v322_v58 }
  0xb6   :  { %11095 = vst [vmem:[#allocation30_spill] sm:$0xff] %v9189_v12  ;;  %813 = vmatpush.msra.mxu0 %v9199_v57  ;;  %v9205_v60 = vsub.f32 %v323_v56, %v9199_v57 }
  0xb7   :  { %11096 = vst [vmem:[#allocation31_spill] sm:$0xff] %v9199_v57 }
  0xb8   :  { %11097 = vst [vmem:[#allocation32_spill] sm:$0xff] %v9202_v59  ;;  %815 = vmatpush.msra.mxu0 %v9202_v59 }
  0xb9   :  { %v9185_v61 = vpop.f32.mrf.mxu0 }
  0xba   :  { %11093 = vst [vmem:[#allocation28_spill] sm:$0xff] %v9185_v61  ;;  %v440_v0 = vpop.f32.mrf.mxu2  ;;  %v9187_v1 = vpop.f32.mrf.mxu1 }
  0xbb   :  { %11094 = vst [vmem:[#allocation29_spill] sm:$0xff] %v9187_v1  ;;  %v441_v2 = vadd.f32 %v440_v0, %v411_v63  ;;  %v467_v3 = vpop.f32.mrf.mxu3  ;;  %v9209_v63 = vand.u32 4294901760, %v9205_v60  ;;  %v9211_v0 = vand.u32 4294901760, %v321_v62 }
  0xbd   :  { %v468_v7 = vadd.f32 %v467_v3, %v441_v2  ;;  %11098 = vst [vmem:[#allocation33_spill] sm:$0xff] %v9209_v63  ;;  %v9214_v2 = vsub.f32 %v322_v58, %v9202_v59  ;;  %v320_v3 = vld [vmem:[#allocation7] sm:$0xff]  ;;  %v844_v4 = vsub.f32 %v9205_v60, %v9209_v63  ;;  %817 = vmatpush.msra.mxu0 %v9211_v0 }
  0xbe   :  { %11099 = vst [vmem:[#allocation34_spill] sm:$0xff] %v9211_v0 }
  0xbf   :  { %11100 = vst [vmem:[#allocation35_spill] sm:$0xff] %v9214_v2  ;;  %v9220_v6 = vand.u32 4294901760, %v9214_v2 }
  0xc1   :  { %v500_v8 = vpop.f32.mrf.mxu0  ;;  %11101 = vst [vmem:[#allocation36_spill] sm:$0xff] %v9220_v6 }
  0xc2   :  { %v501_v9 = vadd.f32 %v500_v8, %v468_v7  ;;  %v525_v10 = vpop.f32.mrf.mxu1  ;;  %v9222_v7 = vand.u32 4294901760, %v320_v3  ;;  %v9225_v8 = vsub.f32 %v321_v62, %v9211_v0 }
  0xc4   :  { %v526_v13 = vadd.f32 %v525_v10, %v501_v9  ;;  %11102 = vst [vmem:[#allocation37_spill] sm:$0xff] %v9222_v7  ;;  %v9227_v9 = vand.u32 4294901760, %v844_v4  ;;  %v850_v10 = vsub.f32 %v9214_v2, %v9220_v6  ;;  %819 = vmatpush.msra.mxu0 %v9222_v7 }
  0xc5   :  { %11103 = vst [vmem:[#allocation38_spill] sm:$0xff] %v9225_v8 }
  0xc6   :  { %v528_v15 = vadd.f32 %v526_v13, %v9189_v12  ;;  %v9233_v13 = vand.u32 4294901760, %v9225_v8  ;;  %846 = vmatpush.msra.mxu1 %v9227_v9 }
  0xc8   :  { %8636 = vtanh.f32 %v528_v15  ;;  %v8595_v19 = vmul.f32 -1.442695, %v528_v15  ;;  %11104 = vst [vmem:[#allocation39_spill] sm:$0xff] %v9233_v13  ;;  %v9236_v15 = vsub.f32 %v320_v3, %v9222_v7 }
  0xca   :  { %8638 = vpow2.f32 %v8595_v19  ;;  %11105 = vst [vmem:[#allocation40_spill] sm:$0xff] %v9236_v15  ;;  %v856_v19 = vsub.f32 %v9225_v8, %v9233_v13 }
  0xce   :  { %v8637_v18 = vpop.eup %8636 }
  0xcf   :  { %551 = vrot.lane.b32.xlu0 %v8637_v18, %s8960_s19  ;;  %v9239_v18 = vand.u32 4294901760, %v850_v10 }
  0xd0   :  { %v8639_v22 = vpop.eup %8638 }
  0xd1   :  { %v532_v25 = vadd.f32 1.0, %v8639_v22  ;;  %v9244_v22 = vand.u32 4294901760, %v9236_v15  ;;  %852 = vmatpush.msra.mxu1 %v9239_v18 }
  0xd3   :  { %8640 = vrcp.f32 %v532_v25  ;;  %v544_v34 = vand.u32 2147483648, %v532_v25  ;;  %vm538_vm3 = vweird.f32 %v532_v25  ;;  %v542_v36 = vand.u32 2147483647, %v532_v25  ;;  %11106 = vst [vmem:[#allocation41_spill] sm:$0xff] %v9244_v22 }
  0xd5   :  { %v545_v38 = vor.u32 1.1754944e-38, %v544_v34  ;;  %vm543_vm5 = vcmp.eq.f32.partialorder %v542_v36, 8.507059e+37  ;;  %v325_v34 = vld [vmem:[#allocation5 + $0x8] sm:$0xff] }
  0xd9   :  { %v8641_v26 = vpop.eup %8640 }
  0xda   :  { %v534_v28 = vmul.f32 %v8641_v26, %v532_v25  ;;  %vm539_vm2 = vweird.f32 %v8641_v26  ;;  %v9247_v25 = vand.u32 4294901760, %v856_v19 }
  0xdb   :  { %vm540_vm4 = vmor %vm538_vm3, %vm539_vm2 }
  0xdc   :  { %v535_v31 = vsub.f32 1.0, %v534_v28  ;;  %858 = vmatpush.msra.mxu1 %v9247_v25 }
  0xde   :  { %v536_v32 = vmul.f32 %v8641_v26, %v535_v31  ;;  %v327_v31 = vld [vmem:[#allocation5 + $0x18] sm:$0xff] }
  0xe0   :  { %v537_v33 = vadd.f32 %v8641_v26, %v536_v32  ;;  %v9255_v32 = vand.u32 4294901760, %v327_v31 }
  0xe2   :  { %v541_v37 = vsel %vm540_vm4, %v8641_v26, %v537_v33  ;;  %v862_v26 = vsub.f32 %v9236_v15, %v9244_v22  ;;  %11108 = vst [vmem:[#allocation43_spill] sm:$0xff] %v9255_v32  ;;  %v326_v33 = vld [vmem:[#allocation5 + $0x10] sm:$0xff] }
  0xe3   :  { %v546_v42 = vsel %vm543_vm5, %v545_v38, %v541_v37  ;;  %v9257_v36 = vand.u32 4294901760, %v326_v33  ;;  %v9260_v37 = vsub.f32 %v327_v31, %v9255_v32  ;;  %v9262_v38 = vand.u32 4294901760, %v325_v34 }
  0xe4   :  { %v549_v46 = vmul.f32 0.0, %v546_v42  ;;  %v9252_v28 = vand.u32 4294901760, %v862_v26 }
  0xe5   :  { %11109 = vst [vmem:[#allocation44_spill] sm:$0xff] %v9257_v36 }
  0xe6   :  { %11107 = vst [vmem:[#allocation42_spill] sm:$0xff] %v9252_v28  ;;  %864 = vmatpush.msra.mxu1 %v9252_v28 }
  0xe7   :  { %11110 = vst [vmem:[#allocation45_spill] sm:$0xff] %v9260_v37 }
  0xe8   :  { %11111 = vst [vmem:[#allocation46_spill] sm:$0xff] %v9262_v38 }
 0x141   :  { %v552_v39 = vpop.permute.xlu0 %551 }
 0x142   :  { %v554_v44 = vmul.f32 %v552_v39, %v546_v42  ;;  %v324_v39 = vld [vmem:[#allocation5] sm:$0xff] }
 0x144   :  { %556 = vrot.lane.b32.xlu0 %v554_v44, %s8960_s19 }
 0x1b6   :  { %v557_v47 = vpop.permute.xlu0 %556 }
 0x1b7   :  { %v9194_v48 = vadd.f32 %v557_v47, %v549_v46  ;;  %v9266_v46 = vsub.f32 %v326_v33, %v9257_v36 }
 0x1b9   :  { %8642 = vtanh.f32 %v9194_v48  ;;  %11112 = vst [vmem:[#allocation47_spill] sm:$0xff] %v9266_v46  ;;  %v9282_v58 = vand.u32 4294901760, %v9266_v46 }
 0x1bb   :  { %11116 = vst [vmem:[#allocation51_spill] sm:$0xff] %v9282_v58  ;;  %v1035_v26 = vsub.f32 %v9266_v46, %v9282_v58 }
 0x1bf   :  { %v8643_v49 = vpop.eup %8642 }
 0x1c0   :  { %562 = vrot.lane.b32.xlu1 %v8643_v49, %s8960_s19  ;;  %v9271_v49 = vand.u32 4294901760, %v9260_v37 }
 0x1c2   :  { %11113 = vst [vmem:[#allocation48_spill] sm:$0xff] %v9271_v49  ;;  %v1029_v3 = vsub.f32 %v9260_v37, %v9271_v49 }
 0x1c4   :  { %v9299_v33 = vand.u32 4294901760, %v1029_v3 }
 0x1c6   :  { %11119 = vst [vmem:[#allocation54_spill] sm:$0xff] %v9299_v33 }
 0x232   :  { %v563_v54 = vpop.permute.xlu1 %562 }
 0x233   :  { %v565_v55 = vmul.f32 %v563_v54, %v546_v42  ;;  %v9273_v54 = vand.u32 4294901760, %v324_v39 }
 0x235   :  { %567 = vrot.lane.b32.xlu1 %v565_v55, %s8961_s20  ;;  %11114 = vst [vmem:[#allocation49_spill] sm:$0xff] %v9273_v54  ;;  %v9276_v55 = vsub.f32 %v325_v34, %v9262_v38  ;;  %v9287_v4 = vsub.f32 %v324_v39, %v9273_v54 }
 0x237   :  { %11115 = vst [vmem:[#allocation50_spill] sm:$0xff] %v9276_v55  ;;  %v9292_v10 = vand.u32 4294901760, %v9276_v55  ;;  %v9302_v34 = vand.u32 4294901760, %v9287_v4 }
 0x238   :  { %11117 = vst [vmem:[#allocation52_spill] sm:$0xff] %v9287_v4 }
 0x239   :  { %11118 = vst [vmem:[#allocation53_spill] sm:$0xff] %v9292_v10  ;;  %v1041_v39 = vsub.f32 %v9276_v55, %v9292_v10 }
 0x23a   :  { %11120 = vst [vmem:[#allocation55_spill] sm:$0xff] %v9302_v34 }
 0x23b   :  { %v9319_v3 = vand.u32 4294901760, %v1041_v39 }
 0x23d   :  { %11122 = vst [vmem:[#allocation57_spill] sm:$0xff] %v9319_v3 }
 0x2a7   :  { %v568_v42 = vpop.permute.xlu1 %567 }
 0x2a8   :  { %v569_v44 = vsel %vm339_vm6, %v568_v42, 0  ;;  %v9311_v42 = vand.u32 4294901760, %v1035_v26 }
 0x2a9   :  { %v9268_v47 = vand.u32 4294901760, %v569_v44 }
 0x2aa   :  { %11121 = vst [vmem:[#allocation56_spill] sm:$0xff] %v9311_v42 }
 0x2ab   :  { %v592_v56 = vsub.f32 %v569_v44, %v9268_v47  ;;  %637 = vmatmul.f32.vlgmr.msrb.gmra.mxu3 %v9268_v47  ;;  %v1047_v44 = vsub.f32 %v9287_v4, %v9302_v34 }
 0x2ac   :  { %913 = vmatpush.msrb.mxu3 %v9199_v57 }
 0x2ad   :  { %667 = vmatmul.f32.vlgmr.msrb.gmra.mxu0 %v592_v56  ;;  %v593_v62 = vand.u32 4294901760, %v592_v56 }
 0x2ae   :  { %915 = vmatpush.msrb.mxu3 %v9202_v59  ;;  %942 = vmatpush.msrb.mxu0 %v9209_v63 }
 0x2af   :  { %694 = vmatmul.f32.vlgmr.msrb.gmra.mxu1 %v593_v62  ;;  %v594_v19 = vsub.f32 %v592_v56, %v593_v62 }
 0x2b0   :  { %917 = vmatpush.msrb.mxu3 %v9211_v0  ;;  %946 = vmatpush.msrb.mxu0 %v9220_v6 }
 0x2b1   :  { %v595_v31 = vand.u32 4294901760, %v594_v19  ;;  %973 = vmatpush.msrb.mxu1 %v9199_v57  ;;  %v9327_v19 = vand.u32 4294901760, %v1047_v44 }
 0x2b2   :  { %919 = vmatpush.msrb.mxu3 %v9222_v7  ;;  %950 = vmatpush.msrb.mxu0 %v9233_v13 }
 0x2b3   :  { %596 = vmatmul.f32.vlgmr.msrb.gmra.mxu2 %v595_v31  ;;  %752 = vmatmul.f32.vlgmr.msra.gmra.mxu3 %v9268_v47  ;;  %11123 = vst [vmem:[#allocation58_spill] sm:$0xff] %v9327_v19 }
 0x2b4   :  { %975 = vmatpush.msrb.mxu1 %v9202_v59  ;;  %884 = vmatpush.msrb.mxu2 %v9205_v60 }
 0x2b5   :  { %825 = vmatmul.f32.vlgmr.msra.gmra.mxu0 %v8959_v45  ;;  %1031 = vmatpush.msra.mxu3 %v9299_v33 }
 0x2b6   :  { %954 = vmatpush.msrb.mxu0 %v9244_v22  ;;  %977 = vmatpush.msrb.mxu1 %v9211_v0 }
 0x2b7   :  { %866 = vmatmul.f32.vlgmr.msra.gmra.mxu1 %v8959_v45  ;;  %887 = vmatpush.msrb.mxu2 %v9214_v2 }
 0x2b8   :  { %979 = vmatpush.msrb.mxu1 %v9222_v7  ;;  %1037 = vmatpush.msra.mxu3 %v9311_v42 }
 0x2b9   :  { %1069 = vmatpush.msra.mxu0 %v9260_v37  ;;  %890 = vmatpush.msrb.mxu2 %v9225_v8 }
 0x2ba   :  { %1043 = vmatpush.msra.mxu3 %v9319_v3  ;;  %1098 = vmatpush.msra.mxu1 %v9255_v32 }
 0x2bb   :  { %727 = vmatmul.f32.vlgmr.msra.gmra.mxu2 %v9268_v47  ;;  %923 = vmatmul.f32.vlgmr.msrb.gmra.mxu3 %v8959_v45 }
 0x2bc   :  { %1072 = vmatpush.msra.mxu0 %v9266_v46  ;;  %893 = vmatpush.msrb.mxu2 %v9236_v15 }
 0x2bd   :  { %956 = vmatmul.f32.vlgmr.msrb.gmra.mxu0 %v8959_v45  ;;  %1049 = vmatpush.msra.mxu3 %v9327_v19 }
 0x2be   :  { %1075 = vmatpush.msra.mxu0 %v9276_v55  ;;  %1100 = vmatpush.msra.mxu1 %v9257_v36 }
 0x2bf   :  { %981 = vmatmul.f32.vlgmr.msrb.gmra.mxu1 %v8959_v45  ;;  %998 = vmatpush.msra.mxu2 %v9255_v32 }
 0x2c0   :  { %1078 = vmatpush.msra.mxu0 %v9287_v4  ;;  %1102 = vmatpush.msra.mxu1 %v9262_v38 }
 0x2c1   :  { %1158 = vmatpush.msrb.mxu3 %v9255_v32  ;;  %1000 = vmatpush.msra.mxu2 %v9257_v36 }
 0x2c2   :  { %1104 = vmatpush.msra.mxu1 %v9273_v54 }
 0x2c3   :  { %896 = vmatmul.f32.vlgmr.msrb.gmra.mxu2 %v8959_v45  ;;  %1051 = vmatmul.f32.vlgmr.msra.gmra.mxu3 %v9268_v47 }
 0x2c4   :  { %1160 = vmatpush.msrb.mxu3 %v9257_v36  ;;  %1002 = vmatpush.msra.mxu2 %v9262_v38 }
 0x2c5   :  { %1081 = vmatmul.f32.vlgmr.msra.gmra.mxu0 %v592_v56 }
 0x2c6   :  { %1162 = vmatpush.msrb.mxu3 %v9262_v38  ;;  %1004 = vmatpush.msra.mxu2 %v9273_v54 }
 0x2c7   :  { %1108 = vmatmul.f32.vlgmr.msra.gmra.mxu1 %v593_v62 }
 0x2c8   :  { %1127 = vmatpush.msrb.mxu2 %v9271_v49  ;;  %1164 = vmatpush.msrb.mxu3 %v9273_v54 }
 0x2ca   :  { %1131 = vmatpush.msrb.mxu2 %v9282_v58 }
 0x2cb   :  { %1010 = vmatmul.f32.vlgmr.msra.gmra.mxu2 %v595_v31  ;;  %1166 = vmatmul.f32.vlgmr.msrb.gmra.mxu3 %v9268_v47 }
 0x2cc   :  { %1135 = vmatpush.msrb.mxu2 %v9292_v10 }
 0x2ce   :  { %1139 = vmatpush.msrb.mxu2 %v9302_v34 }
 0x2d3   :  { %1141 = vmatmul.f32.vlgmr.msrb.gmra.mxu2 %v9268_v47 }
 0x32a   :  { %v668_v56 = vpop.f32.mrf.mxu0 }
 0x32c   :  { %v695_v26 = vpop.f32.mrf.mxu1 }
 0x32e   :  { %v638_v45 = vpop.f32.mrf.mxu3 }
 0x332   :  { %v826_v44 = vpop.f32.mrf.mxu0 }
 0x334   :  { %v867_v61 = vpop.f32.mrf.mxu1 }
 0x335   :  { %v868_v51 = vadd.f32 %v867_v61, %v826_v44  ;;  %v9362_v61 = vld [vmem:[%s10895_s6] ss:$0 sm:$0xff] }
 0x336   :  { %v597_v39 = vpop.f32.mrf.mxu2  ;;  %v753_v62 = vpop.f32.mrf.mxu3  ;;  %11124 = vst [vmem:[#allocation59_spill] sm:$0xff] %v9362_v61 }
 0x33a   :  { %v957_v50 = vpop.f32.mrf.mxu0 }
 0x33c   :  { %v982_v55 = vpop.f32.mrf.mxu1 }
 0x33e   :  { %v728_v1 = vpop.f32.mrf.mxu2  ;;  %v924_v53 = vpop.f32.mrf.mxu3 }
 0x342   :  { %v1082_v58 = vpop.f32.mrf.mxu0 }
 0x344   :  { %v1109_v49 = vpop.f32.mrf.mxu1 }
 0x346   :  { %v897_v52 = vpop.f32.mrf.mxu2  ;;  %v1052_v34 = vpop.f32.mrf.mxu3 }
 0x347   :  { %v898_v31 = vadd.f32 %v897_v52, %v868_v51 }
 0x349   :  { %v925_v4 = vadd.f32 %v924_v53, %v898_v31 }
 0x34b   :  { %v958_v46 = vadd.f32 %v957_v50, %v925_v4 }
 0x34d   :  { %v983_v37 = vadd.f32 %v982_v55, %v958_v46 }
 0x34e   :  { %v1011_v10 = vpop.f32.mrf.mxu2  ;;  %v1167_v51 = vpop.f32.mrf.mxu3 }
 0x34f   :  { %v1012_v47 = vadd.f32 %v1011_v10, %v983_v37 }
 0x351   :  { %v1053_v22 = vadd.f32 %v1052_v34, %v1012_v47 }
 0x353   :  { %v1083_v13 = vadd.f32 %v1082_v58, %v1053_v22 }
 0x355   :  { %v1110_v19 = vadd.f32 %v1109_v49, %v1083_v13 }
 0x356   :  { %v1142_v6 = vpop.f32.mrf.mxu2 }
 0x357   :  { %v1143_v3 = vadd.f32 %v1142_v6, %v1110_v19  ;;  %v639_v6 = vadd.f32 %v638_v45, %v597_v39 }
 0x359   :  { %v1168_v52 = vadd.f32 %v1167_v51, %v1143_v3  ;;  %v669_v55 = vadd.f32 %v668_v56, %v639_v6 }
 0x35b   :  { %v1173_v50 = vadd.f32 %v9362_v61, %v1168_v52  ;;  %v696_v4 = vadd.f32 %v695_v26, %v669_v55 }
 0x35d   :  { %8644 = vtanh.f32 %v1173_v50  ;;  %v8597_v37 = vmul.f32 -1.442695, %v1173_v50  ;;  %v729_v10 = vadd.f32 %v728_v1, %v696_v4 }
 0x35f   :  { %8646 = vpow2.f32 %v8597_v37  ;;  %v754_v3 = vadd.f32 %v753_v62, %v729_v10 }
 0x361   :  { %v757_v47 = vrot.slane %v754_v3, 6 }
 0x363   :  { %v8645_v53 = vpop.eup %8644  ;;  %v759_v50 = vadd.f32 %v757_v47, %v9189_v12  ;;  %v336_v12 = vld [vmem:[#allocation10 + $0x10] sm:$0xff] }
 0x364   :  { %1196 = vrot.lane.b32.xlu2 %v8645_v53, %s8960_s19 }
 0x365   :  { %v8647_v22 = vpop.eup %8646  ;;  %v8596_v26 = vmul.f32 -1.442695, %v759_v50 }
 0x366   :  { %v1177_v46 = vadd.f32 1.0, %v8647_v22 }
 0x368   :  { %8648 = vrcp.f32 %v1177_v46  ;;  %v1189_v44 = vand.u32 2147483648, %v1177_v46  ;;  %vm1183_vm8 = vweird.f32 %v1177_v46  ;;  %v1187_v31 = vand.u32 2147483647, %v1177_v46 }
 0x369   :  { %8650 = vtanh.f32 %v759_v50 }
 0x36a   :  { %v1190_v52 = vor.u32 1.1754944e-38, %v1189_v44  ;;  %vm1188_vm10 = vcmp.eq.f32.partialorder %v1187_v31, 8.507059e+37  ;;  %8652 = vpow2.f32 %v8596_v26 }
 0x36e   :  { %v8649_v13 = vpop.eup %8648 }
 0x36f   :  { %v1179_v49 = vmul.f32 %v8649_v13, %v1177_v46  ;;  %vm1184_vm7 = vweird.f32 %v8649_v13  ;;  %v8651_v1 = vpop.eup %8650 }
 0x370   :  { %vm1185_vm9 = vmor %vm1183_vm8, %vm1184_vm7  ;;  %v8653_v62 = vpop.eup %8652 }
 0x371   :  { %v1180_v58 = vsub.f32 1.0, %v1179_v49  ;;  %v763_v53 = vadd.f32 1.0, %v8653_v62 }
 0x373   :  { %v1181_v34 = vmul.f32 %v8649_v13, %v1180_v58  ;;  %8654 = vrcp.f32 %v763_v53  ;;  %v775_v10 = vand.u32 2147483648, %v763_v53  ;;  %vm769_vm12 = vweird.f32 %v763_v53 }
 0x375   :  { %v1182_v19 = vadd.f32 %v8649_v13, %v1181_v34  ;;  %v773_v34 = vand.u32 2147483647, %v763_v53  ;;  %v776_v44 = vor.u32 1.1754944e-38, %v775_v10 }
 0x377   :  { %v1186_v51 = vsel %vm1185_vm9, %v8649_v13, %v1182_v19  ;;  %vm774_vm14 = vcmp.eq.f32.partialorder %v773_v34, 8.507059e+37 }
 0x378   :  { %v1191_v39 = vsel %vm1188_vm10, %v1190_v52, %v1186_v51  ;;  %v332_v51 = vld [vmem:[#allocation8 + $0x18] sm:$0xff]  ;;  %v331_v52 = vld [vmem:[#allocation8 + $0x10] sm:$0xff] }
 0x379   :  { %v8655_v37 = vpop.eup %8654  ;;  %v1194_v46 = vmul.f32 0.0, %v1191_v39  ;;  %v9377_v50 = vand.u32 4294901760, %v332_v51 }
 0x37a   :  { %v765_v22 = vmul.f32 %v8655_v37, %v763_v53  ;;  %vm770_vm11 = vweird.f32 %v8655_v37 }
 0x37b   :  { %vm771_vm13 = vmor %vm769_vm12, %vm770_vm11  ;;  %11126 = vst [vmem:[#allocation61_spill] sm:$0xff] %v9377_v50  ;;  %1332 = vmatpush.msra.mxu3 %v9377_v50  ;;  %1232 = vmatpush.msrb.mxu0 %v9377_v50 }
 0x37c   :  { %v766_v6 = vsub.f32 1.0, %v765_v22 }
 0x37e   :  { %v767_v55 = vmul.f32 %v8655_v37, %v766_v6 }
 0x380   :  { %v768_v58 = vadd.f32 %v8655_v37, %v767_v55  ;;  %v781_v55 = vrot.slane %v9194_v48, 6 }
 0x382   :  { %v772_v3 = vsel %vm771_vm13, %v8655_v37, %v768_v58 }
 0x383   :  { %v9373_v31 = vsel %vm774_vm14, %v776_v44, %v772_v3  ;;  %v330_v3 = vld [vmem:[#allocation8 + $0x8] sm:$0xff]  ;;  %v329_v44 = vld [vmem:[#allocation8] sm:$0xff] }
 0x384   :  { %v783_v58 = vmul.f32 %v781_v55, %v9373_v31 }
 0x3be   :  { %v1197_v45 = vpop.permute.xlu2 %1196 }
 0x3bf   :  { %v1199_v56 = vmul.f32 %v1197_v45, %v1191_v39  ;;  %v9379_v45 = vand.u32 4294901760, %v331_v52 }
 0x3c1   :  { %1201 = vrot.lane.b32.xlu2 %v1199_v56, %s8960_s19  ;;  %11127 = vst [vmem:[#allocation62_spill] sm:$0xff] %v9379_v45  ;;  %v9382_v56 = vsub.f32 %v332_v51, %v9377_v50  ;;  %1334 = vmatpush.msra.mxu3 %v9379_v45 }
 0x3c2   :  { %1234 = vmatpush.msrb.mxu0 %v9379_v45 }
 0x3c3   :  { %11128 = vst [vmem:[#allocation63_spill] sm:$0xff] %v9382_v56  ;;  %v9390_v26 = vand.u32 4294901760, %v9382_v56  ;;  %1303 = vmatpush.msra.mxu2 %v9382_v56 }
 0x3c5   :  { %11130 = vst [vmem:[#allocation65_spill] sm:$0xff] %v9390_v26  ;;  %v1263_v53 = vsub.f32 %v9382_v56, %v9390_v26 }
 0x3c7   :  { %v9403_v22 = vand.u32 4294901760, %v1263_v53 }
 0x3c9   :  { %785 = vrot.lane.b32.xlu2 %v8651_v1, %s8960_s19  ;;  %v9385_v1 = vsub.f32 %v331_v52, %v9379_v45  ;;  %11132 = vst [vmem:[#allocation67_spill] sm:$0xff] %v9403_v22  ;;  %1265 = vmatpush.msrb.mxu1 %v9403_v22 }
 0x3cb   :  { %11129 = vst [vmem:[#allocation64_spill] sm:$0xff] %v9385_v1  ;;  %v9393_v62 = vand.u32 4294901760, %v9385_v1  ;;  %1306 = vmatpush.msra.mxu2 %v9385_v1 }
 0x3cd   :  { %11131 = vst [vmem:[#allocation66_spill] sm:$0xff] %v9393_v62  ;;  %v1269_v37 = vsub.f32 %v9385_v1, %v9393_v62 }
 0x41b   :  { %v1202_v13 = vpop.permute.xlu2 %1201 }
 0x41c   :  { %v9369_v49 = vadd.f32 %v1202_v13, %v1194_v46  ;;  %v9405_v46 = vand.u32 4294901760, %v1269_v37 }
 0x41e   :  { %11125 = vst [vmem:[#allocation60_spill] sm:$0xff] %v9369_v49  ;;  %8656 = vtanh.f32 %v9369_v49  ;;  %1271 = vmatpush.msrb.mxu1 %v9405_v46 }
 0x41f   :  { %11133 = vst [vmem:[#allocation68_spill] sm:$0xff] %v9405_v46 }
 0x423   :  { %v786_v19 = vpop.permute.xlu2 %785 }
 0x424   :  { %v8657_v4 = vpop.eup %8656  ;;  %v788_v47 = vmul.f32 %v786_v19, %v9373_v31  ;;  %v9416_v19 = vand.u32 4294901760, %v330_v3 }
 0x425   :  { %1207 = vrot.lane.b32.xlu0 %v8657_v4, %s8960_s19 }
 0x426   :  { %11135 = vst [vmem:[#allocation70_spill] sm:$0xff] %v9416_v19  ;;  %1336 = vmatpush.msra.mxu3 %v9416_v19  ;;  %1236 = vmatpush.msrb.mxu0 %v9416_v19 }
 0x42d   :  { %790 = vrot.lane.b32.xlu0 %v788_v47, %s8960_s19  ;;  %v9421_v47 = vand.u32 4294901760, %v329_v44 }
 0x42f   :  { %11137 = vst [vmem:[#allocation72_spill] sm:$0xff] %v9421_v47  ;;  %v9429_v51 = vsub.f32 %v329_v44, %v9421_v47  ;;  %1338 = vmatpush.msra.mxu3 %v9421_v47  ;;  %1238 = vmatpush.msrb.mxu0 %v9421_v47 }
 0x431   :  { %11139 = vst [vmem:[#allocation74_spill] sm:$0xff] %v9429_v51  ;;  %v9437_v53 = vand.u32 4294901760, %v9429_v51  ;;  %1361 = vmatpush.msra.mxu0 %v9390_v26 }
 0x433   :  { %11140 = vst [vmem:[#allocation75_spill] sm:$0xff] %v9437_v53  ;;  %1365 = vmatpush.msra.mxu0 %v9393_v62 }
 0x497   :  { %v1208_v13 = vpop.permute.xlu0 %1207 }
 0x498   :  { %v1210_v6 = vmul.f32 %v1208_v13, %v1191_v39  ;;  %v9419_v39 = vsub.f32 %v330_v3, %v9416_v19  ;;  %v1281_v13 = vsub.f32 %v9429_v51, %v9437_v53 }
 0x49a   :  { %1215 = vrot.lane.b32.xlu1 %v1210_v6, %s8961_s20  ;;  %11136 = vst [vmem:[#allocation71_spill] sm:$0xff] %v9419_v39  ;;  %v9426_v48 = vand.u32 4294901760, %v9419_v39  ;;  %1309 = vmatpush.msra.mxu2 %v9419_v39  ;;  %v9447_v6 = vand.u32 4294901760, %v1281_v13 }
 0x49c   :  { %11138 = vst [vmem:[#allocation73_spill] sm:$0xff] %v9426_v48  ;;  %v1275_v52 = vsub.f32 %v9419_v39, %v9426_v48  ;;  %1312 = vmatpush.msra.mxu2 %v9429_v51  ;;  %1369 = vmatpush.msra.mxu0 %v9426_v48 }
 0x49d   :  { %11142 = vst [vmem:[#allocation77_spill] sm:$0xff] %v9447_v6 }
 0x49e   :  { %v9441_v37 = vand.u32 4294901760, %v1275_v52  ;;  %1373 = vmatpush.msra.mxu0 %v9437_v53  ;;  %v335_v53 = vld [vmem:[#allocation10 + $0x8] sm:$0xff] }
 0x49f   :  { %v791_v4 = vpop.permute.xlu0 %790 }
 0x4a0   :  { %v9412_v10 = vadd.f32 %v791_v4, %v783_v58  ;;  %11141 = vst [vmem:[#allocation76_spill] sm:$0xff] %v9441_v37  ;;  %1277 = vmatpush.msrb.mxu1 %v9441_v37 }
 0x4a2   :  { %11134 = vst [vmem:[#allocation69_spill] sm:$0xff] %v9412_v10  ;;  %8658 = vtanh.f32 %v9412_v10  ;;  %1283 = vmatpush.msrb.mxu1 %v9447_v6  ;;  %v337_v10 = vld [vmem:[#allocation10 + $0x18] sm:$0xff] }
 0x4a3   :  { %v9477_v49 = vand.u32 4294901760, %v337_v10 }
 0x4a4   :  { %1392 = vmatpush.msra.mxu1 %v9377_v50 }
 0x4a5   :  { %11143 = vst [vmem:[#allocation78_spill] sm:$0xff] %v9477_v49  ;;  %v9480_v61 = vsub.f32 %v337_v10, %v9477_v49  ;;  %1424 = vmatpush.msrb.mxu2 %v9477_v49  ;;  %v334_v10 = vld [vmem:[#allocation10] sm:$0xff] }
 0x4a6   :  { %1394 = vmatpush.msra.mxu1 %v9379_v45 }
 0x4a7   :  { %11144 = vst [vmem:[#allocation79_spill] sm:$0xff] %v9480_v61 }
 0x4a8   :  { %v8659_v34 = vpop.eup %8658  ;;  %1396 = vmatpush.msra.mxu1 %v9416_v19 }
 0x4a9   :  { %796 = vrot.lane.b32.xlu1 %v8659_v34, %s8960_s19 }
 0x4aa   :  { %1398 = vmatpush.msra.mxu1 %v9421_v47 }
 0x50c   :  { %v1216_v55 = vpop.permute.xlu1 %1215 }
 0x50d   :  { %v1217_v58 = vsel %vm339_vm6, %v1216_v55, 0 }
 0x50e   :  { %v9457_v4 = vand.u32 4294901760, %v1217_v58 }
 0x510   :  { %v9460_v34 = vsub.f32 %v1217_v58, %v9457_v4  ;;  %1285 = vmatmul.f32.vlgmr.msrb.gmra.mxu1 %v9457_v4 }
 0x511   :  { %1524 = vmatpush.msrb.mxu1 %v9477_v49 }
 0x512   :  { %1315 = vmatmul.f32.vlgmr.msra.gmra.mxu2 %v9460_v34  ;;  %v9465_v3 = vand.u32 4294901760, %v9460_v34 }
 0x514   :  { %1342 = vmatmul.f32.vlgmr.msra.gmra.mxu3 %v9465_v3  ;;  %v1242_v44 = vsub.f32 %v9460_v34, %v9465_v3 }
 0x516   :  { %v9470_v52 = vand.u32 4294901760, %v1242_v44  ;;  %v9482_v44 = vand.u32 4294901760, %v336_v12 }
 0x518   :  { %1244 = vmatmul.f32.vlgmr.msrb.gmra.mxu0 %v9470_v52  ;;  %1400 = vmatmul.f32.vlgmr.msra.gmra.mxu1 %v9457_v4  ;;  %11145 = vst [vmem:[#allocation80_spill] sm:$0xff] %v9482_v44 }
 0x519   :  { %1495 = vmatpush.msrb.mxu0 %v9480_v61  ;;  %1526 = vmatpush.msrb.mxu1 %v9482_v44 }
 0x51a   :  { %1426 = vmatpush.msrb.mxu2 %v9482_v44 }
 0x51b   :  { %v797_v13 = vpop.permute.xlu1 %796 }
 0x51c   :  { %v799_v55 = vmul.f32 %v797_v13, %v9373_v31  ;;  %v9487_v31 = vand.u32 4294901760, %v9480_v61  ;;  %v9490_v13 = vsub.f32 %v336_v12, %v9482_v44  ;;  %v9506_v12 = vand.u32 4294901760, %v334_v10 }
 0x51e   :  { %v1598_v58 = vrot.slane %v799_v55, 2  ;;  %11146 = vst [vmem:[#allocation81_spill] sm:$0xff] %v9487_v31  ;;  %v9493_v55 = vand.u32 4294901760, %v335_v53  ;;  %v9500_v48 = vand.u32 4294901760, %v9490_v13  ;;  %1498 = vmatpush.msrb.mxu0 %v9490_v13  ;;  %v9518_v51 = vsub.f32 %v334_v10, %v9506_v12 }
 0x51f   :  { %11147 = vst [vmem:[#allocation82_spill] sm:$0xff] %v9490_v13 }
 0x520   :  { %1375 = vmatmul.f32.vlgmr.msra.gmra.mxu0 %v9457_v4  ;;  %1599 = vrot.lane.b32.xlu2 %v1598_v58, %s8961_s20  ;;  %11148 = vst [vmem:[#allocation83_spill] sm:$0xff] %v9493_v55  ;;  %v1455_v58 = vsub.f32 %v9480_v61, %v9487_v31  ;;  %v9503_v62 = vsub.f32 %v335_v53, %v9493_v55 }
 0x521   :  { %11149 = vst [vmem:[#allocation84_spill] sm:$0xff] %v9500_v48  ;;  %1528 = vmatpush.msrb.mxu1 %v9493_v55  ;;  %1428 = vmatpush.msrb.mxu2 %v9493_v55  ;;  %v1461_v47 = vsub.f32 %v9490_v13, %v9500_v48  ;;  %v9530_v13 = vand.u32 4294901760, %v9518_v51 }
 0x522   :  { %11150 = vst [vmem:[#allocation85_spill] sm:$0xff] %v9503_v62  ;;  %v9510_v26 = vand.u32 4294901760, %v1455_v58  ;;  %v9515_v61 = vand.u32 4294901760, %v9503_v62  ;;  %1501 = vmatpush.msrb.mxu0 %v9503_v62 }
 0x523   :  { %11151 = vst [vmem:[#allocation86_spill] sm:$0xff] %v9506_v12  ;;  %1530 = vmatpush.msrb.mxu1 %v9506_v12  ;;  %1430 = vmatpush.msrb.mxu2 %v9506_v12  ;;  %v9525_v53 = vand.u32 4294901760, %v1461_v47  ;;  %v1473_v47 = vsub.f32 %v9518_v51, %v9530_v13 }
 0x524   :  { %11152 = vst [vmem:[#allocation87_spill] sm:$0xff] %v9510_v26  ;;  %1457 = vmatpush.msrb.mxu3 %v9510_v26  ;;  %v1467_v58 = vsub.f32 %v9503_v62, %v9515_v61  ;;  %1504 = vmatpush.msrb.mxu0 %v9518_v51 }
 0x525   :  { %11153 = vst [vmem:[#allocation88_spill] sm:$0xff] %v9515_v61  ;;  %1649 = vmatpush.msra.mxu1 %v9103_v35  ;;  %1553 = vmatpush.msra.mxu2 %v9487_v31  ;;  %v9544_v62 = vand.u32 4294901760, %v1473_v47 }
 0x526   :  { %11154 = vst [vmem:[#allocation89_spill] sm:$0xff] %v9518_v51  ;;  %1616 = vmatpush.msra.mxu0 %v9057_v5  ;;  %1463 = vmatpush.msrb.mxu3 %v9525_v53  ;;  %v9536_v10 = vand.u32 4294901760, %v1467_v58  ;;  %v9560_v58 = vld [vmem:[%s10897_s8] ss:$0 sm:$0xff] }
 0x527   :  { %11155 = vst [vmem:[#allocation90_spill] sm:$0xff] %v9525_v53  ;;  %1655 = vmatpush.msra.mxu1 %v9110_v40  ;;  %1557 = vmatpush.msra.mxu2 %v9500_v48 }
 0x528   :  { %11156 = vst [vmem:[#allocation91_spill] sm:$0xff] %v9530_v13  ;;  %1618 = vmatpush.msra.mxu0 %v9064_v11  ;;  %1469 = vmatpush.msrb.mxu3 %v9536_v10 }
 0x529   :  { %11157 = vst [vmem:[#allocation92_spill] sm:$0xff] %v9536_v10  ;;  %1661 = vmatpush.msra.mxu1 %v9113_v41  ;;  %1561 = vmatpush.msra.mxu2 %v9515_v61 }
 0x52a   :  { %11158 = vst [vmem:[#allocation93_spill] sm:$0xff] %v9544_v62  ;;  %1620 = vmatpush.msra.mxu0 %v9071_v16  ;;  %1475 = vmatpush.msrb.mxu3 %v9544_v62 }
 0x52b   :  { %1667 = vmatpush.msra.mxu1 %v9117_v43  ;;  %1565 = vmatpush.msra.mxu2 %v9530_v13 }
 0x52c   :  { %1584 = vmatpush.msra.mxu3 %v9477_v49  ;;  %1622 = vmatpush.msra.mxu0 %v9073_v17 }
 0x52e   :  { %1586 = vmatpush.msra.mxu3 %v9482_v44 }
 0x530   :  { %1588 = vmatpush.msra.mxu3 %v9493_v55 }
 0x532   :  { %1590 = vmatpush.msra.mxu3 %v9506_v12 }
 0x57a   :  { %v1600_v40 = vpop.permute.xlu2 %1599 }
 0x57b   :  { %v1601_v48 = vsel %vm339_vm6, %v1600_v40, 0 }
 0x57c   :  { %v9564_v12 = vand.u32 4294901760, %v1601_v48 }
 0x57e   :  { %v9567_v49 = vsub.f32 %v1601_v48, %v9564_v12 }
 0x58d   :  { %v1286_v47 = vpop.f32.mrf.mxu1 }
 0x595   :  { %v1245_v43 = vpop.f32.mrf.mxu0  ;;  %v1316_v61 = vpop.f32.mrf.mxu2 }
 0x596   :  { %v1246_v51 = vadd.f32 %v9560_v58, %v1245_v43  ;;  %v1401_v10 = vpop.f32.mrf.mxu1 }
 0x597   :  { %v1343_v13 = vpop.f32.mrf.mxu3 }
 0x598   :  { %v1287_v41 = vadd.f32 %v1286_v47, %v1246_v51  ;;  %v9571_v47 = vand.u32 4294901760, %v9567_v49 }
 0x59a   :  { %v1317_v35 = vadd.f32 %v1316_v61, %v1287_v41  ;;  %v1626_v61 = vsub.f32 %v9567_v49, %v9571_v47 }
 0x59c   :  { %v1344_v31 = vadd.f32 %v1343_v13, %v1317_v35  ;;  %v1627_v48 = vand.u32 4294901760, %v1626_v61  ;;  %v11163_v13 = vld [vmem:[#allocation39_spill] sm:$0xff]  ;;  %v11177_v61 = vld [vmem:[#allocation80_spill] sm:$0xff] }
 0x59d   :  { %v1376_v62 = vpop.f32.mrf.mxu0 }
 0x59e   :  { %v1377_v55 = vadd.f32 %v1376_v62, %v1344_v31  ;;  %v11162_v31 = vld [vmem:[#allocation48_spill] sm:$0xff] }
 0x5a0   :  { %v1402_v44 = vadd.f32 %v1401_v10, %v1377_v55  ;;  %v11165_v55 = vld [vmem:[#allocation41_spill] sm:$0xff] }
 0x5a1   :  { %v11167_v10 = vld [vmem:[#allocation45_spill] sm:$0xff] }
 0x5a2   :  { %v1404_v53 = vmax.f32 %v1402_v44, 0.0  ;;  %v11161_v44 = vld [vmem:[#allocation58_spill] sm:$0xff] }
 0x5a4   :  { %v1409_v43 = vsel %vm339_vm6, %v1404_v53, 0  ;;  %v11166_v53 = vld [vmem:[#allocation53_spill] sm:$0xff] }
 0x5a5   :  { %v1431_v51 = vand.u32 4294901760, %v1409_v43 }
 0x5a7   :  { %v1432_v41 = vsub.f32 %v1409_v43, %v1431_v51  ;;  %1477 = vmatmul.f32.vlgmr.msrb.gmra.mxu3 %v1431_v51  ;;  %v11168_v43 = vld [vmem:[#allocation55_spill] sm:$0xff] }
 0x5a8   :  { %1716 = vmatpush.msrb.mxu3 %v9057_v5 }
 0x5a9   :  { %1507 = vmatmul.f32.vlgmr.msrb.gmra.mxu0 %v1432_v41  ;;  %v1433_v35 = vand.u32 4294901760, %v1432_v41 }
 0x5aa   :  { %1718 = vmatpush.msrb.mxu3 %v9064_v11  ;;  %1745 = vmatpush.msrb.mxu0 %v9080_v21 }
 0x5ab   :  { %1534 = vmatmul.f32.vlgmr.msrb.gmra.mxu1 %v1433_v35  ;;  %v1434_v40 = vsub.f32 %v1432_v41, %v1433_v35  ;;  %v11170_v41 = vld [vmem:[#allocation50_spill] sm:$0xff]  ;;  %v11175_v35 = vld [vmem:[#allocation65_spill] sm:$0xff] }
 0x5ac   :  { %1720 = vmatpush.msrb.mxu3 %v9071_v16  ;;  %1749 = vmatpush.msrb.mxu0 %v9090_v27 }
 0x5ad   :  { %v1435_v62 = vand.u32 4294901760, %v1434_v40  ;;  %1776 = vmatpush.msrb.mxu1 %v9057_v5  ;;  %v11176_v40 = vld [vmem:[#allocation90_spill] sm:$0xff] }
 0x5ae   :  { %1722 = vmatpush.msrb.mxu3 %v9073_v17  ;;  %1753 = vmatpush.msrb.mxu0 %v9095_v29 }
 0x5af   :  { %1436 = vmatmul.f32.vlgmr.msrb.gmra.mxu2 %v1435_v62  ;;  %1592 = vmatmul.f32.vlgmr.msra.gmra.mxu3 %v1431_v51  ;;  %v11178_v62 = vld [vmem:[#allocation66_spill] sm:$0xff] }
 0x5b0   :  { %1778 = vmatpush.msrb.mxu1 %v9064_v11  ;;  %1687 = vmatpush.msrb.mxu2 %v9067_v14 }
 0x5b1   :  { %1628 = vmatmul.f32.vlgmr.msra.gmra.mxu0 %v1627_v48  ;;  %1878 = vmatpush.msra.mxu3 %v9227_v9 }
 0x5b2   :  { %1757 = vmatpush.msrb.mxu0 %v9098_v30  ;;  %1780 = vmatpush.msrb.mxu1 %v9071_v16 }
 0x5b3   :  { %1669 = vmatmul.f32.vlgmr.msra.gmra.mxu1 %v9564_v12  ;;  %1690 = vmatpush.msrb.mxu2 %v9077_v20 }
 0x5b4   :  { %1782 = vmatpush.msrb.mxu1 %v9073_v17  ;;  %1884 = vmatpush.msra.mxu3 %v9239_v18 }
 0x5b5   :  { %1916 = vmatpush.msra.mxu0 %v9205_v60  ;;  %1693 = vmatpush.msrb.mxu2 %v9084_v23 }
 0x5b6   :  { %1890 = vmatpush.msra.mxu3 %v9247_v25  ;;  %1945 = vmatpush.msra.mxu1 %v9199_v57 }
 0x5b7   :  { %1567 = vmatmul.f32.vlgmr.msra.gmra.mxu2 %v1431_v51  ;;  %1726 = vmatmul.f32.vlgmr.msrb.gmra.mxu3 %v9571_v47  ;;  %v11169_v51 = vld [vmem:[#allocation47_spill] sm:$0xff] }
 0x5b8   :  { %1919 = vmatpush.msra.mxu0 %v9214_v2  ;;  %1696 = vmatpush.msrb.mxu2 %v9087_v24 }
 0x5b9   :  { %1759 = vmatmul.f32.vlgmr.msrb.gmra.mxu0 %v9564_v12  ;;  %1896 = vmatpush.msra.mxu3 %v9252_v28 }
 0x5ba   :  { %1922 = vmatpush.msra.mxu0 %v9225_v8  ;;  %1947 = vmatpush.msra.mxu1 %v9202_v59 }
 0x5bb   :  { %1784 = vmatmul.f32.vlgmr.msrb.gmra.mxu1 %v9564_v12  ;;  %1845 = vmatpush.msra.mxu2 %v9199_v57 }
 0x5bc   :  { %1925 = vmatpush.msra.mxu0 %v9236_v15  ;;  %1949 = vmatpush.msra.mxu1 %v9211_v0 }
 0x5bd   :  { %2005 = vmatpush.msrb.mxu3 %v9199_v57  ;;  %1847 = vmatpush.msra.mxu2 %v9202_v59 }
 0x5be   :  { %1951 = vmatpush.msra.mxu1 %v9222_v7  ;;  %2030 = vmatpush.msrb.mxu0 %v9255_v32 }
 0x5bf   :  { %1699 = vmatmul.f32.vlgmr.msrb.gmra.mxu2 %v9567_v49  ;;  %1898 = vmatmul.f32.vlgmr.msra.gmra.mxu3 %v9457_v4 }
 0x5c0   :  { %2007 = vmatpush.msrb.mxu3 %v9202_v59  ;;  %1849 = vmatpush.msra.mxu2 %v9211_v0 }
 0x5c1   :  { %1928 = vmatmul.f32.vlgmr.msra.gmra.mxu0 %v9460_v34  ;;  %2063 = vmatpush.msrb.mxu1 %v9299_v33  ;;  %v11159_v34 = vld [vmem:[#allocation57_spill] sm:$0xff] }
 0x5c2   :  { %2009 = vmatpush.msrb.mxu3 %v9211_v0  ;;  %2032 = vmatpush.msrb.mxu0 %v9257_v36 }
 0x5c3   :  { %1955 = vmatmul.f32.vlgmr.msra.gmra.mxu1 %v9465_v3  ;;  %1851 = vmatpush.msra.mxu2 %v9222_v7  ;;  %v11160_v3 = vld [vmem:[#allocation36_spill] sm:$0xff] }
 0x5c4   :  { %2011 = vmatpush.msrb.mxu3 %v9222_v7  ;;  %2034 = vmatpush.msrb.mxu0 %v9262_v38 }
 0x5c5   :  { %2069 = vmatpush.msrb.mxu1 %v9311_v42  ;;  %1974 = vmatpush.msrb.mxu2 %v9209_v63 }
 0x5c6   :  { %2036 = vmatpush.msrb.mxu0 %v9273_v54  ;;  %2130 = vmatpush.msra.mxu3 %v9255_v32 }
 0x5c7   :  { %1857 = vmatmul.f32.vlgmr.msra.gmra.mxu2 %v9470_v52  ;;  %2013 = vmatmul.f32.vlgmr.msrb.gmra.mxu3 %v9457_v4  ;;  %v11164_v52 = vld [vmem:[#allocation51_spill] sm:$0xff] }
 0x5c8   :  { %2075 = vmatpush.msrb.mxu1 %v11159_v34  ;;  %1978 = vmatpush.msrb.mxu2 %v11160_v3 }
 0x5c9   :  { %2042 = vmatmul.f32.vlgmr.msrb.gmra.mxu0 %v1627_v48  ;;  %2132 = vmatpush.msra.mxu3 %v9257_v36  ;;  %v11179_v48 = vld [vmem:[#allocation92_spill] sm:$0xff] }
 0x5ca   :  { %2081 = vmatpush.msrb.mxu1 %v11161_v44  ;;  %2159 = vmatpush.msra.mxu0 %v11162_v31 }
 0x5cb   :  { %1982 = vmatpush.msrb.mxu2 %v11163_v13  ;;  %2083 = vmatmul.f32.vlgmr.msrb.gmra.mxu1 %v9564_v12 }
 0x5cc   :  { %2134 = vmatpush.msra.mxu3 %v9262_v38  ;;  %2163 = vmatpush.msra.mxu0 %v11164_v52 }
 0x5cd   :  { %2190 = vmatpush.msra.mxu1 %v9255_v32  ;;  %1986 = vmatpush.msrb.mxu2 %v11165_v55 }
 0x5ce   :  { %2136 = vmatpush.msra.mxu3 %v9273_v54  ;;  %2167 = vmatpush.msra.mxu0 %v11166_v53 }
 0x5cf   :  { %2192 = vmatpush.msra.mxu1 %v9257_v36  ;;  %1988 = vmatmul.f32.vlgmr.msrb.gmra.mxu2 %v9457_v4  ;;  %v11171_v4 = vld [vmem:[#allocation52_spill] sm:$0xff] }
 0x5d0   :  { %2101 = vmatpush.msra.mxu2 %v11167_v10  ;;  %2140 = vmatmul.f32.vlgmr.msra.gmra.mxu3 %v9571_v47  ;;  %v11174_v47 = vld [vmem:[#allocation78_spill] sm:$0xff] }
 0x5d1   :  { %2171 = vmatpush.msra.mxu0 %v11168_v43  ;;  %2194 = vmatpush.msra.mxu1 %v9262_v38 }
 0x5d2   :  { %2104 = vmatpush.msra.mxu2 %v11169_v51  ;;  %2173 = vmatmul.f32.vlgmr.msra.gmra.mxu0 %v9564_v12 }
 0x5d3   :  { %2196 = vmatpush.msra.mxu1 %v9273_v54  ;;  %2291 = vmatpush.msrb.mxu3 %v9403_v22 }
 0x5d4   :  { %2107 = vmatpush.msra.mxu2 %v11170_v41  ;;  %2198 = vmatmul.f32.vlgmr.msra.gmra.mxu1 %v9564_v12  ;;  %v11172_v12 = vld [vmem:[#allocation74_spill] sm:$0xff] }
 0x5d5   :  { %2297 = vmatpush.msrb.mxu3 %v9405_v46  ;;  %2329 = vmatpush.msrb.mxu0 %v9382_v56 }
 0x5d6   :  { %2110 = vmatpush.msra.mxu2 %v11171_v4  ;;  %2358 = vmatpush.msrb.mxu1 %v9377_v50 }
 0x5d7   :  { %2113 = vmatmul.f32.vlgmr.msra.gmra.mxu2 %v9567_v49  ;;  %2303 = vmatpush.msrb.mxu3 %v9441_v37  ;;  %v11173_v49 = vld [vmem:[#allocation72_spill] sm:$0xff] }
 0x5d8   :  { %2332 = vmatpush.msrb.mxu0 %v9385_v1  ;;  %2360 = vmatpush.msrb.mxu1 %v9379_v45 }
 0x5d9   :  { %2309 = vmatpush.msrb.mxu3 %v9447_v6  ;;  %2258 = vmatpush.msrb.mxu2 %v9377_v50  ;;  %v11184_v6 = vld [vmem:[#allocation75_spill] sm:$0xff] }
 0x5da   :  { %2335 = vmatpush.msrb.mxu0 %v9419_v39  ;;  %2362 = vmatpush.msrb.mxu1 %v9416_v19  ;;  %v11182_v39 = vld [vmem:[#allocation93_spill] sm:$0xff] }
 0x5db   :  { %2418 = vmatpush.msra.mxu3 %v9377_v50  ;;  %2260 = vmatpush.msrb.mxu2 %v9379_v45 }
 0x5dc   :  { %2338 = vmatpush.msrb.mxu0 %v11172_v12  ;;  %2364 = vmatpush.msrb.mxu1 %v11173_v49  ;;  %v11180_v12 = vld [vmem:[#allocation83_spill] sm:$0xff] }
 0x5dd   :  { %2420 = vmatpush.msra.mxu3 %v9379_v45  ;;  %2262 = vmatpush.msrb.mxu2 %v9416_v19 }
 0x5de   :  { %2480 = vmatpush.msra.mxu1 %v9510_v26  ;;  %2447 = vmatpush.msra.mxu0 %v11174_v47  ;;  %v11181_v26 = vld [vmem:[#allocation73_spill] sm:$0xff] }
 0x5df   :  { %2422 = vmatpush.msra.mxu3 %v9416_v19  ;;  %2264 = vmatpush.msrb.mxu2 %v11173_v49  ;;  %v11183_v19 = vld [vmem:[#allocation86_spill] sm:$0xff] }
 0x5e0   :  { %2486 = vmatpush.msra.mxu1 %v11176_v40  ;;  %2449 = vmatpush.msra.mxu0 %v11177_v61 }
 0x5e1   :  { %2387 = vmatpush.msra.mxu2 %v11175_v35  ;;  %2424 = vmatpush.msra.mxu3 %v11173_v49  ;;  %v9690_v49 = vld [vmem:[%s10899_s10] ss:$0 sm:$0xff] }
 0x5e2   :  { %2492 = vmatpush.msra.mxu1 %v11179_v48  ;;  %2451 = vmatpush.msra.mxu0 %v11180_v12  ;;  %11185 = vst [vmem:[#allocation78_spill] sm:$0xff] %v9690_v49 }
 0x5e3   :  { %2391 = vmatpush.msra.mxu2 %v11178_v62 }
 0x5e4   :  { %2498 = vmatpush.msra.mxu1 %v11182_v39  ;;  %2453 = vmatpush.msra.mxu0 %v11183_v19 }
 0x5e5   :  { %2395 = vmatpush.msra.mxu2 %v11181_v26 }
 0x5e7   :  { %2399 = vmatpush.msra.mxu2 %v11184_v6 }
 0x626   :  { %v1508_v40 = vpop.f32.mrf.mxu0 }
 0x628   :  { %v1535_v45 = vpop.f32.mrf.mxu1 }
 0x62a   :  { %v1478_v35 = vpop.f32.mrf.mxu3 }
 0x62e   :  { %v1629_v26 = vpop.f32.mrf.mxu0 }
 0x630   :  { %v1670_v39 = vpop.f32.mrf.mxu1 }
 0x632   :  { %v1437_v62 = vpop.f32.mrf.mxu2  ;;  %v1593_v1 = vpop.f32.mrf.mxu3 }
 0x633   :  { %v1438_v48 = vadd.f32 %v9690_v49, %v1437_v62 }
 0x635   :  { %v1479_v37 = vadd.f32 %v1478_v35, %v1438_v48 }
 0x636   :  { %v1760_v22 = vpop.f32.mrf.mxu0 }
 0x637   :  { %v1509_v50 = vadd.f32 %v1508_v40, %v1479_v37 }
 0x638   :  { %v1785_v51 = vpop.f32.mrf.mxu1 }
 0x639   :  { %v1536_v4 = vadd.f32 %v1535_v45, %v1509_v50 }
 0x63a   :  { %v1568_v56 = vpop.f32.mrf.mxu2  ;;  %v1727_v41 = vpop.f32.mrf.mxu3 }
 0x63b   :  { %v1569_v46 = vadd.f32 %v1568_v56, %v1536_v4 }
 0x63d   :  { %v1594_v6 = vadd.f32 %v1593_v1, %v1569_v46 }
 0x63e   :  { %v1929_v53 = vpop.f32.mrf.mxu0 }
 0x63f   :  { %1596 = vst [vmem:[%s10900_s11] sm:$0x3] %v1594_v6 }
 0x640   :  { %v1956_v35 = vpop.f32.mrf.mxu1 }
 0x642   :  { %v1700_v43 = vpop.f32.mrf.mxu2  ;;  %v1899_v10 = vpop.f32.mrf.mxu3 }
 0x646   :  { %v2043_v56 = vpop.f32.mrf.mxu0 }
 0x648   :  { %v2084_v46 = vpop.f32.mrf.mxu1 }
 0x64a   :  { %v1858_v62 = vpop.f32.mrf.mxu2  ;;  %v2014_v40 = vpop.f32.mrf.mxu3 }
 0x64b   :  { %v1900_v49 = vadd.f32 %v1899_v10, %v1858_v62  ;;  %v11186_v10 = vld [vmem:[#allocation59_spill] sm:$0xff] }
 0x64d   :  { %v1930_v48 = vadd.f32 %v1929_v53, %v1900_v49 }
 0x64f   :  { %v1957_v37 = vadd.f32 %v1956_v35, %v1930_v48  ;;  %v2174_v44 = vpop.f32.mrf.mxu0 }
 0x651   :  { %v2199_v34 = vpop.f32.mrf.mxu1 }
 0x652   :  { %v1989_v50 = vpop.f32.mrf.mxu2 }
 0x653   :  { %v1990_v45 = vadd.f32 %v1989_v50, %v1957_v37  ;;  %v2141_v13 = vpop.f32.mrf.mxu3 }
 0x655   :  { %v2015_v1 = vadd.f32 %v2014_v40, %v1990_v45  ;;  %v1671_v40 = vadd.f32 %v1670_v39, %v1629_v26 }
 0x657   :  { %v2044_v4 = vadd.f32 %v2043_v56, %v2015_v1 }
 0x659   :  { %v2085_v55 = vadd.f32 %v2084_v46, %v2044_v4  ;;  %v11187_v4 = vld [vmem:[#allocation30_spill] sm:$0xff] }
 0x65a   :  { %v2114_v52 = vpop.f32.mrf.mxu2 }
 0x65b   :  { %v2115_v6 = vadd.f32 %v2114_v52, %v2085_v55  ;;  %v1701_v52 = vadd.f32 %v1700_v43, %v1671_v40 }
 0x65d   :  { %v2142_v31 = vadd.f32 %v2141_v13, %v2115_v6  ;;  %v1728_v13 = vadd.f32 %v1727_v41, %v1701_v52 }
 0x65f   :  { %v2175_v3 = vadd.f32 %v2174_v44, %v2142_v31  ;;  %v1761_v44 = vadd.f32 %v1760_v22, %v1728_v13 }
 0x661   :  { %v2200_v54 = vadd.f32 %v2199_v34, %v2175_v3  ;;  %v1786_v34 = vadd.f32 %v1785_v51, %v1761_v44 }
 0x663   :  { %v2202_v62 = vadd.f32 %v11186_v10, %v2200_v54  ;;  %v1789_v56 = vrot.slane %v1786_v34, 4 }
 0x665   :  { %8660 = vtanh.f32 %v2202_v62  ;;  %v8599_v49 = vmul.f32 -1.442695, %v2202_v62  ;;  %v1791_v6 = vadd.f32 %v1789_v56, %v11187_v4 }
 0x667   :  { %8662 = vpow2.f32 %v8599_v49  ;;  %v8598_v51 = vmul.f32 -1.442695, %v1791_v6  ;;  %v11188_v49 = vld [vmem:[#allocation60_spill] sm:$0xff] }
 0x66b   :  { %v8661_v53 = vpop.eup %8660 }
 0x66c   :  { %2225 = vrot.lane.b32.xlu0 %v8661_v53, %s8960_s19 }
 0x66d   :  { %v8663_v35 = vpop.eup %8662 }
 0x66e   :  { %v2206_v48 = vadd.f32 1.0, %v8663_v35 }
 0x670   :  { %8664 = vrcp.f32 %v2206_v48  ;;  %v2218_v54 = vand.u32 2147483648, %v2206_v48  ;;  %vm2212_vm0 = vweird.f32 %v2206_v48  ;;  %v2216_v45 = vand.u32 2147483647, %v2206_v48 }
 0x671   :  { %8666 = vtanh.f32 %v1791_v6 }
 0x672   :  { %v2219_v46 = vor.u32 1.1754944e-38, %v2218_v54  ;;  %vm2217_vm2 = vcmp.eq.f32.partialorder %v2216_v45, 8.507059e+37  ;;  %8668 = vpow2.f32 %v8598_v51 }
 0x676   :  { %v8665_v37 = vpop.eup %8664 }
 0x677   :  { %v2208_v55 = vmul.f32 %v8665_v37, %v2206_v48  ;;  %vm2213_vm15 = vweird.f32 %v8665_v37  ;;  %v8667_v22 = vpop.eup %8666 }
 0x678   :  { %vm2214_vm1 = vmor %vm2212_vm0, %vm2213_vm15  ;;  %v8669_v41 = vpop.eup %8668 }
 0x679   :  { %v2209_v50 = vsub.f32 1.0, %v2208_v55  ;;  %v1795_v10 = vadd.f32 1.0, %v8669_v41 }
 0x67b   :  { %v2210_v31 = vmul.f32 %v8665_v37, %v2209_v50  ;;  %8670 = vrcp.f32 %v1795_v10  ;;  %v1807_v50 = vand.u32 2147483648, %v1795_v10  ;;  %vm1801_vm4 = vweird.f32 %v1795_v10 }
 0x67c   :  { %v1805_v44 = vand.u32 2147483647, %v1795_v10 }
 0x67d   :  { %v2211_v3 = vadd.f32 %v8665_v37, %v2210_v31 }
 0x67e   :  { %vm1806_vm7 = vcmp.eq.f32.partialorder %v1805_v44, 8.507059e+37  ;;  %v11195_v44 = vld [vmem:[#allocation82_spill] sm:$0xff] }
 0x67f   :  { %v2215_v1 = vsel %vm2214_vm1, %v8665_v37, %v2211_v3  ;;  %v1808_v3 = vor.u32 1.1754944e-38, %v1807_v50 }
 0x680   :  { %v2220_v39 = vsel %vm2217_vm2, %v2219_v46, %v2215_v1  ;;  %v11189_v46 = vld [vmem:[#allocation69_spill] sm:$0xff] }
 0x681   :  { %v8671_v62 = vpop.eup %8670  ;;  %v2223_v35 = vmul.f32 %v2220_v39, %v11188_v49  ;;  %v1813_v6 = vrot.slane %v11189_v46, 6  ;;  %v11190_v49 = vld [vmem:[#allocation81_spill] sm:$0xff] }
 0x682   :  { %v1797_v53 = vmul.f32 %v8671_v62, %v1795_v10  ;;  %vm1802_vm3 = vweird.f32 %v8671_v62  ;;  %v11200_v46 = vld [vmem:[#allocation89_spill] sm:$0xff] }
 0x683   :  { %vm1803_vm5 = vmor %vm1801_vm4, %vm1802_vm3 }
 0x684   :  { %v1798_v37 = vsub.f32 1.0, %v1797_v53 }
 0x686   :  { %v1799_v52 = vmul.f32 %v8671_v62, %v1798_v37  ;;  %v11191_v37 = vld [vmem:[#allocation84_spill] sm:$0xff] }
 0x688   :  { %v1800_v55 = vadd.f32 %v8671_v62, %v1799_v52  ;;  %v11192_v52 = vld [vmem:[#allocation79_spill] sm:$0xff] }
 0x68a   :  { %v1804_v31 = vsel %vm1803_vm5, %v8671_v62, %v1800_v55  ;;  %v11193_v55 = vld [vmem:[#allocation20_spill] sm:$0xff] }
 0x68b   :  { %v1809_v54 = vsel %vm1806_vm7, %v1808_v3, %v1804_v31  ;;  %v11197_v3 = vld [vmem:[#allocation91_spill] sm:$0xff] }
 0x6de   :  { %v2226_v26 = vpop.permute.xlu0 %2225 }
 0x6df   :  { %v2228_v43 = vmul.f32 %v2226_v26, %v2220_v39  ;;  %v1815_v26 = vmul.f32 %v1813_v6, %v1809_v54  ;;  %v11201_v6 = vld [vmem:[#allocation23_spill] sm:$0xff] }
 0x6e1   :  { %2230 = vrot.lane.b32.xlu1 %v2228_v43, %s8960_s19 }
 0x6e9   :  { %1817 = vrot.lane.b32.xlu1 %v8667_v22, %s8960_s19 }
 0x753   :  { %v2231_v48 = vpop.permute.xlu1 %2230 }
 0x754   :  { %v9702_v40 = vadd.f32 %v2231_v48, %v2223_v35 }
 0x756   :  { %8672 = vtanh.f32 %v9702_v40 }
 0x75b   :  { %v1818_v34 = vpop.permute.xlu1 %1817 }
 0x75c   :  { %v8673_v13 = vpop.eup %8672  ;;  %v1820_v45 = vmul.f32 %v1818_v34, %v1809_v54  ;;  %v11196_v34 = vld [vmem:[#allocation21_spill] sm:$0xff] }
 0x75d   :  { %2236 = vrot.lane.b32.xlu2 %v8673_v13, %s8960_s19  ;;  %v11194_v13 = vld [vmem:[#allocation88_spill] sm:$0xff] }
 0x765   :  { %1822 = vrot.lane.b32.xlu2 %v1820_v45, %s8960_s19  ;;  %v11198_v45 = vld [vmem:[#allocation85_spill] sm:$0xff] }
 0x7b7   :  { %v2237_v56 = vpop.permute.xlu2 %2236 }
 0x7b8   :  { %v2239_v1 = vmul.f32 %v2237_v56, %v2220_v39 }
 0x7ba   :  { %2241 = vrot.lane.b32.xlu0 %v2239_v1, %s8961_s20  ;;  %v11199_v1 = vld [vmem:[#allocation22_spill] sm:$0xff] }
 0x7bf   :  { %v1823_v43 = vpop.permute.xlu2 %1822 }
 0x7c0   :  { %v9709_v22 = vadd.f32 %v1823_v43, %v1815_v26 }
 0x7c2   :  { %8674 = vtanh.f32 %v9709_v22 }
 0x7c8   :  { %v8675_v51 = vpop.eup %8674 }
 0x7c9   :  { %1828 = vrot.lane.b32.xlu0 %v8675_v51, %s8960_s19 }
 0x82c   :  { %v2242_v41 = vpop.permute.xlu0 %2241 }
 0x82d   :  { %v2243_v10 = vsel %vm339_vm6, %v2242_v41, 0 }
 0x82e   :  { %v9714_v62 = vand.u32 4294901760, %v2243_v10 }
 0x830   :  { %v9717_v39 = vsub.f32 %v2243_v10, %v9714_v62  ;;  %2311 = vmatmul.f32.vlgmr.msrb.gmra.mxu3 %v9714_v62 }
 0x831   :  { %2547 = vmatpush.msrb.mxu3 %v11174_v47 }
 0x832   :  { %2341 = vmatmul.f32.vlgmr.msrb.gmra.mxu0 %v9717_v39  ;;  %v9723_v53 = vand.u32 4294901760, %v9717_v39 }
 0x833   :  { %2549 = vmatpush.msrb.mxu3 %v11177_v61  ;;  %2576 = vmatpush.msrb.mxu0 %v11190_v49 }
 0x834   :  { %2368 = vmatmul.f32.vlgmr.msrb.gmra.mxu1 %v9723_v53  ;;  %v2268_v35 = vsub.f32 %v9717_v39, %v9723_v53 }
 0x835   :  { %2551 = vmatpush.msrb.mxu3 %v11180_v12  ;;  %2607 = vmatpush.msrb.mxu1 %v11174_v47 }
 0x836   :  { %v9732_v48 = vand.u32 4294901760, %v2268_v35  ;;  %2580 = vmatpush.msrb.mxu0 %v11191_v37 }
 0x837   :  { %2553 = vmatpush.msrb.mxu3 %v11183_v19  ;;  %2609 = vmatpush.msrb.mxu1 %v11177_v61 }
 0x838   :  { %2270 = vmatmul.f32.vlgmr.msrb.gmra.mxu2 %v9732_v48  ;;  %2426 = vmatmul.f32.vlgmr.msra.gmra.mxu3 %v9714_v62 }
 0x839   :  { %2518 = vmatpush.msrb.mxu2 %v11192_v52  ;;  %2611 = vmatpush.msrb.mxu1 %v11180_v12 }
 0x83a   :  { %2673 = vmatpush.msra.mxu3 %v11193_v55  ;;  %2584 = vmatpush.msrb.mxu0 %v11194_v13 }
 0x83b   :  { %v1829_v50 = vpop.permute.xlu0 %1828  ;;  %2521 = vmatpush.msrb.mxu2 %v11195_v44  ;;  %2613 = vmatpush.msrb.mxu1 %v11183_v19 }
 0x83c   :  { %v1831_v31 = vmul.f32 %v1829_v50, %v1809_v54  ;;  %2679 = vmatpush.msra.mxu3 %v11196_v34  ;;  %2588 = vmatpush.msrb.mxu0 %v11197_v3 }
 0x83d   :  { %2524 = vmatpush.msrb.mxu2 %v11198_v45 }
 0x83e   :  { %v2622_v56 = vrot.slane %v1831_v31, 4  ;;  %2685 = vmatpush.msra.mxu3 %v11199_v1 }
 0x83f   :  { %2527 = vmatpush.msrb.mxu2 %v11200_v46 }
 0x840   :  { %2401 = vmatmul.f32.vlgmr.msra.gmra.mxu2 %v9714_v62  ;;  %2623 = vrot.lane.b32.xlu1 %v2622_v56, %s8961_s20 }
 0x841   :  { %2640 = vmatpush.msra.mxu2 %v9057_v5  ;;  %2691 = vmatpush.msra.mxu3 %v11201_v6 }
 0x843   :  { %2642 = vmatpush.msra.mxu2 %v9064_v11 }
 0x845   :  { %2644 = vmatpush.msra.mxu2 %v9071_v16 }
 0x847   :  { %2646 = vmatpush.msra.mxu2 %v9073_v17 }
 0x8af   :  { %v2342_v41 = vpop.f32.mrf.mxu0 }
 0x8b1   :  { %v2369_v50 = vpop.f32.mrf.mxu1 }
 0x8b2   :  { %v2624_v10 = vpop.permute.xlu1 %2623 }
 0x8b3   :  { %v2312_v54 = vpop.f32.mrf.mxu3  ;;  %v2625_v31 = vsel %vm339_vm6, %v2624_v10, 0  ;;  %v11206_v10 = vld [vmem:[#allocation48_spill] sm:$0xff] }
 0x8b4   :  { %v9759_v1 = vand.u32 4294901760, %v2625_v31 }
 0x8b6   :  { %v9762_v44 = vsub.f32 %v2625_v31, %v9759_v1  ;;  %v11210_v31 = vld [vmem:[#allocation53_spill] sm:$0xff] }
 0x8bb   :  { %v2271_v26 = vpop.f32.mrf.mxu2  ;;  %v2427_v45 = vpop.f32.mrf.mxu3 }
 0x8bc   :  { %v2272_v43 = vadd.f32 %v9560_v58, %v2271_v26  ;;  %v9766_v26 = vand.u32 4294901760, %v9762_v44 }
 0x8be   :  { %v2313_v51 = vadd.f32 %v2312_v54, %v2272_v43 }
 0x8c0   :  { %v2343_v35 = vadd.f32 %v2342_v41, %v2313_v51  ;;  %v11202_v51 = vld [vmem:[#allocation49_spill] sm:$0xff]  ;;  %v11205_v41 = vld [vmem:[#allocation58_spill] sm:$0xff] }
 0x8c2   :  { %v2370_v56 = vadd.f32 %v2369_v50, %v2343_v35  ;;  %v11207_v35 = vld [vmem:[#allocation39_spill] sm:$0xff]  ;;  %v11209_v50 = vld [vmem:[#allocation41_spill] sm:$0xff] }
 0x8c3   :  { %v2402_v46 = vpop.f32.mrf.mxu2 }
 0x8c4   :  { %v2403_v6 = vadd.f32 %v2402_v46, %v2370_v56  ;;  %v11211_v56 = vld [vmem:[#allocation45_spill] sm:$0xff] }
 0x8c6   :  { %v2428_v3 = vadd.f32 %v2427_v45, %v2403_v6  ;;  %v2650_v45 = vsub.f32 %v9762_v44, %v9766_v26 }
 0x8c8   :  { %v2430_v34 = vmax.f32 %v2428_v3, 0.0  ;;  %v2651_v6 = vand.u32 4294901760, %v2650_v45  ;;  %v11219_v45 = vld [vmem:[#allocation61_spill] sm:$0xff] }
 0x8ca   :  { %v2432_v58 = vsel %vm339_vm6, %v2430_v34, 0 }
 0x8cb   :  { %v2454_v54 = vand.u32 4294901760, %v2432_v58 }
 0x8cd   :  { %v2455_v43 = vsub.f32 %v2432_v58, %v2454_v54  ;;  %2500 = vmatmul.f32.vlgmr.msra.gmra.mxu1 %v2454_v54  ;;  %v11212_v58 = vld [vmem:[#allocation55_spill] sm:$0xff] }
 0x8ce   :  { %2740 = vmatpush.msra.mxu1 %v9057_v5 }
 0x8cf   :  { %2530 = vmatmul.f32.vlgmr.msrb.gmra.mxu2 %v2455_v43  ;;  %v2456_v46 = vand.u32 4294901760, %v2455_v43 }
 0x8d0   :  { %2742 = vmatpush.msra.mxu1 %v9064_v11  ;;  %2769 = vmatpush.msrb.mxu2 %v9080_v21 }
 0x8d1   :  { %2557 = vmatmul.f32.vlgmr.msrb.gmra.mxu3 %v2456_v46  ;;  %v2457_v3 = vsub.f32 %v2455_v43, %v2456_v46  ;;  %v11214_v43 = vld [vmem:[#allocation67_spill] sm:$0xff]  ;;  %v11215_v46 = vld [vmem:[#allocation50_spill] sm:$0xff] }
 0x8d2   :  { %2744 = vmatpush.msra.mxu1 %v9071_v16  ;;  %2773 = vmatpush.msrb.mxu2 %v9090_v27 }
 0x8d3   :  { %v2458_v34 = vand.u32 4294901760, %v2457_v3  ;;  %2800 = vmatpush.msrb.mxu3 %v9057_v5  ;;  %v11217_v3 = vld [vmem:[#allocation63_spill] sm:$0xff] }
 0x8d4   :  { %2746 = vmatpush.msra.mxu1 %v9073_v17  ;;  %2777 = vmatpush.msrb.mxu2 %v9095_v29 }
 0x8d5   :  { %2459 = vmatmul.f32.vlgmr.msra.gmra.mxu0 %v2458_v34  ;;  %2615 = vmatmul.f32.vlgmr.msrb.gmra.mxu1 %v2454_v54  ;;  %v11220_v34 = vld [vmem:[#allocation76_spill] sm:$0xff] }
 0x8d6   :  { %2802 = vmatpush.msrb.mxu3 %v9064_v11  ;;  %2711 = vmatpush.msra.mxu0 %v9067_v14 }
 0x8d7   :  { %2652 = vmatmul.f32.vlgmr.msra.gmra.mxu2 %v2651_v6  ;;  %2902 = vmatpush.msrb.mxu1 %v9227_v9 }
 0x8d8   :  { %2781 = vmatpush.msrb.mxu2 %v9098_v30  ;;  %2804 = vmatpush.msrb.mxu3 %v9071_v16 }
 0x8d9   :  { %2693 = vmatmul.f32.vlgmr.msra.gmra.mxu3 %v9759_v1  ;;  %2714 = vmatpush.msra.mxu0 %v9077_v20 }
 0x8da   :  { %2806 = vmatpush.msrb.mxu3 %v9073_v17  ;;  %2908 = vmatpush.msrb.mxu1 %v9239_v18 }
 0x8db   :  { %2940 = vmatpush.msra.mxu2 %v9205_v60  ;;  %2717 = vmatpush.msra.mxu0 %v9084_v23 }
 0x8dc   :  { %2914 = vmatpush.msrb.mxu1 %v9247_v25  ;;  %2969 = vmatpush.msra.mxu3 %v9199_v57 }
 0x8dd   :  { %2590 = vmatmul.f32.vlgmr.msrb.gmra.mxu0 %v2454_v54  ;;  %2750 = vmatmul.f32.vlgmr.msra.gmra.mxu1 %v9766_v26  ;;  %v11213_v54 = vld [vmem:[#allocation47_spill] sm:$0xff] }
 0x8de   :  { %2943 = vmatpush.msra.mxu2 %v9214_v2  ;;  %2720 = vmatpush.msra.mxu0 %v9087_v24 }
 0x8df   :  { %2783 = vmatmul.f32.vlgmr.msrb.gmra.mxu2 %v9759_v1  ;;  %2920 = vmatpush.msrb.mxu1 %v9252_v28 }
 0x8e0   :  { %2946 = vmatpush.msra.mxu2 %v9225_v8  ;;  %2971 = vmatpush.msra.mxu3 %v9202_v59 }
 0x8e1   :  { %2808 = vmatmul.f32.vlgmr.msrb.gmra.mxu3 %v9759_v1  ;;  %2869 = vmatpush.msrb.mxu0 %v9199_v57 }
 0x8e2   :  { %2949 = vmatpush.msra.mxu2 %v9236_v15  ;;  %2973 = vmatpush.msra.mxu3 %v9211_v0 }
 0x8e3   :  { %3029 = vmatpush.msra.mxu1 %v9199_v57  ;;  %2871 = vmatpush.msrb.mxu0 %v9202_v59 }
 0x8e4   :  { %2975 = vmatpush.msra.mxu3 %v9222_v7  ;;  %3054 = vmatpush.msrb.mxu2 %v9255_v32 }
 0x8e5   :  { %2723 = vmatmul.f32.vlgmr.msra.gmra.mxu0 %v9762_v44  ;;  %2922 = vmatmul.f32.vlgmr.msrb.gmra.mxu1 %v9714_v62 }
 0x8e6   :  { %3031 = vmatpush.msra.mxu1 %v9202_v59  ;;  %2873 = vmatpush.msrb.mxu0 %v9211_v0 }
 0x8e7   :  { %2952 = vmatmul.f32.vlgmr.msra.gmra.mxu2 %v9717_v39  ;;  %3087 = vmatpush.msrb.mxu3 %v9299_v33  ;;  %v11203_v39 = vld [vmem:[#allocation57_spill] sm:$0xff] }
 0x8e8   :  { %3033 = vmatpush.msra.mxu1 %v9211_v0  ;;  %3056 = vmatpush.msrb.mxu2 %v9257_v36 }
 0x8e9   :  { %2979 = vmatmul.f32.vlgmr.msra.gmra.mxu3 %v9723_v53  ;;  %2875 = vmatpush.msrb.mxu0 %v9222_v7  ;;  %v11204_v53 = vld [vmem:[#allocation36_spill] sm:$0xff] }
 0x8ea   :  { %3035 = vmatpush.msra.mxu1 %v9222_v7  ;;  %3058 = vmatpush.msrb.mxu2 %v9262_v38 }
 0x8eb   :  { %3093 = vmatpush.msrb.mxu3 %v9311_v42  ;;  %2998 = vmatpush.msra.mxu0 %v9209_v63 }
 0x8ec   :  { %3060 = vmatpush.msrb.mxu2 %v11202_v51  ;;  %3154 = vmatpush.msrb.mxu1 %v9255_v32 }
 0x8ed   :  { %2881 = vmatmul.f32.vlgmr.msrb.gmra.mxu0 %v9732_v48  ;;  %3037 = vmatmul.f32.vlgmr.msra.gmra.mxu1 %v9714_v62  ;;  %v11208_v48 = vld [vmem:[#allocation51_spill] sm:$0xff] }
 0x8ee   :  { %3099 = vmatpush.msrb.mxu3 %v11203_v39  ;;  %3002 = vmatpush.msra.mxu0 %v11204_v53 }
 0x8ef   :  { %3066 = vmatmul.f32.vlgmr.msrb.gmra.mxu2 %v2651_v6  ;;  %3156 = vmatpush.msrb.mxu1 %v9257_v36  ;;  %v11221_v6 = vld [vmem:[#allocation64_spill] sm:$0xff] }
 0x8f0   :  { %3105 = vmatpush.msrb.mxu3 %v11205_v41  ;;  %3183 = vmatpush.msra.mxu2 %v11206_v10 }
 0x8f1   :  { %3006 = vmatpush.msra.mxu0 %v11207_v35  ;;  %3107 = vmatmul.f32.vlgmr.msrb.gmra.mxu3 %v9759_v1 }
 0x8f2   :  { %3158 = vmatpush.msrb.mxu1 %v9262_v38  ;;  %3187 = vmatpush.msra.mxu2 %v11208_v48 }
 0x8f3   :  { %3214 = vmatpush.msra.mxu3 %v9255_v32  ;;  %3010 = vmatpush.msra.mxu0 %v11209_v50 }
 0x8f4   :  { %3160 = vmatpush.msrb.mxu1 %v11202_v51  ;;  %3191 = vmatpush.msra.mxu2 %v11210_v31 }
 0x8f5   :  { %3216 = vmatpush.msra.mxu3 %v9257_v36  ;;  %3012 = vmatmul.f32.vlgmr.msra.gmra.mxu0 %v9714_v62  ;;  %v11216_v62 = vld [vmem:[#allocation68_spill] sm:$0xff] }
 0x8f6   :  { %3125 = vmatpush.msrb.mxu0 %v11211_v56  ;;  %3164 = vmatmul.f32.vlgmr.msrb.gmra.mxu1 %v9766_v26  ;;  %v11218_v26 = vld [vmem:[#allocation52_spill] sm:$0xff] }
 0x8f7   :  { %3195 = vmatpush.msra.mxu2 %v11212_v58  ;;  %3218 = vmatpush.msra.mxu3 %v9262_v38 }
 0x8f8   :  { %3128 = vmatpush.msrb.mxu0 %v11213_v54  ;;  %3197 = vmatmul.f32.vlgmr.msra.gmra.mxu2 %v9759_v1  ;;  %v11222_v54 = vld [vmem:[#allocation62_spill] sm:$0xff] }
 0x8f9   :  { %3220 = vmatpush.msra.mxu3 %v11202_v51  ;;  %3315 = vmatpush.msra.mxu1 %v11214_v43  ;;  %v11223_v43 = vld [vmem:[#allocation77_spill] sm:$0xff] }
 0x8fa   :  { %3131 = vmatpush.msrb.mxu0 %v11215_v46  ;;  %3222 = vmatmul.f32.vlgmr.msra.gmra.mxu3 %v9759_v1  ;;  %v11224_v1 = vld [vmem:[#allocation71_spill] sm:$0xff] }
 0x8fb   :  { %3321 = vmatpush.msra.mxu1 %v11216_v62  ;;  %3353 = vmatpush.msrb.mxu2 %v11217_v3  ;;  %v11225_v62 = vld [vmem:[#allocation70_spill] sm:$0xff] }
 0x8fc   :  { %3134 = vmatpush.msrb.mxu0 %v11218_v26  ;;  %3382 = vmatpush.msrb.mxu3 %v11219_v45  ;;  %v11226_v26 = vld [vmem:[#allocation74_spill] sm:$0xff] }
 0x8fd   :  { %3137 = vmatmul.f32.vlgmr.msrb.gmra.mxu0 %v9762_v44  ;;  %3327 = vmatpush.msra.mxu1 %v11220_v34  ;;  %v11227_v44 = vld [vmem:[#allocation72_spill] sm:$0xff]  ;;  %v11234_v34 = vld [vmem:[#allocation93_spill] sm:$0xff] }
 0x8fe   :  { %3356 = vmatpush.msrb.mxu2 %v11221_v6  ;;  %3384 = vmatpush.msrb.mxu3 %v11222_v54  ;;  %v11228_v6 = vld [vmem:[#allocation87_spill] sm:$0xff] }
 0x8ff   :  { %3333 = vmatpush.msra.mxu1 %v11223_v43  ;;  %3282 = vmatpush.msra.mxu0 %v11219_v45  ;;  %v11230_v43 = vld [vmem:[#allocation90_spill] sm:$0xff] }
 0x900   :  { %3359 = vmatpush.msrb.mxu2 %v11224_v1  ;;  %3386 = vmatpush.msrb.mxu3 %v11225_v62  ;;  %v11229_v1 = vld [vmem:[#allocation65_spill] sm:$0xff] }
 0x901   :  { %3442 = vmatpush.msrb.mxu1 %v11219_v45  ;;  %3284 = vmatpush.msra.mxu0 %v11222_v54 }
 0x902   :  { %3362 = vmatpush.msrb.mxu2 %v11226_v26  ;;  %3388 = vmatpush.msrb.mxu3 %v11227_v44  ;;  %v11231_v26 = vld [vmem:[#allocation66_spill] sm:$0xff] }
 0x903   :  { %3444 = vmatpush.msrb.mxu1 %v11222_v54  ;;  %3286 = vmatpush.msra.mxu0 %v11225_v62  ;;  %v11232_v54 = vld [vmem:[#allocation92_spill] sm:$0xff] }
 0x904   :  { %3504 = vmatpush.msra.mxu3 %v11228_v6  ;;  %3471 = vmatpush.msra.mxu2 %v11174_v47  ;;  %v11233_v6 = vld [vmem:[#allocation73_spill] sm:$0xff] }
 0x905   :  { %3446 = vmatpush.msrb.mxu1 %v11225_v62  ;;  %3288 = vmatpush.msra.mxu0 %v11227_v44  ;;  %v11235_v62 = vld [vmem:[#allocation75_spill] sm:$0xff] }
 0x906   :  { %3510 = vmatpush.msra.mxu3 %v11230_v43  ;;  %3473 = vmatpush.msra.mxu2 %v11177_v61 }
 0x907   :  { %3411 = vmatpush.msrb.mxu0 %v11229_v1  ;;  %3448 = vmatpush.msrb.mxu1 %v11227_v44  ;;  %v11236_v44 = vld [vmem:[#allocation78_spill] sm:$0xff] }
 0x908   :  { %3516 = vmatpush.msra.mxu3 %v11232_v54  ;;  %3475 = vmatpush.msra.mxu2 %v11180_v12 }
 0x909   :  { %3415 = vmatpush.msrb.mxu0 %v11231_v26 }
 0x90a   :  { %3522 = vmatpush.msra.mxu3 %v11234_v34  ;;  %3477 = vmatpush.msra.mxu2 %v11183_v19 }
 0x90b   :  { %3419 = vmatpush.msrb.mxu0 %v11233_v6 }
 0x90d   :  { %3423 = vmatpush.msrb.mxu0 %v11235_v62 }
 0x94a   :  { %v2501_v1 = vpop.f32.mrf.mxu1 }
 0x952   :  { %v2460_v43 = vpop.f32.mrf.mxu0  ;;  %v2531_v45 = vpop.f32.mrf.mxu2 }
 0x953   :  { %v2461_v3 = vadd.f32 %v11236_v44, %v2460_v43  ;;  %v2616_v46 = vpop.f32.mrf.mxu1 }
 0x954   :  { %v2558_v58 = vpop.f32.mrf.mxu3 }
 0x955   :  { %v2502_v26 = vadd.f32 %v2501_v1, %v2461_v3 }
 0x957   :  { %v2532_v56 = vadd.f32 %v2531_v45, %v2502_v26 }
 0x959   :  { %v2559_v54 = vadd.f32 %v2558_v58, %v2532_v56 }
 0x95a   :  { %v2591_v31 = vpop.f32.mrf.mxu0  ;;  %v2653_v50 = vpop.f32.mrf.mxu2 }
 0x95b   :  { %v2592_v48 = vadd.f32 %v2591_v31, %v2559_v54  ;;  %v2751_v34 = vpop.f32.mrf.mxu1 }
 0x95c   :  { %v2694_v6 = vpop.f32.mrf.mxu3 }
 0x95d   :  { %v2617_v35 = vadd.f32 %v2616_v46, %v2592_v48 }
 0x95f   :  { %8600 = vst [vmem:[%s10900_s11 + $0x2] sm:$0x3] %v2617_v35 }
 0x962   :  { %v2724_v62 = vpop.f32.mrf.mxu0  ;;  %v2784_v10 = vpop.f32.mrf.mxu2 }
 0x963   :  { %v2923_v53 = vpop.f32.mrf.mxu1 }
 0x964   :  { %v2809_v41 = vpop.f32.mrf.mxu3 }
 0x96a   :  { %v2882_v43 = vpop.f32.mrf.mxu0  ;;  %v2953_v44 = vpop.f32.mrf.mxu2 }
 0x96b   :  { %v2924_v39 = vadd.f32 %v2923_v53, %v2882_v43  ;;  %v3038_v58 = vpop.f32.mrf.mxu1 }
 0x96c   :  { %v2980_v3 = vpop.f32.mrf.mxu3 }
 0x96d   :  { %v2954_v26 = vadd.f32 %v2953_v44, %v2924_v39  ;;  %v9889_v39 = vld [vmem:[%s10895_s6] ss:$0 sm:$0xff] }
 0x96f   :  { %v2981_v56 = vadd.f32 %v2980_v3, %v2954_v26 }
 0x972   :  { %v3013_v45 = vpop.f32.mrf.mxu0  ;;  %v3067_v54 = vpop.f32.mrf.mxu2 }
 0x973   :  { %v3014_v31 = vadd.f32 %v3013_v45, %v2981_v56  ;;  %v3165_v42 = vpop.f32.mrf.mxu1 }
 0x974   :  { %v3108_v46 = vpop.f32.mrf.mxu3 }
 0x975   :  { %v3039_v48 = vadd.f32 %v3038_v58, %v3014_v31 }
 0x977   :  { %v3068_v1 = vadd.f32 %v3067_v54, %v3039_v48 }
 0x979   :  { %v3109_v51 = vadd.f32 %v3108_v46, %v3068_v1 }
 0x97a   :  { %v3138_v63 = vpop.f32.mrf.mxu0 }
 0x97b   :  { %v3139_v35 = vadd.f32 %v3138_v63, %v3109_v51  ;;  %v3198_v36 = vpop.f32.mrf.mxu2 }
 0x97d   :  { %v3166_v38 = vadd.f32 %v3165_v42, %v3139_v35  ;;  %v3223_v32 = vpop.f32.mrf.mxu3 }
 0x97f   :  { %v3199_v33 = vadd.f32 %v3198_v36, %v3166_v38  ;;  %v2695_v36 = vadd.f32 %v2694_v6, %v2653_v50 }
 0x981   :  { %v3224_v7 = vadd.f32 %v3223_v32, %v3199_v33  ;;  %v2725_v38 = vadd.f32 %v2724_v62, %v2695_v36 }
 0x983   :  { %v3226_v53 = vadd.f32 %v9889_v39, %v3224_v7  ;;  %v2752_v33 = vadd.f32 %v2751_v34, %v2725_v38 }
 0x985   :  { %8676 = vtanh.f32 %v3226_v53  ;;  %v8602_v44 = vmul.f32 -1.442695, %v3226_v53  ;;  %v2785_v26 = vadd.f32 %v2784_v10, %v2752_v33 }
 0x987   :  { %8678 = vpow2.f32 %v8602_v44  ;;  %v2810_v58 = vadd.f32 %v2809_v41, %v2785_v26 }
 0x989   :  { %v2813_v54 = vrot.slane %v2810_v58, 2 }
 0x98b   :  { %v8677_v43 = vpop.eup %8676  ;;  %v2815_v1 = vadd.f32 %v2813_v54, %v11187_v4 }
 0x98c   :  { %3249 = vrot.lane.b32.xlu2 %v8677_v43, %s8960_s19 }
 0x98d   :  { %v8679_v63 = vpop.eup %8678  ;;  %v8601_v41 = vmul.f32 -1.442695, %v2815_v1 }
 0x98e   :  { %v3230_v51 = vadd.f32 1.0, %v8679_v63 }
 0x990   :  { %8680 = vrcp.f32 %v3230_v51  ;;  %v3242_v7 = vand.u32 2147483648, %v3230_v51  ;;  %vm3236_vm9 = vweird.f32 %v3230_v51  ;;  %v3240_v31 = vand.u32 2147483647, %v3230_v51 }
 0x991   :  { %8682 = vtanh.f32 %v2815_v1 }
 0x992   :  { %v3243_v46 = vor.u32 1.1754944e-38, %v3242_v7  ;;  %vm3241_vm11 = vcmp.eq.f32.partialorder %v3240_v31, 8.507059e+37  ;;  %8684 = vpow2.f32 %v8601_v41  ;;  %v2837_v31 = vrot.slane %v9709_v22, 6 }
 0x996   :  { %v8681_v42 = vpop.eup %8680 }
 0x997   :  { %v3232_v32 = vmul.f32 %v8681_v42, %v3230_v51  ;;  %vm3237_vm8 = vweird.f32 %v8681_v42  ;;  %v8683_v10 = vpop.eup %8682 }
 0x998   :  { %vm3238_vm10 = vmor %vm3236_vm9, %vm3237_vm8  ;;  %v8685_v34 = vpop.eup %8684 }
 0x999   :  { %v3233_v3 = vsub.f32 1.0, %v3232_v32  ;;  %v2819_v35 = vadd.f32 1.0, %v8685_v34 }
 0x99b   :  { %v3234_v56 = vmul.f32 %v8681_v42, %v3233_v3  ;;  %8686 = vrcp.f32 %v2819_v35  ;;  %v2831_v32 = vand.u32 2147483648, %v2819_v35  ;;  %vm2825_vm13 = vweird.f32 %v2819_v35 }
 0x99c   :  { %v2829_v33 = vand.u32 2147483647, %v2819_v35 }
 0x99d   :  { %v3235_v45 = vadd.f32 %v8681_v42, %v3234_v56  ;;  %v2832_v56 = vor.u32 1.1754944e-38, %v2831_v32  ;;  %v11243_v32 = vld [vmem:[#allocation23_spill] sm:$0xff] }
 0x99e   :  { %vm2830_vm15 = vcmp.eq.f32.partialorder %v2829_v33, 8.507059e+37 }
 0x99f   :  { %v3239_v48 = vsel %vm3238_vm10, %v8681_v42, %v3235_v45 }
 0x9a0   :  { %v3244_v62 = vsel %vm3241_vm11, %v3243_v46, %v3239_v48 }
 0x9a1   :  { %v8687_v53 = vpop.eup %8686  ;;  %v3247_v44 = vmul.f32 %v3244_v62, %v9702_v40 }
 0x9a2   :  { %v2821_v43 = vmul.f32 %v8687_v53, %v2819_v35  ;;  %vm2826_vm12 = vweird.f32 %v8687_v53 }
 0x9a3   :  { %vm2827_vm14 = vmor %vm2825_vm13, %vm2826_vm12 }
 0x9a4   :  { %v2822_v4 = vsub.f32 1.0, %v2821_v43 }
 0x9a6   :  { %v2823_v42 = vmul.f32 %v8687_v53, %v2822_v4  ;;  %v11240_v4 = vld [vmem:[#allocation85_spill] sm:$0xff] }
 0x9a8   :  { %v2824_v36 = vadd.f32 %v8687_v53, %v2823_v42 }
 0x9aa   :  { %v2828_v3 = vsel %vm2827_vm14, %v8687_v53, %v2824_v36  ;;  %v11237_v53 = vld [vmem:[#allocation82_spill] sm:$0xff] }
 0x9ab   :  { %v2833_v40 = vsel %vm2830_vm15, %v2832_v56, %v2828_v3  ;;  %v11241_v36 = vld [vmem:[#allocation22_spill] sm:$0xff] }
 0x9ac   :  { %v2839_v54 = vmul.f32 %v2837_v31, %v2833_v40 }
 0x9e6   :  { %v3250_v50 = vpop.permute.xlu2 %3249 }
 0x9e7   :  { %v3252_v6 = vmul.f32 %v3250_v50, %v3244_v62 }
 0x9e9   :  { %3254 = vrot.lane.b32.xlu0 %v3252_v6, %s8960_s19 }
 0x9f1   :  { %2841 = vrot.lane.b32.xlu0 %v8683_v10, %s8960_s19 }
 0xa5b   :  { %v3255_v63 = vpop.permute.xlu0 %3254 }
 0xa5c   :  { %v9897_v51 = vadd.f32 %v3255_v63, %v3247_v44  ;;  %v11238_v44 = vld [vmem:[#allocation21_spill] sm:$0xff]  ;;  %v11239_v63 = vld [vmem:[#allocation91_spill] sm:$0xff] }
 0xa5e   :  { %8688 = vtanh.f32 %v9897_v51 }
 0xa63   :  { %v2842_v26 = vpop.permute.xlu0 %2841 }
 0xa64   :  { %v8689_v38 = vpop.eup %8688  ;;  %v2844_v58 = vmul.f32 %v2842_v26, %v2833_v40  ;;  %v9955_v26 = vld [vmem:[%s10897_s8] ss:$0 sm:$0xff] }
 0xa65   :  { %3260 = vrot.lane.b32.xlu1 %v8689_v38, %s8960_s19  ;;  %v11242_v38 = vld [vmem:[#allocation89_spill] sm:$0xff] }
 0xa6d   :  { %2846 = vrot.lane.b32.xlu1 %v2844_v58, %s8960_s19 }
 0xad7   :  { %v3261_v45 = vpop.permute.xlu1 %3260 }
 0xad8   :  { %v3263_v7 = vmul.f32 %v3261_v45, %v3244_v62 }
 0xada   :  { %3265 = vrot.lane.b32.xlu2 %v3263_v7, %s8961_s20 }
 0xadf   :  { %v2847_v48 = vpop.permute.xlu1 %2846 }
 0xae0   :  { %v9904_v46 = vadd.f32 %v2847_v48, %v2839_v54 }
 0xae2   :  { %8690 = vtanh.f32 %v9904_v46 }
 0xae8   :  { %v8691_v1 = vpop.eup %8690 }
 0xae9   :  { %2852 = vrot.lane.b32.xlu2 %v8691_v1, %s8960_s19 }
 0xb34   :  { %v3266_v50 = vpop.permute.xlu2 %3265 }
 0xb35   :  { %v3267_v6 = vsel %vm339_vm6, %v3266_v50, 0 }
 0xb36   :  { %v9909_v10 = vand.u32 4294901760, %v3267_v6 }
 0xb38   :  { %v9912_v62 = vsub.f32 %v3267_v6, %v9909_v10  ;;  %3335 = vmatmul.f32.vlgmr.msra.gmra.mxu1 %v9909_v10 }
 0xb39   :  { %3571 = vmatpush.msra.mxu1 %v11174_v47 }
 0xb3a   :  { %v9917_v22 = vand.u32 4294901760, %v9912_v62  ;;  %3365 = vmatmul.f32.vlgmr.msrb.gmra.mxu2 %v9912_v62 }
 0xb3b   :  { %3573 = vmatpush.msra.mxu1 %v11177_v61  ;;  %3600 = vmatpush.msrb.mxu2 %v11190_v49 }
 0xb3c   :  { %v3292_v41 = vsub.f32 %v9912_v62, %v9917_v22  ;;  %3392 = vmatmul.f32.vlgmr.msrb.gmra.mxu3 %v9917_v22 }
 0xb3d   :  { %3575 = vmatpush.msra.mxu1 %v11180_v12  ;;  %3631 = vmatpush.msrb.mxu3 %v11174_v47 }
 0xb3e   :  { %v9927_v34 = vand.u32 4294901760, %v3292_v41  ;;  %3604 = vmatpush.msrb.mxu2 %v11191_v37 }
 0xb3f   :  { %3577 = vmatpush.msra.mxu1 %v11183_v19  ;;  %3633 = vmatpush.msrb.mxu3 %v11177_v61 }
 0xb40   :  { %3294 = vmatmul.f32.vlgmr.msra.gmra.mxu0 %v9927_v34  ;;  %3450 = vmatmul.f32.vlgmr.msrb.gmra.mxu1 %v9909_v10 }
 0xb41   :  { %3542 = vmatpush.msra.mxu0 %v11192_v52  ;;  %3635 = vmatpush.msrb.mxu3 %v11180_v12 }
 0xb42   :  { %3697 = vmatpush.msrb.mxu1 %v11193_v55  ;;  %3608 = vmatpush.msrb.mxu2 %v11194_v13 }
 0xb43   :  { %v2853_v35 = vpop.permute.xlu2 %2852  ;;  %3545 = vmatpush.msra.mxu0 %v11237_v53  ;;  %3637 = vmatpush.msrb.mxu3 %v11183_v19 }
 0xb44   :  { %v2855_v43 = vmul.f32 %v2853_v35, %v2833_v40  ;;  %3703 = vmatpush.msrb.mxu1 %v11238_v44  ;;  %3612 = vmatpush.msrb.mxu2 %v11239_v63 }
 0xb45   :  { %3548 = vmatpush.msra.mxu0 %v11240_v4 }
 0xb46   :  { %v3646_v42 = vrot.slane %v2855_v43, 6  ;;  %3709 = vmatpush.msrb.mxu1 %v11241_v36 }
 0xb47   :  { %3551 = vmatpush.msra.mxu0 %v11242_v38 }
 0xb48   :  { %3425 = vmatmul.f32.vlgmr.msrb.gmra.mxu0 %v9909_v10  ;;  %3647 = vrot.lane.b32.xlu0 %v3646_v42, %s8961_s20 }
 0xb49   :  { %3664 = vmatpush.msrb.mxu0 %v9057_v5  ;;  %3715 = vmatpush.msrb.mxu1 %v11243_v32 }
 0xb4b   :  { %3666 = vmatpush.msrb.mxu0 %v9064_v11 }
 0xb4d   :  { %3668 = vmatpush.msrb.mxu0 %v9071_v16 }
 0xb4f   :  { %3670 = vmatpush.msrb.mxu0 %v9073_v17 }
 0xbb5   :  { %v3336_v33 = vpop.f32.mrf.mxu1 }
 0xbba   :  { %v3648_v58 = vpop.permute.xlu0 %3647 }
 0xbbb   :  { %v3649_v54 = vsel %vm339_vm6, %v3648_v58, 0 }
 0xbbc   :  { %v9959_v6 = vand.u32 4294901760, %v3649_v54 }
 0xbbd   :  { %v3295_v3 = vpop.f32.mrf.mxu0  ;;  %v3366_v45 = vpop.f32.mrf.mxu2 }
 0xbbe   :  { %v3296_v56 = vadd.f32 %v9955_v26, %v3295_v3  ;;  %v3451_v41 = vpop.f32.mrf.mxu1  ;;  %v9962_v42 = vsub.f32 %v3649_v54, %v9959_v6 }
 0xbbf   :  { %v3393_v31 = vpop.f32.mrf.mxu3 }
 0xbc0   :  { %v3337_v40 = vadd.f32 %v3336_v33, %v3296_v56  ;;  %v9966_v56 = vand.u32 4294901760, %v9962_v42 }
 0xbc2   :  { %v3367_v7 = vadd.f32 %v3366_v45, %v3337_v40  ;;  %v3674_v45 = vsub.f32 %v9962_v42, %v9966_v56 }
 0xbc4   :  { %v3394_v48 = vadd.f32 %v3393_v31, %v3367_v7  ;;  %v3675_v54 = vand.u32 4294901760, %v3674_v45  ;;  %v11256_v45 = vld [vmem:[#allocation39_spill] sm:$0xff] }
 0xbc5   :  { %v3426_v1 = vpop.f32.mrf.mxu0 }
 0xbc6   :  { %v3427_v50 = vadd.f32 %v3426_v1, %v3394_v48  ;;  %v11244_v48 = vld [vmem:[#allocation37_spill] sm:$0xff]  ;;  %v11245_v1 = vld [vmem:[#allocation43_spill] sm:$0xff] }
 0xbc8   :  { %v3452_v35 = vadd.f32 %v3451_v41, %v3427_v50  ;;  %v11246_v50 = vld [vmem:[#allocation54_spill] sm:$0xff]  ;;  %v11247_v41 = vld [vmem:[#allocation44_spill] sm:$0xff] }
 0xbca   :  { %v3454_v43 = vmax.f32 %v3452_v35, 0.0  ;;  %v11248_v35 = vld [vmem:[#allocation46_spill] sm:$0xff] }
 0xbcc   :  { %v3456_v3 = vsel %vm339_vm6, %v3454_v43, 0  ;;  %v11249_v43 = vld [vmem:[#allocation56_spill] sm:$0xff] }
 0xbcd   :  { %v3478_v33 = vand.u32 4294901760, %v3456_v3 }
 0xbcf   :  { %v3479_v40 = vsub.f32 %v3456_v3, %v3478_v33  ;;  %3524 = vmatmul.f32.vlgmr.msra.gmra.mxu3 %v3478_v33  ;;  %v11250_v3 = vld [vmem:[#allocation33_spill] sm:$0xff] }
 0xbd0   :  { %3764 = vmatpush.msra.mxu3 %v9057_v5 }
 0xbd1   :  { %v3480_v58 = vand.u32 4294901760, %v3479_v40  ;;  %3554 = vmatmul.f32.vlgmr.msra.gmra.mxu0 %v3479_v40 }
 0xbd2   :  { %3766 = vmatpush.msra.mxu3 %v9064_v11  ;;  %3793 = vmatpush.msra.mxu0 %v9080_v21 }
 0xbd3   :  { %v3481_v7 = vsub.f32 %v3479_v40, %v3480_v58  ;;  %3581 = vmatmul.f32.vlgmr.msra.gmra.mxu1 %v3480_v58  ;;  %v11254_v40 = vld [vmem:[#allocation58_spill] sm:$0xff]  ;;  %v11255_v58 = vld [vmem:[#allocation48_spill] sm:$0xff] }
 0xbd4   :  { %3768 = vmatpush.msra.mxu3 %v9071_v16  ;;  %3797 = vmatpush.msra.mxu0 %v9090_v27 }
 0xbd5   :  { %v3482_v31 = vand.u32 4294901760, %v3481_v7  ;;  %3824 = vmatpush.msra.mxu1 %v9057_v5  ;;  %v11258_v7 = vld [vmem:[#allocation41_spill] sm:$0xff] }
 0xbd6   :  { %3770 = vmatpush.msra.mxu3 %v9073_v17  ;;  %3801 = vmatpush.msra.mxu0 %v9095_v29 }
 0xbd7   :  { %3483 = vmatmul.f32.vlgmr.msra.gmra.mxu2 %v3482_v31  ;;  %3639 = vmatmul.f32.vlgmr.msrb.gmra.mxu3 %v3478_v33  ;;  %v11259_v31 = vld [vmem:[#allocation53_spill] sm:$0xff] }
 0xbd8   :  { %3826 = vmatpush.msra.mxu1 %v9064_v11  ;;  %3735 = vmatpush.msra.mxu2 %v9067_v14 }
 0xbd9   :  { %3676 = vmatmul.f32.vlgmr.msrb.gmra.mxu0 %v3675_v54  ;;  %3923 = vmatpush.msrb.mxu3 %v9227_v9 }
 0xbda   :  { %3805 = vmatpush.msra.mxu0 %v9098_v30  ;;  %3828 = vmatpush.msra.mxu1 %v9071_v16 }
 0xbdb   :  { %3717 = vmatmul.f32.vlgmr.msrb.gmra.mxu1 %v9959_v6  ;;  %3738 = vmatpush.msra.mxu2 %v9077_v20 }
 0xbdc   :  { %3830 = vmatpush.msra.mxu1 %v9073_v17  ;;  %3929 = vmatpush.msrb.mxu3 %v9239_v18 }
 0xbdd   :  { %3961 = vmatpush.msrb.mxu0 %v9205_v60  ;;  %3741 = vmatpush.msra.mxu2 %v9084_v23 }
 0xbde   :  { %3935 = vmatpush.msrb.mxu3 %v9247_v25  ;;  %3990 = vmatpush.msrb.mxu1 %v9199_v57 }
 0xbdf   :  { %3614 = vmatmul.f32.vlgmr.msrb.gmra.mxu2 %v3478_v33  ;;  %3774 = vmatmul.f32.vlgmr.msra.gmra.mxu3 %v9966_v56  ;;  %v11251_v33 = vld [vmem:[#allocation49_spill] sm:$0xff] }
 0xbe0   :  { %3964 = vmatpush.msrb.mxu0 %v9214_v2  ;;  %3744 = vmatpush.msra.mxu2 %v9087_v24 }
 0xbe1   :  { %3807 = vmatmul.f32.vlgmr.msra.gmra.mxu0 %v9959_v6  ;;  %3941 = vmatpush.msrb.mxu3 %v9252_v28 }
 0xbe2   :  { %3967 = vmatpush.msrb.mxu0 %v9225_v8  ;;  %3992 = vmatpush.msrb.mxu1 %v9202_v59 }
 0xbe3   :  { %3832 = vmatmul.f32.vlgmr.msra.gmra.mxu1 %v9959_v6  ;;  %3890 = vmatpush.msrb.mxu2 %v9199_v57 }
 0xbe4   :  { %3970 = vmatpush.msrb.mxu0 %v9236_v15  ;;  %3994 = vmatpush.msrb.mxu1 %v9211_v0 }
 0xbe5   :  { %4050 = vmatpush.msra.mxu3 %v9199_v57  ;;  %3892 = vmatpush.msrb.mxu2 %v9202_v59 }
 0xbe6   :  { %3996 = vmatpush.msrb.mxu1 %v11244_v48  ;;  %4075 = vmatpush.msra.mxu0 %v11245_v1 }
 0xbe7   :  { %3747 = vmatmul.f32.vlgmr.msra.gmra.mxu2 %v9962_v42  ;;  %3943 = vmatmul.f32.vlgmr.msrb.gmra.mxu3 %v9909_v10 }
 0xbe8   :  { %4052 = vmatpush.msra.mxu3 %v9202_v59  ;;  %3894 = vmatpush.msrb.mxu2 %v9211_v0 }
 0xbe9   :  { %3973 = vmatmul.f32.vlgmr.msrb.gmra.mxu0 %v9912_v62  ;;  %4108 = vmatpush.msra.mxu1 %v11246_v50  ;;  %v11252_v62 = vld [vmem:[#allocation57_spill] sm:$0xff] }
 0xbea   :  { %4054 = vmatpush.msra.mxu3 %v9211_v0  ;;  %4077 = vmatpush.msra.mxu0 %v11247_v41 }
 0xbeb   :  { %4000 = vmatmul.f32.vlgmr.msrb.gmra.mxu1 %v9917_v22  ;;  %3896 = vmatpush.msrb.mxu2 %v11244_v48  ;;  %v11253_v22 = vld [vmem:[#allocation36_spill] sm:$0xff] }
 0xbec   :  { %4056 = vmatpush.msra.mxu3 %v11244_v48  ;;  %4079 = vmatpush.msra.mxu0 %v11248_v35 }
 0xbed   :  { %4114 = vmatpush.msra.mxu1 %v11249_v43  ;;  %4019 = vmatpush.msra.mxu2 %v11250_v3 }
 0xbee   :  { %4081 = vmatpush.msra.mxu0 %v11251_v33  ;;  %4175 = vmatpush.msrb.mxu3 %v11245_v1 }
 0xbef   :  { %3902 = vmatmul.f32.vlgmr.msrb.gmra.mxu2 %v9927_v34  ;;  %4058 = vmatmul.f32.vlgmr.msra.gmra.mxu3 %v9909_v10  ;;  %v11257_v34 = vld [vmem:[#allocation51_spill] sm:$0xff] }
 0xbf0   :  { %4120 = vmatpush.msra.mxu1 %v11252_v62  ;;  %4023 = vmatpush.msra.mxu2 %v11253_v22 }
 0xbf1   :  { %4087 = vmatmul.f32.vlgmr.msra.gmra.mxu0 %v3675_v54  ;;  %4177 = vmatpush.msrb.mxu3 %v11247_v41  ;;  %v11260_v54 = vld [vmem:[#allocation45_spill] sm:$0xff] }
 0xbf2   :  { %4126 = vmatpush.msra.mxu1 %v11254_v40  ;;  %4204 = vmatpush.msrb.mxu0 %v11255_v58  ;;  %v11270_v58 = vld [vmem:[#allocation64_spill] sm:$0xff]  ;;  %v11271_v40 = vld [vmem:[#allocation62_spill] sm:$0xff] }
 0xbf3   :  { %4027 = vmatpush.msra.mxu2 %v11256_v45  ;;  %4128 = vmatmul.f32.vlgmr.msra.gmra.mxu1 %v9959_v6  ;;  %v11261_v45 = vld [vmem:[#allocation55_spill] sm:$0xff] }
 0xbf4   :  { %4179 = vmatpush.msrb.mxu3 %v11248_v35  ;;  %4208 = vmatpush.msrb.mxu0 %v11257_v34  ;;  %v11262_v34 = vld [vmem:[#allocation47_spill] sm:$0xff] }
 0xbf5   :  { %4235 = vmatpush.msrb.mxu1 %v11245_v1  ;;  %4031 = vmatpush.msra.mxu2 %v11258_v7  ;;  %v11263_v7 = vld [vmem:[#allocation67_spill] sm:$0xff] }
 0xbf6   :  { %4181 = vmatpush.msrb.mxu3 %v11251_v33  ;;  %4212 = vmatpush.msrb.mxu0 %v11259_v31  ;;  %v11264_v31 = vld [vmem:[#allocation50_spill] sm:$0xff] }
 0xbf7   :  { %4237 = vmatpush.msrb.mxu1 %v11247_v41  ;;  %4033 = vmatmul.f32.vlgmr.msra.gmra.mxu2 %v9909_v10  ;;  %v11265_v10 = vld [vmem:[#allocation68_spill] sm:$0xff] }
 0xbf8   :  { %4146 = vmatpush.msrb.mxu2 %v11260_v54  ;;  %4185 = vmatmul.f32.vlgmr.msrb.gmra.mxu3 %v9966_v56  ;;  %v11266_v54 = vld [vmem:[#allocation63_spill] sm:$0xff]  ;;  %v11267_v56 = vld [vmem:[#allocation52_spill] sm:$0xff] }
 0xbf9   :  { %4216 = vmatpush.msrb.mxu0 %v11261_v45  ;;  %4239 = vmatpush.msrb.mxu1 %v11248_v35  ;;  %v11268_v45 = vld [vmem:[#allocation61_spill] sm:$0xff] }
 0xbfa   :  { %4149 = vmatpush.msrb.mxu2 %v11262_v34  ;;  %4218 = vmatmul.f32.vlgmr.msrb.gmra.mxu0 %v9959_v6  ;;  %v11269_v34 = vld [vmem:[#allocation76_spill] sm:$0xff] }
 0xbfb   :  { %4241 = vmatpush.msrb.mxu1 %v11251_v33  ;;  %4336 = vmatpush.msra.mxu3 %v11263_v7  ;;  %v11272_v7 = vld [vmem:[#allocation77_spill] sm:$0xff] }
 0xbfc   :  { %4152 = vmatpush.msrb.mxu2 %v11264_v31  ;;  %4243 = vmatmul.f32.vlgmr.msrb.gmra.mxu1 %v9959_v6  ;;  %v11273_v6 = vld [vmem:[#allocation71_spill] sm:$0xff] }
 0xbfd   :  { %4342 = vmatpush.msra.mxu3 %v11265_v10  ;;  %4374 = vmatpush.msra.mxu0 %v11266_v54  ;;  %v11274_v10 = vld [vmem:[#allocation70_spill] sm:$0xff] }
 0xbfe   :  { %4155 = vmatpush.msrb.mxu2 %v11267_v56  ;;  %4403 = vmatpush.msra.mxu1 %v11268_v45  ;;  %v11275_v56 = vld [vmem:[#allocation74_spill] sm:$0xff] }
 0xbff   :  { %4158 = vmatmul.f32.vlgmr.msrb.gmra.mxu2 %v9962_v42  ;;  %4348 = vmatpush.msra.mxu3 %v11269_v34  ;;  %v11276_v42 = vld [vmem:[#allocation72_spill] sm:$0xff]  ;;  %v11283_v34 = vld [vmem:[#allocation93_spill] sm:$0xff] }
 0xc00   :  { %4377 = vmatpush.msra.mxu0 %v11270_v58  ;;  %4405 = vmatpush.msra.mxu1 %v11271_v40  ;;  %v11277_v58 = vld [vmem:[#allocation87_spill] sm:$0xff] }
 0xc01   :  { %4354 = vmatpush.msra.mxu3 %v11272_v7  ;;  %4303 = vmatpush.msra.mxu2 %v11268_v45  ;;  %v11279_v7 = vld [vmem:[#allocation90_spill] sm:$0xff] }
 0xc02   :  { %4380 = vmatpush.msra.mxu0 %v11273_v6  ;;  %4407 = vmatpush.msra.mxu1 %v11274_v10  ;;  %v11278_v6 = vld [vmem:[#allocation65_spill] sm:$0xff] }
 0xc03   :  { %4463 = vmatpush.msrb.mxu3 %v11268_v45  ;;  %4305 = vmatpush.msra.mxu2 %v11271_v40 }
 0xc04   :  { %4383 = vmatpush.msra.mxu0 %v11275_v56  ;;  %4409 = vmatpush.msra.mxu1 %v11276_v42  ;;  %v11280_v56 = vld [vmem:[#allocation66_spill] sm:$0xff] }
 0xc05   :  { %4465 = vmatpush.msrb.mxu3 %v11271_v40  ;;  %4307 = vmatpush.msra.mxu2 %v11274_v10  ;;  %v11281_v40 = vld [vmem:[#allocation92_spill] sm:$0xff] }
 0xc06   :  { %4525 = vmatpush.msrb.mxu1 %v11277_v58  ;;  %4492 = vmatpush.msrb.mxu0 %v11174_v47  ;;  %v11282_v58 = vld [vmem:[#allocation73_spill] sm:$0xff] }
 0xc07   :  { %4467 = vmatpush.msrb.mxu3 %v11274_v10  ;;  %4309 = vmatpush.msra.mxu2 %v11276_v42  ;;  %v11284_v10 = vld [vmem:[#allocation75_spill] sm:$0xff] }
 0xc08   :  { %4531 = vmatpush.msrb.mxu1 %v11279_v7  ;;  %4494 = vmatpush.msrb.mxu0 %v11177_v61 }
 0xc09   :  { %4432 = vmatpush.msrb.mxu2 %v11278_v6  ;;  %4469 = vmatpush.msrb.mxu3 %v11276_v42 }
 0xc0a   :  { %4537 = vmatpush.msrb.mxu1 %v11281_v40  ;;  %4496 = vmatpush.msrb.mxu0 %v11180_v12 }
 0xc0b   :  { %4436 = vmatpush.msrb.mxu2 %v11280_v56  ;;  %v10085_v56 = vld [vmem:[%s10899_s10] ss:$0 sm:$0xff] }
 0xc0c   :  { %4543 = vmatpush.msrb.mxu1 %v11283_v34  ;;  %4498 = vmatpush.msrb.mxu0 %v11183_v19  ;;  %11285 = vst [vmem:[#allocation80_spill] sm:$0xff] %v10085_v56 }
 0xc0d   :  { %4440 = vmatpush.msrb.mxu2 %v11282_v58 }
 0xc0f   :  { %4444 = vmatpush.msrb.mxu2 %v11284_v10 }
 0xc4e   :  { %v3555_v7 = vpop.f32.mrf.mxu0 }
 0xc50   :  { %v3582_v45 = vpop.f32.mrf.mxu1 }
 0xc52   :  { %v3525_v6 = vpop.f32.mrf.mxu3 }
 0xc56   :  { %v3677_v58 = vpop.f32.mrf.mxu0 }
 0xc58   :  { %v3718_v34 = vpop.f32.mrf.mxu1 }
 0xc5a   :  { %v3484_v42 = vpop.f32.mrf.mxu2  ;;  %v3640_v54 = vpop.f32.mrf.mxu3 }
 0xc5b   :  { %v3485_v40 = vadd.f32 %v10085_v56, %v3484_v42 }
 0xc5d   :  { %v3526_v31 = vadd.f32 %v3525_v6, %v3485_v40 }
 0xc5e   :  { %v3808_v35 = vpop.f32.mrf.mxu0 }
 0xc5f   :  { %v3556_v22 = vadd.f32 %v3555_v7, %v3526_v31 }
 0xc60   :  { %v3833_v41 = vpop.f32.mrf.mxu1 }
 0xc61   :  { %v3583_v62 = vadd.f32 %v3582_v45, %v3556_v22 }
 0xc62   :  { %v3615_v33 = vpop.f32.mrf.mxu2  ;;  %v3775_v43 = vpop.f32.mrf.mxu3 }
 0xc63   :  { %v3616_v3 = vadd.f32 %v3615_v33, %v3583_v62 }
 0xc65   :  { %v3641_v10 = vadd.f32 %v3640_v54, %v3616_v3 }
 0xc66   :  { %v3974_v48 = vpop.f32.mrf.mxu0 }
 0xc67   :  { %8603 = vst [vmem:[%s10900_s11 + $0x4] sm:$0x3] %v3641_v10 }
 0xc68   :  { %v4001_v40 = vpop.f32.mrf.mxu1 }
 0xc6a   :  { %v3748_v50 = vpop.f32.mrf.mxu2  ;;  %v3944_v1 = vpop.f32.mrf.mxu3 }
 0xc6e   :  { %v4088_v33 = vpop.f32.mrf.mxu0 }
 0xc70   :  { %v4129_v62 = vpop.f32.mrf.mxu1 }
 0xc72   :  { %v3903_v42 = vpop.f32.mrf.mxu2  ;;  %v4059_v31 = vpop.f32.mrf.mxu3 }
 0xc73   :  { %v3945_v56 = vadd.f32 %v3944_v1, %v3903_v42 }
 0xc75   :  { %v3975_v6 = vadd.f32 %v3974_v48, %v3945_v56 }
 0xc77   :  { %v4002_v7 = vadd.f32 %v4001_v40, %v3975_v6  ;;  %v4219_v28 = vpop.f32.mrf.mxu0 }
 0xc79   :  { %v4244_v2 = vpop.f32.mrf.mxu1 }
 0xc7a   :  { %v4034_v22 = vpop.f32.mrf.mxu2 }
 0xc7b   :  { %v4035_v45 = vadd.f32 %v4034_v22, %v4002_v7  ;;  %v4186_v59 = vpop.f32.mrf.mxu3  ;;  %v11288_v7 = vld [vmem:[#allocation25_spill] sm:$0xff] }
 0xc7d   :  { %v4060_v3 = vadd.f32 %v4059_v31, %v4035_v45 }
 0xc7f   :  { %v4089_v54 = vadd.f32 %v4088_v33, %v4060_v3  ;;  %v11289_v33 = vld [vmem:[#allocation27_spill] sm:$0xff] }
 0xc81   :  { %v4130_v0 = vadd.f32 %v4129_v62, %v4089_v54 }
 0xc82   :  { %v4159_v15 = vpop.f32.mrf.mxu2 }
 0xc83   :  { %v4160_v10 = vadd.f32 %v4159_v15, %v4130_v0  ;;  %v11286_v0 = vld [vmem:[#allocation24_spill] sm:$0xff] }
 0xc85   :  { %v4187_v8 = vadd.f32 %v4186_v59, %v4160_v10  ;;  %v8767_v59 = vld [vmem:[%s10892_s3] ss:$0 sm:$0xff]  ;;  %v11290_v10 = vld [vmem:[#allocation28_spill] sm:$0xff]  ;;  %s8571_s3 = sshll.u32 %s8964_s17, 4  ;;  %s8572_s3 = int_to_ptr.vmem [resolvable:$true] %s8571_s3 }
 0xc87   :  { %v4220_v24 = vadd.f32 %v4219_v28, %v4187_v8  ;;  %v171_v8 = vadd.f32 %v8767_v59, %v11286_v0 }
 0xc89   :  { %v4245_v57 = vadd.f32 %v4244_v2, %v4220_v24  ;;  %v3719_v24 = vadd.f32 %v3718_v34, %v3677_v58  ;;  %v11287_v2 = vld [vmem:[#allocation26_spill] sm:$0xff]  ;;  %v11291_v34 = vld [vmem:[#allocation29_spill] sm:$0xff] }
 0xc8b   :  { %v4247_v1 = vadd.f32 %v9889_v39, %v4245_v57  ;;  %v201_v57 = vadd.f32 %v11287_v2, %v171_v8  ;;  %v3749_v28 = vadd.f32 %v3748_v50, %v3719_v24 }
 0xc8d   :  { %8692 = vtanh.f32 %v4247_v1  ;;  %v8605_v56 = vmul.f32 -1.442695, %v4247_v1  ;;  %v230_v31 = vadd.f32 %v11288_v7, %v201_v57  ;;  %v3776_v22 = vadd.f32 %v3775_v43, %v3749_v28 }
 0xc8f   :  { %8694 = vpow2.f32 %v8605_v56  ;;  %v260_v3 = vadd.f32 %v11289_v33, %v230_v31  ;;  %v3809_v62 = vadd.f32 %v3808_v35, %v3776_v22 }
 0xc91   :  { %v288_v1 = vadd.f32 %v11290_v10, %v260_v3 }
 0xc93   :  { %v8693_v48 = vpop.eup %8692  ;;  %v10102_v50 = vadd.f32 %v11291_v34, %v288_v1 }
 0xc94   :  { %4270 = vrot.lane.b32.xlu1 %v8693_v48, %s8960_s19 }
 0xc95   :  { %v8695_v42 = vpop.eup %8694 }
 0xc96   :  { %v4251_v40 = vadd.f32 1.0, %v8695_v42  ;;  %v3834_v42 = vadd.f32 %v3833_v41, %v3809_v62 }
 0xc98   :  { %8696 = vrcp.f32 %v4251_v40  ;;  %v4263_v48 = vand.u32 2147483648, %v4251_v40  ;;  %vm4257_vm1 = vweird.f32 %v4251_v40  ;;  %v4261_v56 = vand.u32 2147483647, %v4251_v40 }
 0xc99   :  { %v3836_v43 = vadd.f32 %v3834_v42, %v10102_v50  ;;  %v3858_v42 = vrot.slane %v9904_v46, 6 }
 0xc9a   :  { %v4264_v59 = vor.u32 1.1754944e-38, %v4263_v48  ;;  %vm4262_vm3 = vcmp.eq.f32.partialorder %v4261_v56, 8.507059e+37 }
 0xc9b   :  { %8698 = vtanh.f32 %v3836_v43 }
 0xc9e   :  { %v8697_v6 = vpop.eup %8696 }
 0xc9f   :  { %v4253_v15 = vmul.f32 %v8697_v6, %v4251_v40  ;;  %vm4258_vm0 = vweird.f32 %v8697_v6  ;;  %v8604_v40 = vmul.f32 -1.442695, %v3836_v43 }
 0xca0   :  { %vm4259_vm2 = vmor %vm4257_vm1, %vm4258_vm0 }
 0xca1   :  { %v4254_v39 = vsub.f32 1.0, %v4253_v15  ;;  %v8699_v15 = vpop.eup %8698  ;;  %8700 = vpow2.f32 %v8604_v40 }
 0xca3   :  { %v4255_v45 = vmul.f32 %v8697_v6, %v4254_v39 }
 0xca5   :  { %v4256_v54 = vadd.f32 %v8697_v6, %v4255_v45 }
 0xca7   :  { %v4260_v58 = vsel %vm4259_vm2, %v8697_v6, %v4256_v54  ;;  %v8701_v41 = vpop.eup %8700 }
 0xca8   :  { %v4265_v8 = vsel %vm4262_vm3, %v4264_v59, %v4260_v58  ;;  %v3840_v6 = vadd.f32 1.0, %v8701_v41 }
 0xca9   :  { %v4268_v57 = vmul.f32 %v4265_v8, %v9897_v51 }
 0xcaa   :  { %8702 = vrcp.f32 %v3840_v6  ;;  %v3852_v33 = vand.u32 2147483648, %v3840_v6  ;;  %vm3846_vm5 = vweird.f32 %v3840_v6  ;;  %v3850_v3 = vand.u32 2147483647, %v3840_v6 }
 0xcac   :  { %v3853_v10 = vor.u32 1.1754944e-38, %v3852_v33  ;;  %vm3851_vm8 = vcmp.eq.f32.partialorder %v3850_v3, 8.507059e+37 }
 0xcb0   :  { %v8703_v24 = vpop.eup %8702 }
 0xcb1   :  { %v3842_v2 = vmul.f32 %v8703_v24, %v3840_v6  ;;  %vm3847_vm4 = vweird.f32 %v8703_v24 }
 0xcb2   :  { %vm3848_vm7 = vmor %vm3846_vm5, %vm3847_vm4 }
 0xcb3   :  { %v3843_v39 = vsub.f32 1.0, %v3842_v2 }
 0xcb5   :  { %v3844_v31 = vmul.f32 %v8703_v24, %v3843_v39 }
 0xcb7   :  { %v3845_v22 = vadd.f32 %v8703_v24, %v3844_v31 }
 0xcb9   :  { %v3849_v62 = vsel %vm3848_vm7, %v8703_v24, %v3845_v22 }
 0xcba   :  { %v3854_v51 = vsel %vm3851_vm8, %v3853_v10, %v3849_v62 }
 0xcbb   :  { %v3860_v58 = vmul.f32 %v3858_v42, %v3854_v51 }
 0xd06   :  { %v4271_v0 = vpop.permute.xlu1 %4270 }
 0xd07   :  { %v4273_v35 = vmul.f32 %v4271_v0, %v4265_v8 }
 0xd09   :  { %4275 = vrot.lane.b32.xlu2 %v4273_v35, %s8960_s19 }
 0xd11   :  { %3862 = vrot.lane.b32.xlu2 %v8699_v15, %s8960_s19 }
 0xd63   :  { %v4276_v28 = vpop.permute.xlu2 %4275 }
 0xd64   :  { %v10108_v7 = vadd.f32 %v4276_v28, %v4268_v57 }
 0xd66   :  { %8704 = vtanh.f32 %v10108_v7 }
 0xd6b   :  { %v3863_v54 = vpop.permute.xlu2 %3862 }
 0xd6c   :  { %v8705_v45 = vpop.eup %8704  ;;  %v3865_v1 = vmul.f32 %v3863_v54, %v3854_v51 }
 0xd6d   :  { %4281 = vrot.lane.b32.xlu0 %v8705_v45, %s8960_s19 }
 0xd75   :  { %3867 = vrot.lane.b32.xlu0 %v3865_v1, %s8960_s19 }
 0xddf   :  { %v4282_v48 = vpop.permute.xlu0 %4281 }
 0xde0   :  { %v4284_v56 = vmul.f32 %v4282_v48, %v4265_v8 }
 0xde2   :  { %4286 = vrot.lane.b32.xlu1 %v4284_v56, %s8961_s20 }
 0xde7   :  { %v3868_v34 = vpop.permute.xlu0 %3867 }
 0xde8   :  { %v10115_v59 = vadd.f32 %v3868_v34, %v3860_v58 }
 0xdea   :  { %8706 = vtanh.f32 %v10115_v59 }
 0xdf0   :  { %v8707_v43 = vpop.eup %8706 }
 0xdf1   :  { %3873 = vrot.lane.b32.xlu1 %v8707_v43, %s8960_s19 }
 0xe54   :  { %v4287_v0 = vpop.permute.xlu1 %4286 }
 0xe55   :  { %v4288_v35 = vsel %vm339_vm6, %v4287_v0, 0 }
 0xe56   :  { %v10120_v15 = vand.u32 4294901760, %v4288_v35 }
 0xe58   :  { %v10123_v8 = vsub.f32 %v4288_v35, %v10120_v15  ;;  %4356 = vmatmul.f32.vlgmr.msra.gmra.mxu3 %v10120_v15 }
 0xe59   :  { %4592 = vmatpush.msra.mxu3 %v11174_v47 }
 0xe5a   :  { %v10128_v46 = vand.u32 4294901760, %v10123_v8  ;;  %4386 = vmatmul.f32.vlgmr.msra.gmra.mxu0 %v10123_v8 }
 0xe5b   :  { %4594 = vmatpush.msra.mxu3 %v11177_v61  ;;  %4621 = vmatpush.msra.mxu0 %v11190_v49 }
 0xe5c   :  { %v4313_v40 = vsub.f32 %v10123_v8, %v10128_v46  ;;  %4413 = vmatmul.f32.vlgmr.msra.gmra.mxu1 %v10128_v46 }
 0xe5d   :  { %4596 = vmatpush.msra.mxu3 %v11180_v12  ;;  %4652 = vmatpush.msra.mxu1 %v11174_v47 }
 0xe5e   :  { %v10138_v41 = vand.u32 4294901760, %v4313_v40  ;;  %4625 = vmatpush.msra.mxu0 %v11191_v37 }
 0xe5f   :  { %4598 = vmatpush.msra.mxu3 %v11183_v19  ;;  %4654 = vmatpush.msra.mxu1 %v11177_v61 }
 0xe60   :  { %4315 = vmatmul.f32.vlgmr.msra.gmra.mxu2 %v10138_v41  ;;  %4471 = vmatmul.f32.vlgmr.msrb.gmra.mxu3 %v10120_v15 }
 0xe61   :  { %4563 = vmatpush.msra.mxu2 %v11192_v52  ;;  %4656 = vmatpush.msra.mxu1 %v11180_v12 }
 0xe62   :  { %4717 = vmatpush.msrb.mxu3 %v11193_v55  ;;  %4629 = vmatpush.msra.mxu0 %v11194_v13 }
 0xe63   :  { %v3874_v6 = vpop.permute.xlu1 %3873  ;;  %4566 = vmatpush.msra.mxu2 %v11237_v53  ;;  %4658 = vmatpush.msra.mxu1 %v11183_v19 }
 0xe64   :  { %v3876_v24 = vmul.f32 %v3874_v6, %v3854_v51  ;;  %4723 = vmatpush.msrb.mxu3 %v11238_v44  ;;  %4633 = vmatpush.msra.mxu0 %v11239_v63 }
 0xe65   :  { %4569 = vmatpush.msra.mxu2 %v11240_v4 }
 0xe66   :  { %4667 = vrot.lane.b32.xlu2 %v3876_v24, %s8961_s20  ;;  %4729 = vmatpush.msrb.mxu3 %v11241_v36 }
 0xe67   :  { %4572 = vmatpush.msra.mxu2 %v11242_v38 }
 0xe68   :  { %4446 = vmatmul.f32.vlgmr.msrb.gmra.mxu2 %v10120_v15  ;;  %4735 = vmatpush.msrb.mxu3 %v11243_v32 }
 0xe69   :  { %4684 = vmatpush.msrb.mxu2 %v9057_v5 }
 0xe6b   :  { %4686 = vmatpush.msrb.mxu2 %v9064_v11 }
 0xe6d   :  { %4688 = vmatpush.msrb.mxu2 %v9071_v16 }
 0xe6f   :  { %4690 = vmatpush.msrb.mxu2 %v9073_v17 }
 0xec0   :  { %v4668_v31 = vpop.permute.xlu2 %4667 }
 0xec1   :  { %v4669_v3 = vsel %vm339_vm6, %v4668_v31, 0  ;;  %v11296_v31 = vld [vmem:[#allocation38_spill] sm:$0xff] }
 0xec2   :  { %v10165_v51 = vand.u32 4294901760, %v4669_v3 }
 0xec4   :  { %v10168_v42 = vsub.f32 %v4669_v3, %v10165_v51  ;;  %v11300_v3 = vld [vmem:[#allocation37_spill] sm:$0xff] }
 0xec6   :  { %v10172_v34 = vand.u32 4294901760, %v10168_v42 }
 0xec8   :  { %v4694_v35 = vsub.f32 %v10168_v42, %v10172_v34 }
 0xeca   :  { %v4695_v24 = vand.u32 4294901760, %v4694_v35  ;;  %v11314_v35 = vld [vmem:[#allocation41_spill] sm:$0xff] }
 0xed7   :  { %v4387_v22 = vpop.f32.mrf.mxu0 }
 0xed9   :  { %v4414_v33 = vpop.f32.mrf.mxu1 }
 0xedb   :  { %v4357_v2 = vpop.f32.mrf.mxu3 }
 0xee3   :  { %v4316_v57 = vpop.f32.mrf.mxu2  ;;  %v4472_v1 = vpop.f32.mrf.mxu3 }
 0xee4   :  { %v4317_v28 = vadd.f32 %v9955_v26, %v4316_v57  ;;  %v11293_v57 = vld [vmem:[#allocation35_spill] sm:$0xff] }
 0xee6   :  { %v4358_v39 = vadd.f32 %v4357_v2, %v4317_v28  ;;  %v11292_v2 = vld [vmem:[#allocation31_spill] sm:$0xff] }
 0xee7   :  { %v11294_v28 = vld [vmem:[#allocation19_spill] sm:$0xff] }
 0xee8   :  { %v4388_v45 = vadd.f32 %v4387_v22, %v4358_v39  ;;  %v11295_v39 = vld [vmem:[#allocation42_spill] sm:$0xff]  ;;  %v11297_v22 = vld [vmem:[#allocation32_spill] sm:$0xff] }
 0xeea   :  { %v4415_v62 = vadd.f32 %v4414_v33, %v4388_v45  ;;  %v11298_v45 = vld [vmem:[#allocation40_spill] sm:$0xff]  ;;  %v11299_v33 = vld [vmem:[#allocation34_spill] sm:$0xff] }
 0xeeb   :  { %v4447_v54 = vpop.f32.mrf.mxu2 }
 0xeec   :  { %v4448_v10 = vadd.f32 %v4447_v54, %v4415_v62  ;;  %v11301_v62 = vld [vmem:[#allocation43_spill] sm:$0xff]  ;;  %v11302_v54 = vld [vmem:[#allocation54_spill] sm:$0xff] }
 0xeee   :  { %v4473_v48 = vadd.f32 %v4472_v1, %v4448_v10  ;;  %v11303_v10 = vld [vmem:[#allocation44_spill] sm:$0xff]  ;;  %v11304_v1 = vld [vmem:[#allocation46_spill] sm:$0xff] }
 0xef0   :  { %v4475_v56 = vmax.f32 %v4473_v48, 0.0  ;;  %v11305_v48 = vld [vmem:[#allocation56_spill] sm:$0xff] }
 0xef2   :  { %v4477_v26 = vsel %vm339_vm6, %v4475_v56, 0  ;;  %v11306_v56 = vld [vmem:[#allocation33_spill] sm:$0xff] }
 0xef3   :  { %v4499_v58 = vand.u32 4294901760, %v4477_v26 }
 0xef5   :  { %v4500_v43 = vsub.f32 %v4477_v26, %v4499_v58  ;;  %4545 = vmatmul.f32.vlgmr.msrb.gmra.mxu1 %v4499_v58  ;;  %v11307_v26 = vld [vmem:[#allocation49_spill] sm:$0xff] }
 0xef6   :  { %4784 = vmatpush.msrb.mxu1 %v9057_v5 }
 0xef7   :  { %v4501_v0 = vand.u32 4294901760, %v4500_v43  ;;  %4575 = vmatmul.f32.vlgmr.msra.gmra.mxu2 %v4500_v43 }
 0xef8   :  { %4786 = vmatpush.msrb.mxu1 %v9064_v11  ;;  %4813 = vmatpush.msra.mxu2 %v9080_v21 }
 0xef9   :  { %v4502_v40 = vsub.f32 %v4500_v43, %v4501_v0  ;;  %4602 = vmatmul.f32.vlgmr.msra.gmra.mxu3 %v4501_v0  ;;  %v11311_v43 = vld [vmem:[#allocation48_spill] sm:$0xff]  ;;  %v11312_v0 = vld [vmem:[#allocation39_spill] sm:$0xff] }
 0xefa   :  { %4788 = vmatpush.msrb.mxu1 %v9071_v16  ;;  %4817 = vmatpush.msra.mxu2 %v9090_v27 }
 0xefb   :  { %v4503_v6 = vand.u32 4294901760, %v4502_v40  ;;  %4844 = vmatpush.msra.mxu3 %v9057_v5  ;;  %v11315_v40 = vld [vmem:[#allocation53_spill] sm:$0xff] }
 0xefc   :  { %4790 = vmatpush.msrb.mxu1 %v9073_v17  ;;  %4821 = vmatpush.msra.mxu2 %v9095_v29 }
 0xefd   :  { %4504 = vmatmul.f32.vlgmr.msrb.gmra.mxu0 %v4503_v6  ;;  %4660 = vmatmul.f32.vlgmr.msra.gmra.mxu1 %v4499_v58  ;;  %v11316_v6 = vld [vmem:[#allocation45_spill] sm:$0xff] }
 0xefe   :  { %4846 = vmatpush.msra.mxu3 %v9064_v11  ;;  %4755 = vmatpush.msrb.mxu0 %v9067_v14 }
 0xeff   :  { %4696 = vmatmul.f32.vlgmr.msrb.gmra.mxu2 %v4695_v24  ;;  %4946 = vmatpush.msra.mxu1 %v9227_v9 }
 0xf00   :  { %4825 = vmatpush.msra.mxu2 %v9098_v30  ;;  %4848 = vmatpush.msra.mxu3 %v9071_v16 }
 0xf01   :  { %4737 = vmatmul.f32.vlgmr.msrb.gmra.mxu3 %v10165_v51  ;;  %4758 = vmatpush.msrb.mxu0 %v9077_v20 }
 0xf02   :  { %4850 = vmatpush.msra.mxu3 %v9073_v17  ;;  %4952 = vmatpush.msra.mxu1 %v9239_v18 }
 0xf03   :  { %4984 = vmatpush.msrb.mxu2 %v9205_v60  ;;  %4761 = vmatpush.msrb.mxu0 %v9084_v23 }
 0xf04   :  { %4958 = vmatpush.msra.mxu1 %v9247_v25  ;;  %5013 = vmatpush.msrb.mxu3 %v11292_v2 }
 0xf05   :  { %4635 = vmatmul.f32.vlgmr.msra.gmra.mxu0 %v4499_v58  ;;  %4794 = vmatmul.f32.vlgmr.msrb.gmra.mxu1 %v10172_v34  ;;  %v11310_v58 = vld [vmem:[#allocation58_spill] sm:$0xff] }
 0xf06   :  { %4987 = vmatpush.msrb.mxu2 %v11293_v57  ;;  %4764 = vmatpush.msrb.mxu0 %v11294_v28 }
 0xf07   :  { %4827 = vmatmul.f32.vlgmr.msra.gmra.mxu2 %v10165_v51  ;;  %4964 = vmatpush.msra.mxu1 %v11295_v39 }
 0xf08   :  { %4990 = vmatpush.msrb.mxu2 %v11296_v31  ;;  %5015 = vmatpush.msrb.mxu3 %v11297_v22 }
 0xf09   :  { %4852 = vmatmul.f32.vlgmr.msra.gmra.mxu3 %v10165_v51  ;;  %4913 = vmatpush.msra.mxu0 %v11292_v2 }
 0xf0a   :  { %4993 = vmatpush.msrb.mxu2 %v11298_v45  ;;  %5017 = vmatpush.msrb.mxu3 %v11299_v33 }
 0xf0b   :  { %5073 = vmatpush.msrb.mxu1 %v11292_v2  ;;  %4915 = vmatpush.msra.mxu0 %v11297_v22 }
 0xf0c   :  { %5019 = vmatpush.msrb.mxu3 %v11300_v3  ;;  %5098 = vmatpush.msra.mxu2 %v11301_v62 }
 0xf0d   :  { %4767 = vmatmul.f32.vlgmr.msrb.gmra.mxu0 %v10168_v42  ;;  %4966 = vmatmul.f32.vlgmr.msra.gmra.mxu1 %v10120_v15 }
 0xf0e   :  { %5075 = vmatpush.msrb.mxu1 %v11297_v22  ;;  %4917 = vmatpush.msra.mxu0 %v11299_v33 }
 0xf0f   :  { %4996 = vmatmul.f32.vlgmr.msrb.gmra.mxu2 %v10123_v8  ;;  %5131 = vmatpush.msra.mxu3 %v11302_v54  ;;  %v11308_v8 = vld [vmem:[#allocation57_spill] sm:$0xff] }
 0xf10   :  { %5077 = vmatpush.msrb.mxu1 %v11299_v33  ;;  %5100 = vmatpush.msra.mxu2 %v11303_v10 }
 0xf11   :  { %5023 = vmatmul.f32.vlgmr.msrb.gmra.mxu3 %v10128_v46  ;;  %4919 = vmatpush.msra.mxu0 %v11300_v3  ;;  %v11309_v46 = vld [vmem:[#allocation36_spill] sm:$0xff] }
 0xf12   :  { %5079 = vmatpush.msrb.mxu1 %v11300_v3  ;;  %5102 = vmatpush.msra.mxu2 %v11304_v1 }
 0xf13   :  { %5137 = vmatpush.msra.mxu3 %v11305_v48  ;;  %5042 = vmatpush.msrb.mxu0 %v11306_v56 }
 0xf14   :  { %5104 = vmatpush.msra.mxu2 %v11307_v26  ;;  %5198 = vmatpush.msra.mxu1 %v11301_v62 }
 0xf15   :  { %4925 = vmatmul.f32.vlgmr.msra.gmra.mxu0 %v10138_v41  ;;  %5081 = vmatmul.f32.vlgmr.msrb.gmra.mxu1 %v10120_v15  ;;  %v11313_v41 = vld [vmem:[#allocation51_spill] sm:$0xff] }
 0xf16   :  { %5143 = vmatpush.msra.mxu3 %v11308_v8  ;;  %5046 = vmatpush.msrb.mxu0 %v11309_v46 }
 0xf17   :  { %5110 = vmatmul.f32.vlgmr.msra.gmra.mxu2 %v4695_v24  ;;  %5200 = vmatpush.msra.mxu1 %v11303_v10  ;;  %v11317_v24 = vld [vmem:[#allocation55_spill] sm:$0xff] }
 0xf18   :  { %5149 = vmatpush.msra.mxu3 %v11310_v58  ;;  %5227 = vmatpush.msrb.mxu2 %v11311_v43  ;;  %v11327_v43 = vld [vmem:[#allocation62_spill] sm:$0xff] }
 0xf19   :  { %5050 = vmatpush.msrb.mxu0 %v11312_v0  ;;  %5151 = vmatmul.f32.vlgmr.msra.gmra.mxu3 %v10165_v51  ;;  %v11326_v0 = vld [vmem:[#allocation64_spill] sm:$0xff] }
 0xf1a   :  { %5202 = vmatpush.msra.mxu1 %v11304_v1  ;;  %5231 = vmatpush.msrb.mxu2 %v11313_v41  ;;  %v11318_v41 = vld [vmem:[#allocation47_spill] sm:$0xff] }
 0xf1b   :  { %5258 = vmatpush.msrb.mxu3 %v11301_v62  ;;  %5054 = vmatpush.msrb.mxu0 %v11314_v35  ;;  %v11319_v35 = vld [vmem:[#allocation67_spill] sm:$0xff] }
 0xf1c   :  { %5204 = vmatpush.msra.mxu1 %v11307_v26  ;;  %5235 = vmatpush.msrb.mxu2 %v11315_v40  ;;  %v11320_v40 = vld [vmem:[#allocation50_spill] sm:$0xff] }
 0xf1d   :  { %5260 = vmatpush.msrb.mxu3 %v11303_v10  ;;  %5056 = vmatmul.f32.vlgmr.msrb.gmra.mxu0 %v10120_v15  ;;  %v11321_v15 = vld [vmem:[#allocation68_spill] sm:$0xff] }
 0xf1e   :  { %5169 = vmatpush.msra.mxu0 %v11316_v6  ;;  %5208 = vmatmul.f32.vlgmr.msra.gmra.mxu1 %v10172_v34  ;;  %v11322_v6 = vld [vmem:[#allocation63_spill] sm:$0xff]  ;;  %v11323_v34 = vld [vmem:[#allocation52_spill] sm:$0xff] }
 0xf1f   :  { %5239 = vmatpush.msrb.mxu2 %v11317_v24  ;;  %5262 = vmatpush.msrb.mxu3 %v11304_v1  ;;  %v11324_v24 = vld [vmem:[#allocation61_spill] sm:$0xff] }
 0xf20   :  { %5172 = vmatpush.msra.mxu0 %v11318_v41  ;;  %5241 = vmatmul.f32.vlgmr.msrb.gmra.mxu2 %v10165_v51  ;;  %v11325_v41 = vld [vmem:[#allocation76_spill] sm:$0xff] }
 0xf21   :  { %5264 = vmatpush.msrb.mxu3 %v11307_v26  ;;  %5359 = vmatpush.msrb.mxu1 %v11319_v35  ;;  %v11328_v35 = vld [vmem:[#allocation77_spill] sm:$0xff] }
 0xf22   :  { %5175 = vmatpush.msra.mxu0 %v11320_v40  ;;  %5266 = vmatmul.f32.vlgmr.msrb.gmra.mxu3 %v10165_v51  ;;  %v11329_v51 = vld [vmem:[#allocation71_spill] sm:$0xff] }
 0xf23   :  { %5365 = vmatpush.msrb.mxu1 %v11321_v15  ;;  %5397 = vmatpush.msra.mxu2 %v11322_v6  ;;  %v11330_v15 = vld [vmem:[#allocation70_spill] sm:$0xff] }
 0xf24   :  { %5178 = vmatpush.msra.mxu0 %v11323_v34  ;;  %5426 = vmatpush.msra.mxu3 %v11324_v24  ;;  %v11331_v34 = vld [vmem:[#allocation74_spill] sm:$0xff] }
 0xf25   :  { %5181 = vmatmul.f32.vlgmr.msra.gmra.mxu0 %v10168_v42  ;;  %5371 = vmatpush.msrb.mxu1 %v11325_v41  ;;  %v11332_v42 = vld [vmem:[#allocation72_spill] sm:$0xff]  ;;  %v11339_v41 = vld [vmem:[#allocation93_spill] sm:$0xff] }
 0xf26   :  { %5400 = vmatpush.msra.mxu2 %v11326_v0  ;;  %5428 = vmatpush.msra.mxu3 %v11327_v43  ;;  %v11333_v0 = vld [vmem:[#allocation87_spill] sm:$0xff] }
 0xf27   :  { %5377 = vmatpush.msrb.mxu1 %v11328_v35  ;;  %5326 = vmatpush.msrb.mxu0 %v11324_v24  ;;  %v11335_v35 = vld [vmem:[#allocation90_spill] sm:$0xff] }
 0xf28   :  { %5403 = vmatpush.msra.mxu2 %v11329_v51  ;;  %5430 = vmatpush.msra.mxu3 %v11330_v15  ;;  %v11334_v51 = vld [vmem:[#allocation65_spill] sm:$0xff] }
 0xf29   :  { %5486 = vmatpush.msra.mxu1 %v11324_v24  ;;  %5328 = vmatpush.msrb.mxu0 %v11327_v43 }
 0xf2a   :  { %5406 = vmatpush.msra.mxu2 %v11331_v34  ;;  %5432 = vmatpush.msra.mxu3 %v11332_v42  ;;  %v11336_v34 = vld [vmem:[#allocation66_spill] sm:$0xff] }
 0xf2b   :  { %5488 = vmatpush.msra.mxu1 %v11327_v43  ;;  %5330 = vmatpush.msrb.mxu0 %v11330_v15  ;;  %v11337_v43 = vld [vmem:[#allocation92_spill] sm:$0xff] }
 0xf2c   :  { %5548 = vmatpush.msrb.mxu3 %v11333_v0  ;;  %5515 = vmatpush.msrb.mxu2 %v11174_v47  ;;  %v11338_v0 = vld [vmem:[#allocation73_spill] sm:$0xff] }
 0xf2d   :  { %5490 = vmatpush.msra.mxu1 %v11330_v15  ;;  %5332 = vmatpush.msrb.mxu0 %v11332_v42  ;;  %v11340_v15 = vld [vmem:[#allocation75_spill] sm:$0xff] }
 0xf2e   :  { %5554 = vmatpush.msrb.mxu3 %v11335_v35  ;;  %5517 = vmatpush.msrb.mxu2 %v11177_v61 }
 0xf2f   :  { %5455 = vmatpush.msra.mxu0 %v11334_v51  ;;  %5492 = vmatpush.msra.mxu1 %v11332_v42  ;;  %v11341_v42 = vld [vmem:[#allocation80_spill] sm:$0xff] }
 0xf30   :  { %5560 = vmatpush.msrb.mxu3 %v11337_v43  ;;  %5519 = vmatpush.msrb.mxu2 %v11180_v12 }
 0xf31   :  { %5459 = vmatpush.msra.mxu0 %v11336_v34 }
 0xf32   :  { %5566 = vmatpush.msrb.mxu3 %v11339_v41  ;;  %5521 = vmatpush.msrb.mxu2 %v11183_v19 }
 0xf33   :  { %5463 = vmatpush.msra.mxu0 %v11338_v0 }
 0xf35   :  { %5467 = vmatpush.msra.mxu0 %v11340_v15 }
 0xf72   :  { %v4546_v51 = vpop.f32.mrf.mxu1 }
 0xf7a   :  { %v4505_v35 = vpop.f32.mrf.mxu0  ;;  %v4576_v24 = vpop.f32.mrf.mxu2 }
 0xf7b   :  { %v4506_v6 = vadd.f32 %v11341_v42, %v4505_v35  ;;  %v4661_v40 = vpop.f32.mrf.mxu1 }
 0xf7c   :  { %v4603_v58 = vpop.f32.mrf.mxu3 }
 0xf7d   :  { %v4547_v34 = vadd.f32 %v4546_v51, %v4506_v6 }
 0xf7f   :  { %v4577_v46 = vadd.f32 %v4576_v24, %v4547_v34 }
 0xf81   :  { %v4604_v43 = vadd.f32 %v4603_v58, %v4577_v46 }
 0xf82   :  { %v4636_v8 = vpop.f32.mrf.mxu0  ;;  %v4697_v26 = vpop.f32.mrf.mxu2 }
 0xf83   :  { %v4637_v56 = vadd.f32 %v4636_v8, %v4604_v43  ;;  %v4795_v41 = vpop.f32.mrf.mxu1 }
 0xf84   :  { %v4738_v0 = vpop.f32.mrf.mxu3 }
 0xf85   :  { %v4662_v48 = vadd.f32 %v4661_v40, %v4637_v56 }
 0xf87   :  { %8606 = vst [vmem:[%s10900_s11 + $0x6] sm:$0x3] %v4662_v48 }
 0xf8a   :  { %v4768_v15 = vpop.f32.mrf.mxu0  ;;  %v4828_v1 = vpop.f32.mrf.mxu2 }
 0xf8b   :  { %v4967_v54 = vpop.f32.mrf.mxu1 }
 0xf8c   :  { %v4853_v10 = vpop.f32.mrf.mxu3 }
 0xf92   :  { %v4926_v35 = vpop.f32.mrf.mxu0  ;;  %v4997_v42 = vpop.f32.mrf.mxu2 }
 0xf93   :  { %v4968_v62 = vadd.f32 %v4967_v54, %v4926_v35  ;;  %v5082_v58 = vpop.f32.mrf.mxu1 }
 0xf94   :  { %v5024_v6 = vpop.f32.mrf.mxu3 }
 0xf95   :  { %v4998_v24 = vadd.f32 %v4997_v42, %v4968_v62  ;;  %v10295_v62 = vld [vmem:[%s10895_s6] ss:$0 sm:$0xff] }
 0xf97   :  { %v5025_v46 = vadd.f32 %v5024_v6, %v4998_v24 }
 0xf9a   :  { %v5057_v34 = vpop.f32.mrf.mxu0  ;;  %v5111_v43 = vpop.f32.mrf.mxu2 }
 0xf9b   :  { %v5058_v8 = vadd.f32 %v5057_v34, %v5025_v46  ;;  %v5209_v45 = vpop.f32.mrf.mxu1 }
 0xf9c   :  { %v5152_v40 = vpop.f32.mrf.mxu3 }
 0xf9d   :  { %v5083_v56 = vadd.f32 %v5082_v58, %v5058_v8 }
 0xf9f   :  { %v5112_v51 = vadd.f32 %v5111_v43, %v5083_v56 }
 0xfa1   :  { %v5153_v3 = vadd.f32 %v5152_v40, %v5112_v51 }
 0xfa2   :  { %v5182_v33 = vpop.f32.mrf.mxu0 }
 0xfa3   :  { %v5183_v48 = vadd.f32 %v5182_v33, %v5153_v3  ;;  %v5242_v31 = vpop.f32.mrf.mxu2 }
 0xfa5   :  { %v5210_v22 = vadd.f32 %v5209_v45, %v5183_v48  ;;  %v5267_v28 = vpop.f32.mrf.mxu3 }
 0xfa7   :  { %v5243_v39 = vadd.f32 %v5242_v31, %v5210_v22  ;;  %v4739_v31 = vadd.f32 %v4738_v0, %v4697_v26 }
 0xfa9   :  { %v5268_v57 = vadd.f32 %v5267_v28, %v5243_v39  ;;  %v4769_v22 = vadd.f32 %v4768_v15, %v4739_v31 }
 0xfab   :  { %v5270_v54 = vadd.f32 %v10295_v62, %v5268_v57  ;;  %v4796_v39 = vadd.f32 %v4795_v41, %v4769_v22 }
 0xfad   :  { %8708 = vtanh.f32 %v5270_v54  ;;  %v8608_v42 = vmul.f32 -1.442695, %v5270_v54  ;;  %v4829_v24 = vadd.f32 %v4828_v1, %v4796_v39 }
 0xfaf   :  { %8710 = vpow2.f32 %v8608_v42  ;;  %v4854_v58 = vadd.f32 %v4853_v10, %v4829_v24 }
 0xfb1   :  { %v4857_v43 = vrot.slane %v4854_v58, 6 }
 0xfb3   :  { %v8709_v35 = vpop.eup %8708  ;;  %v4859_v51 = vadd.f32 %v4857_v43, %v10102_v50  ;;  %v4881_v43 = vrot.slane %v10115_v59, 6 }
 0xfb4   :  { %5293 = vrot.lane.b32.xlu0 %v8709_v35, %s8960_s19 }
 0xfb5   :  { %v8711_v33 = vpop.eup %8710  ;;  %v8607_v10 = vmul.f32 -1.442695, %v4859_v51 }
 0xfb6   :  { %v5274_v3 = vadd.f32 1.0, %v8711_v33 }
 0xfb8   :  { %8712 = vrcp.f32 %v5274_v3  ;;  %v5286_v57 = vand.u32 2147483648, %v5274_v3  ;;  %vm5280_vm10 = vweird.f32 %v5274_v3  ;;  %v5284_v8 = vand.u32 2147483647, %v5274_v3 }
 0xfb9   :  { %8714 = vtanh.f32 %v4859_v51 }
 0xfba   :  { %v5287_v40 = vor.u32 1.1754944e-38, %v5286_v57  ;;  %vm5285_vm12 = vcmp.eq.f32.partialorder %v5284_v8, 8.507059e+37  ;;  %8716 = vpow2.f32 %v8607_v10 }
 0xfbe   :  { %v8713_v45 = vpop.eup %8712 }
 0xfbf   :  { %v5276_v28 = vmul.f32 %v8713_v45, %v5274_v3  ;;  %vm5281_vm9 = vweird.f32 %v8713_v45  ;;  %v8715_v1 = vpop.eup %8714 }
 0xfc0   :  { %vm5282_vm11 = vmor %vm5280_vm10, %vm5281_vm9  ;;  %v8717_v41 = vpop.eup %8716 }
 0xfc1   :  { %v5277_v6 = vsub.f32 1.0, %v5276_v28  ;;  %v4863_v48 = vadd.f32 1.0, %v8717_v41 }
 0xfc3   :  { %v5278_v46 = vmul.f32 %v8713_v45, %v5277_v6  ;;  %8718 = vrcp.f32 %v4863_v48  ;;  %v4875_v39 = vand.u32 2147483648, %v4863_v48  ;;  %vm4869_vm14 = vweird.f32 %v4863_v48 }
 0xfc4   :  { %v4873_v6 = vand.u32 2147483647, %v4863_v48 }
 0xfc5   :  { %v5279_v34 = vadd.f32 %v8713_v45, %v5278_v46  ;;  %v4876_v58 = vor.u32 1.1754944e-38, %v4875_v39 }
 0xfc6   :  { %vm4874_vm0 = vcmp.eq.f32.partialorder %v4873_v6, 8.507059e+37 }
 0xfc7   :  { %v5283_v56 = vsel %vm5282_vm11, %v8713_v45, %v5279_v34 }
 0xfc8   :  { %v5288_v0 = vsel %vm5285_vm12, %v5287_v40, %v5283_v56 }
 0xfc9   :  { %v8719_v54 = vpop.eup %8718  ;;  %v5291_v42 = vmul.f32 %v5288_v0, %v10108_v7 }
 0xfca   :  { %v4865_v35 = vmul.f32 %v8719_v54, %v4863_v48  ;;  %vm4870_vm13 = vweird.f32 %v8719_v54 }
 0xfcb   :  { %vm4871_vm15 = vmor %vm4869_vm14, %vm4870_vm13 }
 0xfcc   :  { %v4866_v3 = vsub.f32 1.0, %v4865_v35 }
 0xfce   :  { %v4867_v31 = vmul.f32 %v8719_v54, %v4866_v3 }
 0xfd0   :  { %v4868_v22 = vadd.f32 %v8719_v54, %v4867_v31  ;;  %v10361_v31 = vld [vmem:[%s10897_s8] ss:$0 sm:$0xff] }
 0xfd2   :  { %v4872_v24 = vsel %vm4871_vm15, %v8719_v54, %v4868_v22 }
 0xfd3   :  { %v4877_v7 = vsel %vm4874_vm0, %v4876_v58, %v4872_v24 }
 0xfd4   :  { %v4883_v56 = vmul.f32 %v4881_v43, %v4877_v7 }
0x1026   :  { %v5294_v26 = vpop.permute.xlu0 %5293 }
0x1027   :  { %v5296_v15 = vmul.f32 %v5294_v26, %v5288_v0 }
0x1029   :  { %5298 = vrot.lane.b32.xlu1 %v5296_v15, %s8960_s19 }
0x1031   :  { %4885 = vrot.lane.b32.xlu1 %v8715_v1, %s8960_s19 }
0x109b   :  { %v5299_v33 = vpop.permute.xlu1 %5298 }
0x109c   :  { %v10303_v45 = vadd.f32 %v5299_v33, %v5291_v42 }
0x109e   :  { %8720 = vtanh.f32 %v10303_v45 }
0x10a3   :  { %v4886_v46 = vpop.permute.xlu1 %4885 }
0x10a4   :  { %v8721_v28 = vpop.eup %8720  ;;  %v4888_v34 = vmul.f32 %v4886_v46, %v4877_v7 }
0x10a5   :  { %5304 = vrot.lane.b32.xlu2 %v8721_v28, %s8960_s19 }
0x10ad   :  { %4890 = vrot.lane.b32.xlu2 %v4888_v34, %s8960_s19 }
0x10ff   :  { %v5305_v57 = vpop.permute.xlu2 %5304 }
0x1100   :  { %v5307_v8 = vmul.f32 %v5305_v57, %v5288_v0 }
0x1102   :  { %5309 = vrot.lane.b32.xlu0 %v5307_v8, %s8961_s20 }
0x1107   :  { %v4891_v40 = vpop.permute.xlu2 %4890 }
0x1108   :  { %v10310_v51 = vadd.f32 %v4891_v40, %v4883_v56 }
0x110a   :  { %8722 = vtanh.f32 %v10310_v51 }
0x1110   :  { %v8723_v26 = vpop.eup %8722 }
0x1111   :  { %4896 = vrot.lane.b32.xlu0 %v8723_v26, %s8960_s19 }
0x1174   :  { %v5310_v15 = vpop.permute.xlu0 %5309 }
0x1175   :  { %v5311_v1 = vsel %vm339_vm6, %v5310_v15, 0 }
0x1176   :  { %v10315_v10 = vand.u32 4294901760, %v5311_v1 }
0x1178   :  { %v10318_v0 = vsub.f32 %v5311_v1, %v10315_v10  ;;  %5379 = vmatmul.f32.vlgmr.msrb.gmra.mxu1 %v10315_v10 }
0x1179   :  { %5615 = vmatpush.msrb.mxu1 %v11174_v47 }
0x117a   :  { %v10323_v59 = vand.u32 4294901760, %v10318_v0  ;;  %5409 = vmatmul.f32.vlgmr.msra.gmra.mxu2 %v10318_v0 }
0x117b   :  { %5617 = vmatpush.msrb.mxu1 %v11177_v61  ;;  %5644 = vmatpush.msra.mxu2 %v11190_v49 }
0x117c   :  { %v5336_v41 = vsub.f32 %v10318_v0, %v10323_v59  ;;  %5436 = vmatmul.f32.vlgmr.msra.gmra.mxu3 %v10323_v59 }
0x117d   :  { %5619 = vmatpush.msrb.mxu1 %v11180_v12  ;;  %5675 = vmatpush.msra.mxu3 %v11174_v47 }
0x117e   :  { %v10333_v48 = vand.u32 4294901760, %v5336_v41  ;;  %5648 = vmatpush.msra.mxu2 %v11191_v37 }
0x117f   :  { %5621 = vmatpush.msrb.mxu1 %v11183_v19  ;;  %5677 = vmatpush.msra.mxu3 %v11177_v61 }
0x1180   :  { %5338 = vmatmul.f32.vlgmr.msrb.gmra.mxu0 %v10333_v48  ;;  %5494 = vmatmul.f32.vlgmr.msra.gmra.mxu1 %v10315_v10 }
0x1181   :  { %5586 = vmatpush.msrb.mxu0 %v11192_v52  ;;  %5679 = vmatpush.msra.mxu3 %v11180_v12 }
0x1182   :  { %5741 = vmatpush.msra.mxu1 %v11193_v55  ;;  %5652 = vmatpush.msra.mxu2 %v11194_v13 }
0x1183   :  { %v4897_v54 = vpop.permute.xlu0 %4896  ;;  %5589 = vmatpush.msrb.mxu0 %v11237_v53  ;;  %5681 = vmatpush.msra.mxu3 %v11183_v19 }
0x1184   :  { %v4899_v35 = vmul.f32 %v4897_v54, %v4877_v7  ;;  %5747 = vmatpush.msra.mxu1 %v11238_v44  ;;  %5656 = vmatpush.msra.mxu2 %v11239_v63 }
0x1185   :  { %5592 = vmatpush.msrb.mxu0 %v11240_v4 }
0x1186   :  { %v5690_v42 = vrot.slane %v4899_v35, 2  ;;  %5753 = vmatpush.msra.mxu1 %v11241_v36 }
0x1187   :  { %5595 = vmatpush.msrb.mxu0 %v11242_v38 }
0x1188   :  { %5469 = vmatmul.f32.vlgmr.msra.gmra.mxu0 %v10315_v10  ;;  %5691 = vrot.lane.b32.xlu1 %v5690_v42, %s8961_s20 }
0x1189   :  { %5708 = vmatpush.msra.mxu0 %v9057_v5  ;;  %5759 = vmatpush.msra.mxu1 %v11243_v32 }
0x118b   :  { %5710 = vmatpush.msra.mxu0 %v9064_v11 }
0x118d   :  { %5712 = vmatpush.msra.mxu0 %v9071_v16 }
0x118f   :  { %5714 = vmatpush.msra.mxu0 %v9073_v17 }
0x11f5   :  { %v5380_v33 = vpop.f32.mrf.mxu1 }
0x11fa   :  { %v5692_v39 = vpop.permute.xlu1 %5691 }
0x11fb   :  { %v5693_v58 = vsel %vm339_vm6, %v5692_v39, 0  ;;  %v11343_v39 = vld [vmem:[#allocation19_spill] sm:$0xff] }
0x11fc   :  { %v10365_v8 = vand.u32 4294901760, %v5693_v58 }
0x11fd   :  { %v5339_v3 = vpop.f32.mrf.mxu0  ;;  %v5410_v6 = vpop.f32.mrf.mxu2 }
0x11fe   :  { %v5340_v22 = vadd.f32 %v10361_v31, %v5339_v3  ;;  %v5495_v43 = vpop.f32.mrf.mxu1  ;;  %v10368_v26 = vsub.f32 %v5693_v58, %v10365_v8  ;;  %v11347_v58 = vld [vmem:[#allocation40_spill] sm:$0xff] }
0x11ff   :  { %v5437_v46 = vpop.f32.mrf.mxu3 }
0x1200   :  { %v5381_v28 = vadd.f32 %v5380_v33, %v5340_v22  ;;  %v10372_v41 = vand.u32 4294901760, %v10368_v26 }
0x1202   :  { %v5411_v24 = vadd.f32 %v5410_v6, %v5381_v28  ;;  %v5718_v42 = vsub.f32 %v10368_v26, %v10372_v41  ;;  %v11342_v28 = vld [vmem:[#allocation35_spill] sm:$0xff]  ;;  %v11344_v6 = vld [vmem:[#allocation42_spill] sm:$0xff] }
0x1204   :  { %v5438_v7 = vadd.f32 %v5437_v46, %v5411_v24  ;;  %v5719_v22 = vand.u32 4294901760, %v5718_v42  ;;  %v11345_v24 = vld [vmem:[#allocation38_spill] sm:$0xff]  ;;  %v11346_v46 = vld [vmem:[#allocation32_spill] sm:$0xff] }
0x1205   :  { %v5470_v34 = vpop.f32.mrf.mxu0  ;;  %v11360_v42 = vld [vmem:[#allocation48_spill] sm:$0xff] }
0x1206   :  { %v5471_v57 = vadd.f32 %v5470_v34, %v5438_v7  ;;  %v11348_v7 = vld [vmem:[#allocation34_spill] sm:$0xff]  ;;  %v11349_v34 = vld [vmem:[#allocation37_spill] sm:$0xff] }
0x1208   :  { %v5496_v56 = vadd.f32 %v5495_v43, %v5471_v57  ;;  %v11350_v57 = vld [vmem:[#allocation43_spill] sm:$0xff]  ;;  %v11351_v43 = vld [vmem:[#allocation54_spill] sm:$0xff] }
0x120a   :  { %v5498_v40 = vmax.f32 %v5496_v56, 0.0  ;;  %v11352_v56 = vld [vmem:[#allocation44_spill] sm:$0xff] }
0x120c   :  { %v5500_v15 = vsel %vm339_vm6, %v5498_v40, 0  ;;  %v11353_v40 = vld [vmem:[#allocation46_spill] sm:$0xff] }
0x120d   :  { %v5522_v1 = vand.u32 4294901760, %v5500_v15 }
0x120f   :  { %v5523_v54 = vsub.f32 %v5500_v15, %v5522_v1  ;;  %5568 = vmatmul.f32.vlgmr.msrb.gmra.mxu3 %v5522_v1  ;;  %v11354_v15 = vld [vmem:[#allocation56_spill] sm:$0xff] }
0x1210   :  { %5808 = vmatpush.msrb.mxu3 %v9057_v5 }
0x1211   :  { %v5524_v35 = vand.u32 4294901760, %v5523_v54  ;;  %5598 = vmatmul.f32.vlgmr.msrb.gmra.mxu0 %v5523_v54 }
0x1212   :  { %5810 = vmatpush.msrb.mxu3 %v9064_v11  ;;  %5837 = vmatpush.msrb.mxu0 %v9080_v21 }
0x1213   :  { %v5525_v33 = vsub.f32 %v5523_v54, %v5524_v35  ;;  %5625 = vmatmul.f32.vlgmr.msrb.gmra.mxu1 %v5524_v35  ;;  %v11356_v54 = vld [vmem:[#allocation49_spill] sm:$0xff]  ;;  %v11359_v35 = vld [vmem:[#allocation58_spill] sm:$0xff] }
0x1214   :  { %5812 = vmatpush.msrb.mxu3 %v9071_v16  ;;  %5841 = vmatpush.msrb.mxu0 %v9090_v27 }
0x1215   :  { %v5526_v3 = vand.u32 4294901760, %v5525_v33  ;;  %5868 = vmatpush.msrb.mxu1 %v9057_v5  ;;  %v11361_v33 = vld [vmem:[#allocation39_spill] sm:$0xff] }
0x1216   :  { %5814 = vmatpush.msrb.mxu3 %v9073_v17  ;;  %5845 = vmatpush.msrb.mxu0 %v9095_v29 }
0x1217   :  { %5527 = vmatmul.f32.vlgmr.msrb.gmra.mxu2 %v5526_v3  ;;  %5683 = vmatmul.f32.vlgmr.msra.gmra.mxu3 %v5522_v1  ;;  %v11363_v3 = vld [vmem:[#allocation41_spill] sm:$0xff] }
0x1218   :  { %5870 = vmatpush.msrb.mxu1 %v9064_v11  ;;  %5779 = vmatpush.msrb.mxu2 %v9067_v14 }
0x1219   :  { %5720 = vmatmul.f32.vlgmr.msra.gmra.mxu0 %v5719_v22  ;;  %5970 = vmatpush.msra.mxu3 %v9227_v9 }
0x121a   :  { %5849 = vmatpush.msrb.mxu0 %v9098_v30  ;;  %5872 = vmatpush.msrb.mxu1 %v9071_v16 }
0x121b   :  { %5761 = vmatmul.f32.vlgmr.msra.gmra.mxu1 %v10365_v8  ;;  %5782 = vmatpush.msrb.mxu2 %v9077_v20 }
0x121c   :  { %5874 = vmatpush.msrb.mxu1 %v9073_v17  ;;  %5976 = vmatpush.msra.mxu3 %v9239_v18 }
0x121d   :  { %6008 = vmatpush.msra.mxu0 %v9205_v60  ;;  %5785 = vmatpush.msrb.mxu2 %v9084_v23 }
0x121e   :  { %5982 = vmatpush.msra.mxu3 %v9247_v25  ;;  %6037 = vmatpush.msra.mxu1 %v11292_v2 }
0x121f   :  { %5658 = vmatmul.f32.vlgmr.msra.gmra.mxu2 %v5522_v1  ;;  %5818 = vmatmul.f32.vlgmr.msrb.gmra.mxu3 %v10372_v41  ;;  %v11355_v1 = vld [vmem:[#allocation33_spill] sm:$0xff] }
0x1220   :  { %6011 = vmatpush.msra.mxu0 %v11342_v28  ;;  %5788 = vmatpush.msrb.mxu2 %v11343_v39 }
0x1221   :  { %5851 = vmatmul.f32.vlgmr.msrb.gmra.mxu0 %v10365_v8  ;;  %5988 = vmatpush.msra.mxu3 %v11344_v6 }
0x1222   :  { %6014 = vmatpush.msra.mxu0 %v11345_v24  ;;  %6039 = vmatpush.msra.mxu1 %v11346_v46 }
0x1223   :  { %5876 = vmatmul.f32.vlgmr.msrb.gmra.mxu1 %v10365_v8  ;;  %5937 = vmatpush.msra.mxu2 %v11292_v2 }
0x1224   :  { %6017 = vmatpush.msra.mxu0 %v11347_v58  ;;  %6041 = vmatpush.msra.mxu1 %v11348_v7 }
0x1225   :  { %6097 = vmatpush.msrb.mxu3 %v11292_v2  ;;  %5939 = vmatpush.msra.mxu2 %v11346_v46 }
0x1226   :  { %6043 = vmatpush.msra.mxu1 %v11349_v34  ;;  %6122 = vmatpush.msrb.mxu0 %v11350_v57 }
0x1227   :  { %5791 = vmatmul.f32.vlgmr.msrb.gmra.mxu2 %v10368_v26  ;;  %5990 = vmatmul.f32.vlgmr.msra.gmra.mxu3 %v10315_v10 }
0x1228   :  { %6099 = vmatpush.msrb.mxu3 %v11346_v46  ;;  %5941 = vmatpush.msra.mxu2 %v11348_v7 }
0x1229   :  { %6020 = vmatmul.f32.vlgmr.msra.gmra.mxu0 %v10318_v0  ;;  %6155 = vmatpush.msrb.mxu1 %v11351_v43  ;;  %v11357_v0 = vld [vmem:[#allocation57_spill] sm:$0xff] }
0x122a   :  { %6101 = vmatpush.msrb.mxu3 %v11348_v7  ;;  %6124 = vmatpush.msrb.mxu0 %v11352_v56 }
0x122b   :  { %6047 = vmatmul.f32.vlgmr.msra.gmra.mxu1 %v10323_v59  ;;  %5943 = vmatpush.msra.mxu2 %v11349_v34  ;;  %v11358_v59 = vld [vmem:[#allocation36_spill] sm:$0xff] }
0x122c   :  { %6103 = vmatpush.msrb.mxu3 %v11349_v34  ;;  %6126 = vmatpush.msrb.mxu0 %v11353_v40 }
0x122d   :  { %6161 = vmatpush.msrb.mxu1 %v11354_v15  ;;  %6066 = vmatpush.msrb.mxu2 %v11355_v1 }
0x122e   :  { %6128 = vmatpush.msrb.mxu0 %v11356_v54  ;;  %6222 = vmatpush.msra.mxu3 %v11350_v57 }
0x122f   :  { %5949 = vmatmul.f32.vlgmr.msra.gmra.mxu2 %v10333_v48  ;;  %6105 = vmatmul.f32.vlgmr.msrb.gmra.mxu3 %v10315_v10  ;;  %v11362_v48 = vld [vmem:[#allocation51_spill] sm:$0xff] }
0x1230   :  { %6167 = vmatpush.msrb.mxu1 %v11357_v0  ;;  %6070 = vmatpush.msrb.mxu2 %v11358_v59  ;;  %v11376_v59 = vld [vmem:[#allocation62_spill] sm:$0xff] }
0x1231   :  { %6134 = vmatmul.f32.vlgmr.msrb.gmra.mxu0 %v5719_v22  ;;  %6224 = vmatpush.msra.mxu3 %v11352_v56  ;;  %v11364_v22 = vld [vmem:[#allocation53_spill] sm:$0xff] }
0x1232   :  { %6173 = vmatpush.msrb.mxu1 %v11359_v35  ;;  %6251 = vmatpush.msra.mxu0 %v11360_v42  ;;  %v11365_v42 = vld [vmem:[#allocation45_spill] sm:$0xff]  ;;  %v11375_v35 = vld [vmem:[#allocation64_spill] sm:$0xff] }
0x1233   :  { %6074 = vmatpush.msrb.mxu2 %v11361_v33  ;;  %6175 = vmatmul.f32.vlgmr.msrb.gmra.mxu1 %v10365_v8  ;;  %v11366_v33 = vld [vmem:[#allocation55_spill] sm:$0xff] }
0x1234   :  { %6226 = vmatpush.msra.mxu3 %v11353_v40  ;;  %6255 = vmatpush.msra.mxu0 %v11362_v48  ;;  %v11367_v48 = vld [vmem:[#allocation47_spill] sm:$0xff] }
0x1235   :  { %6282 = vmatpush.msra.mxu1 %v11350_v57  ;;  %6078 = vmatpush.msrb.mxu2 %v11363_v3  ;;  %v11368_v3 = vld [vmem:[#allocation67_spill] sm:$0xff] }
0x1236   :  { %6228 = vmatpush.msra.mxu3 %v11356_v54  ;;  %6259 = vmatpush.msra.mxu0 %v11364_v22  ;;  %v11369_v22 = vld [vmem:[#allocation50_spill] sm:$0xff] }
0x1237   :  { %6284 = vmatpush.msra.mxu1 %v11352_v56  ;;  %6080 = vmatmul.f32.vlgmr.msrb.gmra.mxu2 %v10315_v10  ;;  %v11370_v10 = vld [vmem:[#allocation68_spill] sm:$0xff] }
0x1238   :  { %6193 = vmatpush.msra.mxu2 %v11365_v42  ;;  %6232 = vmatmul.f32.vlgmr.msra.gmra.mxu3 %v10372_v41  ;;  %v11371_v42 = vld [vmem:[#allocation63_spill] sm:$0xff]  ;;  %v11372_v41 = vld [vmem:[#allocation52_spill] sm:$0xff] }
0x1239   :  { %6263 = vmatpush.msra.mxu0 %v11366_v33  ;;  %6286 = vmatpush.msra.mxu1 %v11353_v40  ;;  %v11373_v33 = vld [vmem:[#allocation61_spill] sm:$0xff] }
0x123a   :  { %6196 = vmatpush.msra.mxu2 %v11367_v48  ;;  %6265 = vmatmul.f32.vlgmr.msra.gmra.mxu0 %v10365_v8  ;;  %v11374_v48 = vld [vmem:[#allocation76_spill] sm:$0xff] }
0x123b   :  { %6288 = vmatpush.msra.mxu1 %v11356_v54  ;;  %6383 = vmatpush.msrb.mxu3 %v11368_v3  ;;  %v11377_v3 = vld [vmem:[#allocation77_spill] sm:$0xff] }
0x123c   :  { %6199 = vmatpush.msra.mxu2 %v11369_v22  ;;  %6290 = vmatmul.f32.vlgmr.msra.gmra.mxu1 %v10365_v8  ;;  %v11378_v8 = vld [vmem:[#allocation71_spill] sm:$0xff] }
0x123d   :  { %6389 = vmatpush.msrb.mxu3 %v11370_v10  ;;  %6421 = vmatpush.msrb.mxu0 %v11371_v42  ;;  %v11379_v10 = vld [vmem:[#allocation70_spill] sm:$0xff] }
0x123e   :  { %6202 = vmatpush.msra.mxu2 %v11372_v41  ;;  %6450 = vmatpush.msrb.mxu1 %v11373_v33  ;;  %v11380_v41 = vld [vmem:[#allocation74_spill] sm:$0xff] }
0x123f   :  { %6205 = vmatmul.f32.vlgmr.msra.gmra.mxu2 %v10368_v26  ;;  %6395 = vmatpush.msrb.mxu3 %v11374_v48  ;;  %v11381_v26 = vld [vmem:[#allocation72_spill] sm:$0xff]  ;;  %v11388_v48 = vld [vmem:[#allocation93_spill] sm:$0xff] }
0x1240   :  { %6424 = vmatpush.msrb.mxu0 %v11375_v35  ;;  %6452 = vmatpush.msrb.mxu1 %v11376_v59  ;;  %v11382_v35 = vld [vmem:[#allocation87_spill] sm:$0xff] }
0x1241   :  { %6401 = vmatpush.msrb.mxu3 %v11377_v3  ;;  %6350 = vmatpush.msrb.mxu2 %v11373_v33  ;;  %v11384_v3 = vld [vmem:[#allocation90_spill] sm:$0xff] }
0x1242   :  { %6427 = vmatpush.msrb.mxu0 %v11378_v8  ;;  %6454 = vmatpush.msrb.mxu1 %v11379_v10  ;;  %v11383_v8 = vld [vmem:[#allocation65_spill] sm:$0xff] }
0x1243   :  { %6510 = vmatpush.msra.mxu3 %v11373_v33  ;;  %6352 = vmatpush.msrb.mxu2 %v11376_v59 }
0x1244   :  { %6430 = vmatpush.msrb.mxu0 %v11380_v41  ;;  %6456 = vmatpush.msrb.mxu1 %v11381_v26  ;;  %v11385_v41 = vld [vmem:[#allocation66_spill] sm:$0xff] }
0x1245   :  { %6512 = vmatpush.msra.mxu3 %v11376_v59  ;;  %6354 = vmatpush.msrb.mxu2 %v11379_v10  ;;  %v11386_v59 = vld [vmem:[#allocation92_spill] sm:$0xff] }
0x1246   :  { %6572 = vmatpush.msra.mxu1 %v11382_v35  ;;  %6539 = vmatpush.msra.mxu0 %v11174_v47  ;;  %v11387_v35 = vld [vmem:[#allocation73_spill] sm:$0xff] }
0x1247   :  { %6514 = vmatpush.msra.mxu3 %v11379_v10  ;;  %6356 = vmatpush.msrb.mxu2 %v11381_v26  ;;  %v11389_v10 = vld [vmem:[#allocation75_spill] sm:$0xff] }
0x1248   :  { %6578 = vmatpush.msra.mxu1 %v11384_v3  ;;  %6541 = vmatpush.msra.mxu0 %v11177_v61 }
0x1249   :  { %6479 = vmatpush.msra.mxu2 %v11383_v8  ;;  %6516 = vmatpush.msra.mxu3 %v11381_v26 }
0x124a   :  { %6584 = vmatpush.msra.mxu1 %v11386_v59  ;;  %6543 = vmatpush.msra.mxu0 %v11180_v12  ;;  %v10491_v59 = vld [vmem:[%s10899_s10] ss:$0 sm:$0xff] }
0x124b   :  { %6483 = vmatpush.msra.mxu2 %v11385_v41  ;;  %11390 = vst [vmem:[#allocation83_spill] sm:$0xff] %v10491_v59 }
0x124c   :  { %6590 = vmatpush.msra.mxu1 %v11388_v48  ;;  %6545 = vmatpush.msra.mxu0 %v11183_v19 }
0x124d   :  { %6487 = vmatpush.msra.mxu2 %v11387_v35 }
0x124f   :  { %6491 = vmatpush.msra.mxu2 %v11389_v10 }
0x128e   :  { %v5599_v8 = vpop.f32.mrf.mxu0 }
0x1290   :  { %v5626_v3 = vpop.f32.mrf.mxu1 }
0x1292   :  { %v5569_v33 = vpop.f32.mrf.mxu3 }
0x1296   :  { %v5721_v26 = vpop.f32.mrf.mxu0 }
0x1298   :  { %v5762_v42 = vpop.f32.mrf.mxu1 }
0x1299   :  { %v5763_v22 = vadd.f32 %v5762_v42, %v5721_v26 }
0x129a   :  { %v5528_v0 = vpop.f32.mrf.mxu2  ;;  %v5684_v41 = vpop.f32.mrf.mxu3 }
0x129b   :  { %v5529_v35 = vadd.f32 %v10491_v59, %v5528_v0 }
0x129d   :  { %v5570_v48 = vadd.f32 %v5569_v33, %v5529_v35 }
0x129e   :  { %v5852_v42 = vpop.f32.mrf.mxu0 }
0x129f   :  { %v5600_v54 = vadd.f32 %v5599_v8, %v5570_v48 }
0x12a0   :  { %v5877_v26 = vpop.f32.mrf.mxu1 }
0x12a1   :  { %v5627_v1 = vadd.f32 %v5626_v3, %v5600_v54 }
0x12a2   :  { %v5659_v15 = vpop.f32.mrf.mxu2  ;;  %v5819_v56 = vpop.f32.mrf.mxu3 }
0x12a3   :  { %v5660_v10 = vadd.f32 %v5659_v15, %v5627_v1 }
0x12a5   :  { %v5685_v40 = vadd.f32 %v5684_v41, %v5660_v10 }
0x12a6   :  { %v6021_v59 = vpop.f32.mrf.mxu0 }
0x12a7   :  { %8609 = vst [vmem:[%s10900_s11 + $0x8] sm:$0x3] %v5685_v40 }
0x12a8   :  { %v6048_v54 = vpop.f32.mrf.mxu1 }
0x12aa   :  { %v5792_v43 = vpop.f32.mrf.mxu2  ;;  %v5991_v58 = vpop.f32.mrf.mxu3 }
0x12ab   :  { %v5793_v57 = vadd.f32 %v5792_v43, %v5763_v22 }
0x12ad   :  { %v5820_v34 = vadd.f32 %v5819_v56, %v5793_v57 }
0x12ae   :  { %v6135_v41 = vpop.f32.mrf.mxu0 }
0x12af   :  { %v5853_v7 = vadd.f32 %v5852_v42, %v5820_v34 }
0x12b0   :  { %v6176_v40 = vpop.f32.mrf.mxu1 }
0x12b1   :  { %v5878_v0 = vadd.f32 %v5877_v26, %v5853_v7 }
0x12b2   :  { %v5950_v35 = vpop.f32.mrf.mxu2  ;;  %v6106_v1 = vpop.f32.mrf.mxu3 }
0x12b3   :  { %v5992_v33 = vadd.f32 %v5991_v58, %v5950_v35 }
0x12b5   :  { %v6022_v48 = vadd.f32 %v6021_v59, %v5992_v33 }
0x12b7   :  { %v6049_v15 = vadd.f32 %v6048_v54, %v6022_v48  ;;  %v6266_v56 = vpop.f32.mrf.mxu0 }
0x12b9   :  { %v6291_v22 = vpop.f32.mrf.mxu1 }
0x12ba   :  { %v6081_v3 = vpop.f32.mrf.mxu2 }
0x12bb   :  { %v6082_v10 = vadd.f32 %v6081_v3, %v6049_v15  ;;  %v6233_v57 = vpop.f32.mrf.mxu3  ;;  %v5881_v3 = vrot.slane %v5878_v0, 4 }
0x12bd   :  { %v6107_v8 = vadd.f32 %v6106_v1, %v6082_v10 }
0x12bf   :  { %v6136_v46 = vadd.f32 %v6135_v41, %v6107_v8  ;;  %v5883_v41 = vadd.f32 %v5881_v3, %v10102_v50 }
0x12c1   :  { %v6177_v24 = vadd.f32 %v6176_v40, %v6136_v46 }
0x12c2   :  { %v6206_v6 = vpop.f32.mrf.mxu2 }
0x12c3   :  { %v6207_v43 = vadd.f32 %v6206_v6, %v6177_v24 }
0x12c5   :  { %v6234_v34 = vadd.f32 %v6233_v57, %v6207_v43 }
0x12c7   :  { %v6267_v7 = vadd.f32 %v6266_v56, %v6234_v34  ;;  %v8610_v34 = vmul.f32 -1.442695, %v5883_v41 }
0x12c9   :  { %v6292_v42 = vadd.f32 %v6291_v22, %v6267_v7 }
0x12cb   :  { %v6294_v58 = vadd.f32 %v10295_v62, %v6292_v42 }
0x12cd   :  { %8724 = vtanh.f32 %v6294_v58  ;;  %v8611_v26 = vmul.f32 -1.442695, %v6294_v58 }
0x12cf   :  { %8726 = vpow2.f32 %v8611_v26 }
0x12d3   :  { %v8725_v59 = vpop.eup %8724 }
0x12d4   :  { %6317 = vrot.lane.b32.xlu2 %v8725_v59, %s8960_s19 }
0x12d5   :  { %v8727_v35 = vpop.eup %8726 }
0x12d6   :  { %v6298_v33 = vadd.f32 1.0, %v8727_v35 }
0x12d8   :  { %8728 = vrcp.f32 %v6298_v33  ;;  %v6310_v15 = vand.u32 2147483648, %v6298_v33  ;;  %vm6304_vm2 = vweird.f32 %v6298_v33  ;;  %v6308_v1 = vand.u32 2147483647, %v6298_v33 }
0x12d9   :  { %8730 = vtanh.f32 %v5883_v41 }
0x12da   :  { %v6311_v10 = vor.u32 1.1754944e-38, %v6310_v15  ;;  %vm6309_vm4 = vcmp.eq.f32.partialorder %v6308_v1, 8.507059e+37  ;;  %8732 = vpow2.f32 %v8610_v34 }
0x12de   :  { %v8729_v46 = vpop.eup %8728 }
0x12df   :  { %v6300_v54 = vmul.f32 %v8729_v46, %v6298_v33  ;;  %vm6305_vm1 = vweird.f32 %v8729_v46  ;;  %v8731_v57 = vpop.eup %8730 }
0x12e0   :  { %vm6306_vm3 = vmor %vm6304_vm2, %vm6305_vm1  ;;  %v8733_v56 = vpop.eup %8732 }
0x12e1   :  { %v6301_v6 = vsub.f32 1.0, %v6300_v54  ;;  %v5887_v7 = vadd.f32 1.0, %v8733_v56 }
0x12e3   :  { %v6302_v24 = vmul.f32 %v8729_v46, %v6301_v6  ;;  %8734 = vrcp.f32 %v5887_v7  ;;  %v5899_v54 = vand.u32 2147483648, %v5887_v7  ;;  %vm5893_vm7 = vweird.f32 %v5887_v7 }
0x12e4   :  { %v5897_v6 = vand.u32 2147483647, %v5887_v7 }
0x12e5   :  { %v6303_v48 = vadd.f32 %v8729_v46, %v6302_v24  ;;  %v5900_v15 = vor.u32 1.1754944e-38, %v5899_v54 }
0x12e6   :  { %vm5898_vm9 = vcmp.eq.f32.partialorder %v5897_v6, 8.507059e+37 }
0x12e7   :  { %v6307_v62 = vsel %vm6306_vm3, %v8729_v46, %v6303_v48 }
0x12e8   :  { %v6312_v40 = vsel %vm6309_vm4, %v6311_v10, %v6307_v62  ;;  %v5905_v10 = vrot.slane %v10310_v51, 6 }
0x12e9   :  { %v8735_v0 = vpop.eup %8734  ;;  %v6315_v42 = vmul.f32 %v6312_v40, %v10303_v45 }
0x12ea   :  { %v5889_v22 = vmul.f32 %v8735_v0, %v5887_v7  ;;  %vm5894_vm5 = vweird.f32 %v8735_v0 }
0x12eb   :  { %vm5895_vm8 = vmor %vm5893_vm7, %vm5894_vm5  ;;  %vm8535_vm7 = vcmask 261126  }
0x12ec   :  { %v5890_v59 = vsub.f32 1.0, %v5889_v22 }
0x12ee   :  { %v5891_v35 = vmul.f32 %v8735_v0, %v5890_v59 }
0x12f0   :  { %v5892_v33 = vadd.f32 %v8735_v0, %v5891_v35 }
0x12f2   :  { %v5896_v24 = vsel %vm5895_vm8, %v8735_v0, %v5892_v33  ;;  %vm8544_vm8 = vcmask 254976  }
0x12f3   :  { %v5901_v45 = vsel %vm5898_vm9, %v5900_v15, %v5896_v24 }
0x12f4   :  { %v5907_v41 = vmul.f32 %v5905_v10, %v5901_v45 }
0x132e   :  { %v6318_v8 = vpop.permute.xlu2 %6317 }
0x132f   :  { %v6320_v43 = vmul.f32 %v6318_v8, %v6312_v40 }
0x1331   :  { %6322 = vrot.lane.b32.xlu0 %v6320_v43, %s8960_s19 }
0x1339   :  { %5909 = vrot.lane.b32.xlu0 %v8731_v57, %s8960_s19 }
0x13a3   :  { %v6323_v58 = vpop.permute.xlu0 %6322 }
0x13a4   :  { %v10503_v26 = vadd.f32 %v6323_v58, %v6315_v42 }
0x13a6   :  { %8736 = vtanh.f32 %v10503_v26 }
0x13ab   :  { %v5910_v48 = vpop.permute.xlu0 %5909 }
0x13ac   :  { %v8737_v46 = vpop.eup %8736  ;;  %v5912_v1 = vmul.f32 %v5910_v48, %v5901_v45 }
0x13ad   :  { %6328 = vrot.lane.b32.xlu1 %v8737_v46, %s8960_s19 }
0x13b5   :  { %5914 = vrot.lane.b32.xlu1 %v5912_v1, %s8960_s19 }
0x141f   :  { %v6329_v3 = vpop.permute.xlu1 %6328 }
0x1420   :  { %v6331_v62 = vmul.f32 %v6329_v3, %v6312_v40 }
0x1422   :  { %6333 = vrot.lane.b32.xlu2 %v6331_v62, %s8961_s20 }
0x1427   :  { %v5915_v8 = vpop.permute.xlu1 %5914 }
0x1428   :  { %v10510_v43 = vadd.f32 %v5915_v8, %v5907_v41 }
0x142a   :  { %8738 = vtanh.f32 %v10510_v43 }
0x1430   :  { %v8739_v57 = vpop.eup %8738 }
0x1431   :  { %5920 = vrot.lane.b32.xlu2 %v8739_v57, %s8960_s19 }
0x147c   :  { %v6334_v34 = vpop.permute.xlu2 %6333 }
0x147d   :  { %v6335_v56 = vsel %vm339_vm6, %v6334_v34, 0 }
0x147e   :  { %v10515_v7 = vand.u32 4294901760, %v6335_v56 }
0x1480   :  { %v10518_v40 = vsub.f32 %v6335_v56, %v10515_v7  ;;  %6403 = vmatmul.f32.vlgmr.msrb.gmra.mxu3 %v10515_v7 }
0x1481   :  { %6639 = vmatpush.msrb.mxu3 %v11174_v47 }
0x1482   :  { %v10523_v51 = vand.u32 4294901760, %v10518_v40  ;;  %6433 = vmatmul.f32.vlgmr.msrb.gmra.mxu0 %v10518_v40 }
0x1483   :  { %6641 = vmatpush.msrb.mxu3 %v11177_v61  ;;  %6668 = vmatpush.msrb.mxu0 %v11190_v49 }
0x1484   :  { %v6360_v0 = vsub.f32 %v10518_v40, %v10523_v51  ;;  %6460 = vmatmul.f32.vlgmr.msrb.gmra.mxu1 %v10523_v51 }
0x1485   :  { %6643 = vmatpush.msrb.mxu3 %v11180_v12  ;;  %6699 = vmatpush.msrb.mxu1 %v11174_v47 }
0x1486   :  { %v10533_v22 = vand.u32 4294901760, %v6360_v0  ;;  %6672 = vmatpush.msrb.mxu0 %v11191_v37 }
0x1487   :  { %6645 = vmatpush.msrb.mxu3 %v11183_v19  ;;  %6701 = vmatpush.msrb.mxu1 %v11177_v61 }
0x1488   :  { %6362 = vmatmul.f32.vlgmr.msrb.gmra.mxu2 %v10533_v22  ;;  %6518 = vmatmul.f32.vlgmr.msra.gmra.mxu3 %v10515_v7 }
0x1489   :  { %6610 = vmatpush.msrb.mxu2 %v11192_v52  ;;  %6703 = vmatpush.msrb.mxu1 %v11180_v12 }
0x148a   :  { %6765 = vmatpush.msra.mxu3 %v11193_v55  ;;  %6676 = vmatpush.msrb.mxu0 %v11194_v13 }
0x148b   :  { %v5921_v42 = vpop.permute.xlu2 %5920  ;;  %6613 = vmatpush.msrb.mxu2 %v11237_v53  ;;  %6705 = vmatpush.msrb.mxu1 %v11183_v19 }
0x148c   :  { %v5923_v58 = vmul.f32 %v5921_v42, %v5901_v45  ;;  %6771 = vmatpush.msra.mxu3 %v11238_v44  ;;  %6680 = vmatpush.msrb.mxu0 %v11239_v63 }
0x148d   :  { %6616 = vmatpush.msrb.mxu2 %v11240_v4 }
0x148e   :  { %v6714_v59 = vrot.slane %v5923_v58, 4  ;;  %6777 = vmatpush.msra.mxu3 %v11241_v36 }
0x148f   :  { %6619 = vmatpush.msrb.mxu2 %v11242_v38 }
0x1490   :  { %6493 = vmatmul.f32.vlgmr.msra.gmra.mxu2 %v10515_v7  ;;  %6715 = vrot.lane.b32.xlu0 %v6714_v59, %s8961_s20  ;;  %v11403_v59 = vld [vmem:[#allocation49_spill] sm:$0xff] }
0x1491   :  { %6732 = vmatpush.msra.mxu2 %v9057_v5  ;;  %6783 = vmatpush.msra.mxu3 %v11243_v32 }
0x1493   :  { %6734 = vmatpush.msra.mxu2 %v9064_v11 }
0x1495   :  { %6736 = vmatpush.msra.mxu2 %v9071_v16 }
0x1497   :  { %6738 = vmatpush.msra.mxu2 %v9073_v17 }
0x14ff   :  { %v6434_v33 = vpop.f32.mrf.mxu0 }
0x1501   :  { %v6461_v6 = vpop.f32.mrf.mxu1 }
0x1502   :  { %v6716_v46 = vpop.permute.xlu0 %6715 }
0x1503   :  { %v6404_v55 = vpop.f32.mrf.mxu3  ;;  %v6717_v24 = vsel %vm339_vm6, %v6716_v46, 0  ;;  %v11412_v46 = vld [vmem:[#allocation45_spill] sm:$0xff] }
0x1504   :  { %v10560_v45 = vand.u32 4294901760, %v6717_v24 }
0x1506   :  { %v10563_v10 = vsub.f32 %v6717_v24, %v10560_v45  ;;  %v11415_v24 = vld [vmem:[#allocation67_spill] sm:$0xff] }
0x1508   :  { %v10567_v8 = vand.u32 4294901760, %v10563_v10 }
0x150a   :  { %v6742_v56 = vsub.f32 %v10563_v10, %v10567_v8 }
0x150b   :  { %v6363_v44 = vpop.f32.mrf.mxu2  ;;  %v6519_v1 = vpop.f32.mrf.mxu3 }
0x150c   :  { %v6364_v36 = vadd.f32 %v10361_v31, %v6363_v44  ;;  %v6743_v58 = vand.u32 4294901760, %v6742_v56  ;;  %v11407_v44 = vld [vmem:[#allocation48_spill] sm:$0xff]  ;;  %v11430_v56 = vld [vmem:[#allocation65_spill] sm:$0xff] }
0x150e   :  { %v6405_v35 = vadd.f32 %v6404_v55, %v6364_v36  ;;  %v11406_v55 = vld [vmem:[#allocation58_spill] sm:$0xff]  ;;  %v11408_v36 = vld [vmem:[#allocation39_spill] sm:$0xff] }
0x1510   :  { %v6435_v54 = vadd.f32 %v6434_v33, %v6405_v35  ;;  %v11410_v35 = vld [vmem:[#allocation41_spill] sm:$0xff] }
0x1511   :  { %v11411_v33 = vld [vmem:[#allocation53_spill] sm:$0xff] }
0x1512   :  { %v6462_v48 = vadd.f32 %v6461_v6, %v6435_v54  ;;  %v11413_v54 = vld [vmem:[#allocation55_spill] sm:$0xff] }
0x1513   :  { %v6494_v15 = vpop.f32.mrf.mxu2  ;;  %v11414_v6 = vld [vmem:[#allocation47_spill] sm:$0xff] }
0x1514   :  { %v6495_v32 = vadd.f32 %v6494_v15, %v6462_v48  ;;  %v11416_v48 = vld [vmem:[#allocation50_spill] sm:$0xff]  ;;  %v11418_v15 = vld [vmem:[#allocation63_spill] sm:$0xff] }
0x1516   :  { %v6520_v3 = vadd.f32 %v6519_v1, %v6495_v32  ;;  %v11419_v32 = vld [vmem:[#allocation52_spill] sm:$0xff]  ;;  %v11420_v1 = vld [vmem:[#allocation61_spill] sm:$0xff] }
0x1518   :  { %v6522_v62 = vmax.f32 %v6520_v3, 0.0  ;;  %v11421_v3 = vld [vmem:[#allocation76_spill] sm:$0xff] }
0x151a   :  { %v6524_v31 = vsel %vm339_vm6, %v6522_v62, 0  ;;  %v11422_v62 = vld [vmem:[#allocation64_spill] sm:$0xff] }
0x151b   :  { %v6546_v41 = vand.u32 4294901760, %v6524_v31 }
0x151d   :  { %v6547_v57 = vsub.f32 %v6524_v31, %v6546_v41  ;;  %6592 = vmatmul.f32.vlgmr.msra.gmra.mxu1 %v6546_v41  ;;  %v11423_v31 = vld [vmem:[#allocation62_spill] sm:$0xff] }
0x151e   :  { %6832 = vmatpush.msra.mxu1 %v9057_v5 }
0x151f   :  { %v6548_v34 = vand.u32 4294901760, %v6547_v57  ;;  %6622 = vmatmul.f32.vlgmr.msrb.gmra.mxu2 %v6547_v57 }
0x1520   :  { %6834 = vmatpush.msra.mxu1 %v9064_v11  ;;  %6861 = vmatpush.msrb.mxu2 %v9080_v21  ;;  %v11397_v21 = vld [vmem:[#allocation43_spill] sm:$0xff] }
0x1521   :  { %v6549_v0 = vsub.f32 %v6547_v57, %v6548_v34  ;;  %6649 = vmatmul.f32.vlgmr.msrb.gmra.mxu3 %v6548_v34  ;;  %v11427_v57 = vld [vmem:[#allocation74_spill] sm:$0xff]  ;;  %v11429_v34 = vld [vmem:[#allocation87_spill] sm:$0xff] }
0x1522   :  { %6836 = vmatpush.msra.mxu1 %v9071_v16  ;;  %6865 = vmatpush.msrb.mxu2 %v9090_v27  ;;  %v11399_v27 = vld [vmem:[#allocation44_spill] sm:$0xff] }
0x1523   :  { %v6550_v42 = vand.u32 4294901760, %v6549_v0  ;;  %6892 = vmatpush.msrb.mxu3 %v9057_v5  ;;  %v11391_v5 = vld [vmem:[#allocation42_spill] sm:$0xff] }
0x1524   :  { %6838 = vmatpush.msra.mxu1 %v9073_v17  ;;  %6869 = vmatpush.msrb.mxu2 %v9095_v29  ;;  %v11400_v29 = vld [vmem:[#allocation46_spill] sm:$0xff] }
0x1525   :  { %6551 = vmatmul.f32.vlgmr.msra.gmra.mxu0 %v6550_v42  ;;  %6707 = vmatmul.f32.vlgmr.msrb.gmra.mxu1 %v6546_v41  ;;  %v11431_v0 = vld [vmem:[#allocation90_spill] sm:$0xff] }
0x1526   :  { %6894 = vmatpush.msrb.mxu3 %v9064_v11  ;;  %6803 = vmatpush.msra.mxu0 %v9067_v14  ;;  %v11392_v11 = vld [vmem:[#allocation38_spill] sm:$0xff]  ;;  %v11393_v14 = vld [vmem:[#allocation32_spill] sm:$0xff] }
0x1527   :  { %6744 = vmatmul.f32.vlgmr.msra.gmra.mxu2 %v6743_v58  ;;  %6994 = vmatpush.msrb.mxu1 %v9227_v9  ;;  %v11432_v42 = vld [vmem:[#allocation66_spill] sm:$0xff] }
0x1528   :  { %6873 = vmatpush.msrb.mxu2 %v9098_v30  ;;  %6896 = vmatpush.msrb.mxu3 %v9071_v16  ;;  %v11394_v16 = vld [vmem:[#allocation40_spill] sm:$0xff] }
0x1529   :  { %6785 = vmatmul.f32.vlgmr.msra.gmra.mxu3 %v10560_v45  ;;  %6806 = vmatpush.msra.mxu0 %v9077_v20  ;;  %v11396_v20 = vld [vmem:[#allocation37_spill] sm:$0xff]  ;;  %v11401_v30 = vld [vmem:[#allocation56_spill] sm:$0xff] }
0x152a   :  { %6898 = vmatpush.msrb.mxu3 %v9073_v17  ;;  %7000 = vmatpush.msrb.mxu1 %v9239_v18  ;;  %v11395_v17 = vld [vmem:[#allocation34_spill] sm:$0xff] }
0x152b   :  { %7032 = vmatpush.msra.mxu2 %v9205_v60  ;;  %6809 = vmatpush.msra.mxu0 %v9084_v23  ;;  %v11398_v23 = vld [vmem:[#allocation54_spill] sm:$0xff] }
0x152c   :  { %7006 = vmatpush.msrb.mxu1 %v9247_v25  ;;  %7061 = vmatpush.msra.mxu3 %v11292_v2 }
0x152d   :  { %6682 = vmatmul.f32.vlgmr.msrb.gmra.mxu0 %v6546_v41  ;;  %6842 = vmatmul.f32.vlgmr.msra.gmra.mxu1 %v10567_v8  ;;  %v11424_v41 = vld [vmem:[#allocation77_spill] sm:$0xff] }
0x152e   :  { %7035 = vmatpush.msra.mxu2 %v11342_v28  ;;  %6812 = vmatpush.msra.mxu0 %v11343_v39  ;;  %v11402_v39 = vld [vmem:[#allocation33_spill] sm:$0xff] }
0x152f   :  { %6875 = vmatmul.f32.vlgmr.msrb.gmra.mxu2 %v10560_v45  ;;  %7012 = vmatpush.msrb.mxu1 %v11391_v5 }
0x1530   :  { %7038 = vmatpush.msra.mxu2 %v11392_v11  ;;  %7063 = vmatpush.msra.mxu3 %v11393_v14 }
0x1531   :  { %6900 = vmatmul.f32.vlgmr.msrb.gmra.mxu3 %v10560_v45  ;;  %6961 = vmatpush.msrb.mxu0 %v11292_v2 }
0x1532   :  { %7041 = vmatpush.msra.mxu2 %v11394_v16  ;;  %7065 = vmatpush.msra.mxu3 %v11395_v17 }
0x1533   :  { %7121 = vmatpush.msra.mxu1 %v11292_v2  ;;  %6963 = vmatpush.msrb.mxu0 %v11393_v14 }
0x1534   :  { %7067 = vmatpush.msra.mxu3 %v11396_v20  ;;  %7146 = vmatpush.msrb.mxu2 %v11397_v21 }
0x1535   :  { %6815 = vmatmul.f32.vlgmr.msra.gmra.mxu0 %v10563_v10  ;;  %7014 = vmatmul.f32.vlgmr.msrb.gmra.mxu1 %v10515_v7 }
0x1536   :  { %7123 = vmatpush.msra.mxu1 %v11393_v14  ;;  %6965 = vmatpush.msrb.mxu0 %v11395_v17 }
0x1537   :  { %7044 = vmatmul.f32.vlgmr.msra.gmra.mxu2 %v10518_v40  ;;  %7179 = vmatpush.msrb.mxu3 %v11398_v23  ;;  %v11404_v40 = vld [vmem:[#allocation57_spill] sm:$0xff] }
0x1538   :  { %7125 = vmatpush.msra.mxu1 %v11395_v17  ;;  %7148 = vmatpush.msrb.mxu2 %v11399_v27 }
0x1539   :  { %7071 = vmatmul.f32.vlgmr.msra.gmra.mxu3 %v10523_v51  ;;  %6967 = vmatpush.msrb.mxu0 %v11396_v20  ;;  %v11405_v51 = vld [vmem:[#allocation36_spill] sm:$0xff] }
0x153a   :  { %7127 = vmatpush.msra.mxu1 %v11396_v20  ;;  %7150 = vmatpush.msrb.mxu2 %v11400_v29 }
0x153b   :  { %7185 = vmatpush.msrb.mxu3 %v11401_v30  ;;  %7090 = vmatpush.msra.mxu0 %v11402_v39 }
0x153c   :  { %7152 = vmatpush.msrb.mxu2 %v11403_v59  ;;  %7246 = vmatpush.msrb.mxu1 %v11397_v21 }
0x153d   :  { %6973 = vmatmul.f32.vlgmr.msrb.gmra.mxu0 %v10533_v22  ;;  %7129 = vmatmul.f32.vlgmr.msra.gmra.mxu1 %v10515_v7  ;;  %v11409_v22 = vld [vmem:[#allocation51_spill] sm:$0xff] }
0x153e   :  { %7191 = vmatpush.msrb.mxu3 %v11404_v40  ;;  %7094 = vmatpush.msra.mxu0 %v11405_v51 }
0x153f   :  { %7158 = vmatmul.f32.vlgmr.msrb.gmra.mxu2 %v6743_v58  ;;  %7248 = vmatpush.msrb.mxu1 %v11399_v27  ;;  %v11433_v58 = vld [vmem:[#allocation92_spill] sm:$0xff] }
0x1540   :  { %7197 = vmatpush.msrb.mxu3 %v11406_v55  ;;  %7275 = vmatpush.msra.mxu2 %v11407_v44 }
0x1541   :  { %7098 = vmatpush.msra.mxu0 %v11408_v36  ;;  %7199 = vmatmul.f32.vlgmr.msrb.gmra.mxu3 %v10560_v45 }
0x1542   :  { %7250 = vmatpush.msrb.mxu1 %v11400_v29  ;;  %7279 = vmatpush.msra.mxu2 %v11409_v22 }
0x1543   :  { %7306 = vmatpush.msra.mxu3 %v11397_v21  ;;  %7102 = vmatpush.msra.mxu0 %v11410_v35 }
0x1544   :  { %7252 = vmatpush.msrb.mxu1 %v11403_v59  ;;  %7283 = vmatpush.msra.mxu2 %v11411_v33 }
0x1545   :  { %7308 = vmatpush.msra.mxu3 %v11399_v27  ;;  %7104 = vmatmul.f32.vlgmr.msra.gmra.mxu0 %v10515_v7  ;;  %v11417_v7 = vld [vmem:[#allocation68_spill] sm:$0xff] }
0x1546   :  { %7217 = vmatpush.msrb.mxu0 %v11412_v46  ;;  %7256 = vmatmul.f32.vlgmr.msrb.gmra.mxu1 %v10567_v8  ;;  %v11426_v8 = vld [vmem:[#allocation70_spill] sm:$0xff] }
0x1547   :  { %7287 = vmatpush.msra.mxu2 %v11413_v54  ;;  %7310 = vmatpush.msra.mxu3 %v11400_v29 }
0x1548   :  { %7220 = vmatpush.msrb.mxu0 %v11414_v6  ;;  %7289 = vmatmul.f32.vlgmr.msra.gmra.mxu2 %v10560_v45 }
0x1549   :  { %7312 = vmatpush.msra.mxu3 %v11403_v59  ;;  %7407 = vmatpush.msra.mxu1 %v11415_v24 }
0x154a   :  { %7223 = vmatpush.msrb.mxu0 %v11416_v48  ;;  %7314 = vmatmul.f32.vlgmr.msra.gmra.mxu3 %v10560_v45  ;;  %v11425_v45 = vld [vmem:[#allocation71_spill] sm:$0xff] }
0x154b   :  { %7413 = vmatpush.msra.mxu1 %v11417_v7  ;;  %7445 = vmatpush.msrb.mxu2 %v11418_v15 }
0x154c   :  { %7226 = vmatpush.msrb.mxu0 %v11419_v32  ;;  %7474 = vmatpush.msrb.mxu3 %v11420_v1 }
0x154d   :  { %7229 = vmatmul.f32.vlgmr.msrb.gmra.mxu0 %v10563_v10  ;;  %7419 = vmatpush.msra.mxu1 %v11421_v3  ;;  %v11428_v10 = vld [vmem:[#allocation72_spill] sm:$0xff] }
0x154e   :  { %7448 = vmatpush.msrb.mxu2 %v11422_v62  ;;  %7476 = vmatpush.msrb.mxu3 %v11423_v31 }
0x154f   :  { %7425 = vmatpush.msra.mxu1 %v11424_v41  ;;  %7374 = vmatpush.msra.mxu0 %v11420_v1 }
0x1550   :  { %7451 = vmatpush.msrb.mxu2 %v11425_v45  ;;  %7478 = vmatpush.msrb.mxu3 %v11426_v8  ;;  %v11435_v45 = vld [vmem:[#allocation93_spill] sm:$0xff] }
0x1551   :  { %7534 = vmatpush.msrb.mxu1 %v11420_v1  ;;  %7376 = vmatpush.msra.mxu0 %v11423_v31 }
0x1552   :  { %7454 = vmatpush.msrb.mxu2 %v11427_v57  ;;  %7480 = vmatpush.msrb.mxu3 %v11428_v10  ;;  %v11434_v57 = vld [vmem:[#allocation73_spill] sm:$0xff] }
0x1553   :  { %7536 = vmatpush.msrb.mxu1 %v11423_v31  ;;  %7378 = vmatpush.msra.mxu0 %v11426_v8 }
0x1554   :  { %7596 = vmatpush.msra.mxu3 %v11429_v34  ;;  %7563 = vmatpush.msra.mxu2 %v11174_v47  ;;  %v11436_v34 = vld [vmem:[#allocation75_spill] sm:$0xff] }
0x1555   :  { %7538 = vmatpush.msrb.mxu1 %v11426_v8  ;;  %7380 = vmatpush.msra.mxu0 %v11428_v10 }
0x1556   :  { %7602 = vmatpush.msra.mxu3 %v11431_v0  ;;  %7565 = vmatpush.msra.mxu2 %v11177_v61 }
0x1557   :  { %7503 = vmatpush.msrb.mxu0 %v11430_v56  ;;  %7540 = vmatpush.msrb.mxu1 %v11428_v10  ;;  %v11437_v10 = vld [vmem:[#allocation83_spill] sm:$0xff] }
0x1558   :  { %7608 = vmatpush.msra.mxu3 %v11433_v58  ;;  %7567 = vmatpush.msra.mxu2 %v11180_v12 }
0x1559   :  { %7507 = vmatpush.msrb.mxu0 %v11432_v42 }
0x155a   :  { %7614 = vmatpush.msra.mxu3 %v11435_v45  ;;  %7569 = vmatpush.msra.mxu2 %v11183_v19 }
0x155b   :  { %7511 = vmatpush.msrb.mxu0 %v11434_v57 }
0x155d   :  { %7515 = vmatpush.msrb.mxu0 %v11436_v34 }
0x159a   :  { %v6593_v56 = vpop.f32.mrf.mxu1 }
0x15a2   :  { %v6552_v0 = vpop.f32.mrf.mxu0  ;;  %v6623_v62 = vpop.f32.mrf.mxu2 }
0x15a3   :  { %v6553_v15 = vadd.f32 %v11437_v10, %v6552_v0  ;;  %v6708_v8 = vpop.f32.mrf.mxu1 }
0x15a4   :  { %v6650_v54 = vpop.f32.mrf.mxu3 }
0x15a5   :  { %v6594_v42 = vadd.f32 %v6593_v56, %v6553_v15 }
0x15a7   :  { %v6624_v41 = vadd.f32 %v6623_v62, %v6594_v42 }
0x15a9   :  { %v6651_v58 = vadd.f32 %v6650_v54, %v6624_v41 }
0x15aa   :  { %v6683_v33 = vpop.f32.mrf.mxu0  ;;  %v6745_v31 = vpop.f32.mrf.mxu2 }
0x15ab   :  { %v6684_v3 = vadd.f32 %v6683_v33, %v6651_v58  ;;  %v6843_v7 = vpop.f32.mrf.mxu1 }
0x15ac   :  { %v6786_v57 = vpop.f32.mrf.mxu3 }
0x15ad   :  { %v6709_v22 = vadd.f32 %v6708_v8, %v6684_v3  ;;  %v6787_v45 = vadd.f32 %v6786_v57, %v6745_v31 }
0x15af   :  { %8612 = vst [vmem:[%s10900_s11 + $0xa] sm:$0x3] %v6709_v22 }
0x15b2   :  { %v6816_v34 = vpop.f32.mrf.mxu0  ;;  %v6876_v44 = vpop.f32.mrf.mxu2 }
0x15b3   :  { %v6817_v24 = vadd.f32 %v6816_v34, %v6787_v45  ;;  %v7015_v15 = vpop.f32.mrf.mxu1 }
0x15b4   :  { %v6901_v10 = vpop.f32.mrf.mxu3 }
0x15b5   :  { %v6844_v0 = vadd.f32 %v6843_v7, %v6817_v24 }
0x15b7   :  { %v6877_v1 = vadd.f32 %v6876_v44, %v6844_v0 }
0x15b9   :  { %v6902_v62 = vadd.f32 %v6901_v10, %v6877_v1 }
0x15ba   :  { %v6974_v54 = vpop.f32.mrf.mxu0  ;;  %v7045_v41 = vpop.f32.mrf.mxu2 }
0x15bb   :  { %v7016_v56 = vadd.f32 %v7015_v15, %v6974_v54  ;;  %v7130_v31 = vpop.f32.mrf.mxu1  ;;  %v10690_v15 = vld [vmem:[%s10895_s6] ss:$0 sm:$0xff] }
0x15bc   :  { %v7072_v33 = vpop.f32.mrf.mxu3 }
0x15bd   :  { %v7046_v42 = vadd.f32 %v7045_v41, %v7016_v56 }
0x15bf   :  { %v7073_v3 = vadd.f32 %v7072_v33, %v7046_v42 }
0x15c2   :  { %v7105_v8 = vpop.f32.mrf.mxu0  ;;  %v7159_v58 = vpop.f32.mrf.mxu2 }
0x15c3   :  { %v7106_v57 = vadd.f32 %v7105_v8, %v7073_v3  ;;  %v7257_v24 = vpop.f32.mrf.mxu1 }
0x15c4   :  { %v7200_v22 = vpop.f32.mrf.mxu3 }
0x15c5   :  { %v7131_v59 = vadd.f32 %v7130_v31, %v7106_v57 }
0x15c7   :  { %v7160_v29 = vadd.f32 %v7159_v58, %v7131_v59  ;;  %v6905_v58 = vrot.slane %v6902_v62, 2 }
0x15c9   :  { %v7201_v32 = vadd.f32 %v7200_v22, %v7160_v29 }
0x15ca   :  { %v7230_v45 = vpop.f32.mrf.mxu0 }
0x15cb   :  { %v7231_v34 = vadd.f32 %v7230_v45, %v7201_v32  ;;  %v7290_v7 = vpop.f32.mrf.mxu2 }
0x15cd   :  { %v7258_v44 = vadd.f32 %v7257_v24, %v7231_v34  ;;  %v7315_v10 = vpop.f32.mrf.mxu3  ;;  %v6907_v34 = vadd.f32 %v6905_v58, %v10102_v50 }
0x15cf   :  { %v7291_v1 = vadd.f32 %v7290_v7, %v7258_v44 }
0x15d1   :  { %v7316_v0 = vadd.f32 %v7315_v10, %v7291_v1  ;;  %v8613_v10 = vmul.f32 -1.442695, %v6907_v34 }
0x15d3   :  { %v7318_v54 = vadd.f32 %v10690_v15, %v7316_v0 }
0x15d5   :  { %8740 = vtanh.f32 %v7318_v54  ;;  %v8614_v29 = vmul.f32 -1.442695, %v7318_v54 }
0x15d7   :  { %8742 = vpow2.f32 %v8614_v29 }
0x15db   :  { %v8741_v41 = vpop.eup %8740 }
0x15dc   :  { %7341 = vrot.lane.b32.xlu1 %v8741_v41, %s8960_s19 }
0x15dd   :  { %v8743_v59 = vpop.eup %8742 }
0x15de   :  { %v7322_v32 = vadd.f32 1.0, %v8743_v59 }
0x15e0   :  { %8744 = vrcp.f32 %v7322_v32  ;;  %v7334_v8 = vand.u32 2147483648, %v7322_v32  ;;  %vm7328_vm11 = vweird.f32 %v7322_v32  ;;  %v7332_v57 = vand.u32 2147483647, %v7322_v32 }
0x15e1   :  { %8746 = vtanh.f32 %v6907_v34 }
0x15e2   :  { %v7335_v45 = vor.u32 1.1754944e-38, %v7334_v8  ;;  %vm7333_vm13 = vcmp.eq.f32.partialorder %v7332_v57, 8.507059e+37  ;;  %8748 = vpow2.f32 %v8613_v10 }
0x15e6   :  { %v8745_v56 = vpop.eup %8744 }
0x15e7   :  { %v7324_v33 = vmul.f32 %v8745_v56, %v7322_v32  ;;  %vm7329_vm10 = vweird.f32 %v8745_v56  ;;  %v8747_v1 = vpop.eup %8746 }
0x15e8   :  { %vm7330_vm12 = vmor %vm7328_vm11, %vm7329_vm10  ;;  %v8749_v0 = vpop.eup %8748 }
0x15e9   :  { %v7325_v42 = vsub.f32 1.0, %v7324_v33  ;;  %v6911_v54 = vadd.f32 1.0, %v8749_v0 }
0x15eb   :  { %v7326_v3 = vmul.f32 %v8745_v56, %v7325_v42  ;;  %8750 = vrcp.f32 %v6911_v54  ;;  %vm6917_vm15 = vweird.f32 %v6911_v54 }
0x15ed   :  { %v7327_v31 = vadd.f32 %v8745_v56, %v7326_v3  ;;  %v6923_v3 = vand.u32 2147483648, %v6911_v54 }
0x15ef   :  { %v7331_v22 = vsel %vm7330_vm12, %v8745_v56, %v7327_v31  ;;  %v6921_v31 = vand.u32 2147483647, %v6911_v54  ;;  %v6924_v58 = vor.u32 1.1754944e-38, %v6923_v3 }
0x15f0   :  { %v7336_v44 = vsel %vm7333_vm13, %v7335_v45, %v7331_v22 }
0x15f1   :  { %v8751_v62 = vpop.eup %8750  ;;  %v7339_v29 = vmul.f32 %v7336_v44, %v10503_v26  ;;  %vm6922_vm1 = vcmp.eq.f32.partialorder %v6921_v31, 8.507059e+37 }
0x15f2   :  { %v6913_v41 = vmul.f32 %v8751_v62, %v6911_v54  ;;  %vm6918_vm14 = vweird.f32 %v8751_v62 }
0x15f3   :  { %vm6919_vm0 = vmor %vm6917_vm15, %vm6918_vm14 }
0x15f4   :  { %v6914_v50 = vsub.f32 1.0, %v6913_v41 }
0x15f6   :  { %v6915_v56 = vmul.f32 %v8751_v62, %v6914_v50 }
0x15f8   :  { %v6916_v33 = vadd.f32 %v8751_v62, %v6915_v56 }
0x15fa   :  { %v6920_v8 = vsel %vm6919_vm0, %v8751_v62, %v6916_v33 }
0x15fb   :  { %v6925_v26 = vsel %vm6922_vm1, %v6924_v58, %v6920_v8 }
0x164e   :  { %v7342_v24 = vpop.permute.xlu1 %7341 }
0x164f   :  { %v7344_v7 = vmul.f32 %v7342_v24, %v7336_v44  ;;  %v6929_v24 = vrot.slane %v10510_v43, 6 }
0x1651   :  { %7346 = vrot.lane.b32.xlu2 %v7344_v7, %s8960_s19  ;;  %v6931_v7 = vmul.f32 %v6929_v24, %v6925_v26 }
0x1659   :  { %6933 = vrot.lane.b32.xlu2 %v8747_v1, %s8960_s19 }
0x16ab   :  { %v7347_v59 = vpop.permute.xlu2 %7346 }
0x16ac   :  { %v10698_v32 = vadd.f32 %v7347_v59, %v7339_v29 }
0x16ae   :  { %8752 = vtanh.f32 %v10698_v32 }
0x16b3   :  { %v6934_v57 = vpop.permute.xlu2 %6933 }
0x16b4   :  { %v8753_v42 = vpop.eup %8752  ;;  %v6936_v22 = vmul.f32 %v6934_v57, %v6925_v26 }
0x16b5   :  { %7352 = vrot.lane.b32.xlu0 %v8753_v42, %s8960_s19 }
0x16bd   :  { %6938 = vrot.lane.b32.xlu0 %v6936_v22, %s8960_s19 }
0x1727   :  { %v7353_v45 = vpop.permute.xlu0 %7352 }
0x1728   :  { %v7355_v34 = vmul.f32 %v7353_v45, %v7336_v44 }
0x172a   :  { %7357 = vrot.lane.b32.xlu1 %v7355_v34, %s8961_s20 }
0x172f   :  { %v6939_v1 = vpop.permute.xlu0 %6938 }
0x1730   :  { %v10705_v10 = vadd.f32 %v6939_v1, %v6931_v7 }
0x1732   :  { %8754 = vtanh.f32 %v10705_v10 }
0x1738   :  { %v8755_v0 = vpop.eup %8754 }
0x1739   :  { %6944 = vrot.lane.b32.xlu1 %v8755_v0, %s8960_s19 }
0x179c   :  { %v7358_v54 = vpop.permute.xlu1 %7357 }
0x179d   :  { %v7359_v62 = vsel %vm339_vm6, %v7358_v54, 0 }
0x179e   :  { %v10710_v41 = vand.u32 4294901760, %v7359_v62 }
0x17a0   :  { %v10713_v44 = vsub.f32 %v7359_v62, %v10710_v41  ;;  %7427 = vmatmul.f32.vlgmr.msra.gmra.mxu1 %v10710_v41 }
0x17a1   :  { %7663 = vmatpush.msra.mxu1 %v11174_v47 }
0x17a2   :  { %v10718_v43 = vand.u32 4294901760, %v10713_v44  ;;  %7457 = vmatmul.f32.vlgmr.msrb.gmra.mxu2 %v10713_v44 }
0x17a3   :  { %7665 = vmatpush.msra.mxu1 %v11177_v61  ;;  %7692 = vmatpush.msrb.mxu2 %v11190_v49 }
0x17a4   :  { %v7384_v29 = vsub.f32 %v10713_v44, %v10718_v43  ;;  %7484 = vmatmul.f32.vlgmr.msrb.gmra.mxu3 %v10718_v43 }
0x17a5   :  { %7667 = vmatpush.msra.mxu1 %v11180_v12  ;;  %7723 = vmatpush.msrb.mxu3 %v11174_v47 }
0x17a6   :  { %v7385_v59 = vand.u32 4294901760, %v7384_v29  ;;  %7696 = vmatpush.msrb.mxu2 %v11191_v37 }
0x17a7   :  { %7669 = vmatpush.msra.mxu1 %v11183_v19  ;;  %7725 = vmatpush.msrb.mxu3 %v11177_v61 }
0x17a8   :  { %7386 = vmatmul.f32.vlgmr.msra.gmra.mxu0 %v7385_v59  ;;  %7542 = vmatmul.f32.vlgmr.msrb.gmra.mxu1 %v10710_v41 }
0x17a9   :  { %7634 = vmatpush.msra.mxu0 %v11192_v52  ;;  %7727 = vmatpush.msrb.mxu3 %v11180_v12 }
0x17aa   :  { %7783 = vmatpush.msrb.mxu1 %v9227_v9  ;;  %7700 = vmatpush.msrb.mxu2 %v11194_v13 }
0x17ab   :  { %v6945_v50 = vpop.permute.xlu1 %6944  ;;  %7637 = vmatpush.msra.mxu0 %v11237_v53  ;;  %7729 = vmatpush.msrb.mxu3 %v11183_v19 }
0x17ac   :  { %v10738_v56 = vmul.f32 %v6945_v50, %v6925_v26  ;;  %7789 = vmatpush.msrb.mxu1 %v9239_v18  ;;  %7704 = vmatpush.msrb.mxu2 %v11239_v63  ;;  %v11457_v50 = vld [vmem:[#allocation71_spill] sm:$0xff] }
0x17ad   :  { %7640 = vmatpush.msra.mxu0 %v11240_v4 }
0x17ae   :  { %v7923_v33 = vrot.slane %v10738_v56, 6  ;;  %7795 = vmatpush.msrb.mxu1 %v9247_v25  ;;  %v10756_v25 = vld [vmem:[%s10897_s8] ss:$0 sm:$0xff] }
0x17af   :  { %7643 = vmatpush.msra.mxu0 %v11242_v38 }
0x17b0   :  { %7517 = vmatmul.f32.vlgmr.msrb.gmra.mxu0 %v10710_v41  ;;  %7924 = vrot.lane.b32.xlu2 %v7923_v33, %s8961_s20  ;;  %v11458_v33 = vld [vmem:[#allocation66_spill] sm:$0xff] }
0x17b1   :  { %7750 = vmatpush.msrb.mxu0 %v11292_v2  ;;  %7801 = vmatpush.msrb.mxu1 %v11391_v5 }
0x17b3   :  { %7752 = vmatpush.msrb.mxu0 %v11393_v14 }
0x17b5   :  { %7754 = vmatpush.msrb.mxu0 %v11395_v17 }
0x17b7   :  { %7756 = vmatpush.msrb.mxu0 %v11396_v20 }
0x180a   :  { %v7925_v29 = vpop.permute.xlu2 %7924 }
0x181d   :  { %v7428_v9 = vpop.f32.mrf.mxu1 }
0x1825   :  { %v7387_v18 = vpop.f32.mrf.mxu0  ;;  %v7458_v31 = vpop.f32.mrf.mxu2 }
0x1826   :  { %v7388_v42 = vadd.f32 %v10756_v25, %v7387_v18  ;;  %v7543_v22 = vpop.f32.mrf.mxu1  ;;  %v11460_v18 = vld [vmem:[#allocation74_spill] sm:$0xff] }
0x1827   :  { %v7485_v57 = vpop.f32.mrf.mxu3 }
0x1828   :  { %v7429_v3 = vadd.f32 %v7428_v9, %v7388_v42  ;;  %v11459_v9 = vld [vmem:[#allocation90_spill] sm:$0xff]  ;;  %v11461_v42 = vld [vmem:[#allocation73_spill] sm:$0xff] }
0x182a   :  { %v7459_v8 = vadd.f32 %v7458_v31, %v7429_v3  ;;  %v11462_v3 = vld [vmem:[#allocation92_spill] sm:$0xff]  ;;  %v11463_v31 = vld [vmem:[#allocation75_spill] sm:$0xff] }
0x182c   :  { %v7486_v5 = vadd.f32 %v7485_v57, %v7459_v8  ;;  %v11464_v8 = vld [vmem:[#allocation93_spill] sm:$0xff] }
0x182d   :  { %v7518_v58 = vpop.f32.mrf.mxu0 }
0x182e   :  { %v7519_v26 = vadd.f32 %v7518_v58, %v7486_v5 }
0x1830   :  { %v7544_v45 = vadd.f32 %v7543_v22, %v7519_v26  ;;  %v10841_v22 = vld [vmem:[%s10899_s10] ss:$0 sm:$0xff]  ;;  %s8962_s10 = smov 96  }
0x1832   :  { %v7546_v34 = vmax.f32 %v7544_v45, 0.0 }
0x1834   :  { %v7548_v24 = vsel %vm339_vm6, %v7546_v34, 0 }
0x1835   :  { %v7570_v7 = vand.u32 4294901760, %v7548_v24 }
0x1837   :  { %v7571_v1 = vsub.f32 %v7548_v24, %v7570_v7  ;;  %7616 = vmatmul.f32.vlgmr.msra.gmra.mxu3 %v7570_v7 }
0x1838   :  { %7850 = vmatpush.msra.mxu3 %v11292_v2 }
0x1839   :  { %v7572_v0 = vand.u32 4294901760, %v7571_v1  ;;  %7646 = vmatmul.f32.vlgmr.msra.gmra.mxu0 %v7571_v1 }
0x183a   :  { %7852 = vmatpush.msra.mxu3 %v11393_v14  ;;  %7879 = vmatpush.msra.mxu0 %v11402_v39  ;;  %v7926_v39 = vsel %vm339_vm6, %v7925_v29, 0 }
0x183b   :  { %v7573_v54 = vsub.f32 %v7571_v1, %v7572_v0  ;;  %7673 = vmatmul.f32.vlgmr.msra.gmra.mxu1 %v7572_v0 }
0x183c   :  { %7854 = vmatpush.msra.mxu3 %v11395_v17  ;;  %7883 = vmatpush.msra.mxu0 %v11405_v51  ;;  %v11445_v51 = vld [vmem:[#allocation51_spill] sm:$0xff] }
0x183d   :  { %v7574_v62 = vand.u32 4294901760, %v7573_v54  ;;  %7910 = vmatpush.msra.mxu1 %v11292_v2  ;;  %v7948_v2 = vand.u32 4294901760, %v7926_v39 }
0x183e   :  { %7856 = vmatpush.msra.mxu3 %v11396_v20  ;;  %7887 = vmatpush.msra.mxu0 %v11408_v36  ;;  %v11448_v36 = vld [vmem:[#allocation53_spill] sm:$0xff] }
0x183f   :  { %7575 = vmatmul.f32.vlgmr.msra.gmra.mxu2 %v7574_v62  ;;  %7731 = vmatmul.f32.vlgmr.msrb.gmra.mxu3 %v7570_v7 }
0x1840   :  { %7912 = vmatpush.msra.mxu1 %v11393_v14  ;;  %7821 = vmatpush.msra.mxu2 %v9205_v60  ;;  %v7949_v60 = vsub.f32 %v7926_v39, %v7948_v2 }
0x1841   :  { %7762 = vmatmul.f32.vlgmr.msrb.gmra.mxu0 %v7385_v59  ;;  %7974 = vmatpush.msrb.mxu3 %v11398_v23  ;;  %v11442_v23 = vld [vmem:[#allocation67_spill] sm:$0xff] }
0x1842   :  { %7891 = vmatpush.msra.mxu0 %v11410_v35  ;;  %7914 = vmatpush.msra.mxu1 %v11395_v17  ;;  %v7950_v14 = vand.u32 4294901760, %v7949_v60  ;;  %v11441_v17 = vld [vmem:[#allocation61_spill] sm:$0xff]  ;;  %v11456_v59 = vld [vmem:[#allocation87_spill] sm:$0xff] }
0x1843   :  { %7803 = vmatmul.f32.vlgmr.msrb.gmra.mxu1 %v10710_v41  ;;  %7824 = vmatpush.msra.mxu2 %v11342_v28  ;;  %v11438_v28 = vld [vmem:[#allocation52_spill] sm:$0xff]  ;;  %v11449_v35 = vld [vmem:[#allocation77_spill] sm:$0xff] }
0x1844   :  { %7916 = vmatpush.msra.mxu1 %v11396_v20  ;;  %7980 = vmatpush.msrb.mxu3 %v11401_v30  ;;  %v7951_v20 = vsub.f32 %v7949_v60, %v7950_v14  ;;  %v11444_v30 = vld [vmem:[#allocation68_spill] sm:$0xff] }
0x1845   :  { %8012 = vmatpush.msrb.mxu0 %v11412_v46  ;;  %7827 = vmatpush.msra.mxu2 %v11392_v11  ;;  %v11439_v11 = vld [vmem:[#allocation46_spill] sm:$0xff]  ;;  %v11450_v46 = vld [vmem:[#allocation55_spill] sm:$0xff] }
0x1846   :  { %7986 = vmatpush.msrb.mxu3 %v11404_v40  ;;  %8041 = vmatpush.msrb.mxu1 %v11397_v21  ;;  %v7952_v40 = vand.u32 4294901760, %v7951_v20 }
0x1847   :  { %7706 = vmatmul.f32.vlgmr.msrb.gmra.mxu2 %v7570_v7  ;;  %7860 = vmatmul.f32.vlgmr.msra.gmra.mxu3 %v10718_v43  ;;  %v11455_v43 = vld [vmem:[#allocation65_spill] sm:$0xff] }
0x1848   :  { %8015 = vmatpush.msrb.mxu0 %v11414_v6  ;;  %7830 = vmatpush.msra.mxu2 %v11394_v16  ;;  %v11440_v16 = vld [vmem:[#allocation49_spill] sm:$0xff]  ;;  %v11451_v6 = vld [vmem:[#allocation70_spill] sm:$0xff] }
0x1849   :  { %7893 = vmatmul.f32.vlgmr.msra.gmra.mxu0 %v10710_v41  ;;  %7992 = vmatpush.msrb.mxu3 %v11406_v55  ;;  %v11447_v55 = vld [vmem:[#allocation62_spill] sm:$0xff] }
0x184a   :  { %8018 = vmatpush.msrb.mxu0 %v11416_v48  ;;  %8043 = vmatpush.msrb.mxu1 %v11399_v27  ;;  %v11452_v48 = vld [vmem:[#allocation63_spill] sm:$0xff] }
0x184b   :  { %7918 = vmatmul.f32.vlgmr.msra.gmra.mxu1 %v10710_v41  ;;  %7941 = vmatpush.msrb.mxu2 %v11397_v21  ;;  %v11453_v41 = vld [vmem:[#allocation72_spill] sm:$0xff] }
0x184c   :  { %8021 = vmatpush.msrb.mxu0 %v11438_v28  ;;  %8045 = vmatpush.msrb.mxu1 %v11439_v11 }
0x184d   :  { %8101 = vmatpush.msra.mxu3 %v11397_v21  ;;  %7943 = vmatpush.msrb.mxu2 %v11399_v27  ;;  %v11443_v21 = vld [vmem:[#allocation48_spill] sm:$0xff] }
0x184e   :  { %8047 = vmatpush.msrb.mxu1 %v11440_v16  ;;  %8169 = vmatpush.msra.mxu0 %v11441_v17 }
0x184f   :  { %7833 = vmatmul.f32.vlgmr.msra.gmra.mxu2 %v10713_v44  ;;  %7994 = vmatmul.f32.vlgmr.msrb.gmra.mxu3 %v7948_v2  ;;  %v11454_v44 = vld [vmem:[#allocation64_spill] sm:$0xff] }
0x1850   :  { %8103 = vmatpush.msra.mxu3 %v11399_v27  ;;  %7945 = vmatpush.msrb.mxu2 %v11439_v11  ;;  %v11446_v27 = vld [vmem:[#allocation76_spill] sm:$0xff] }
0x1851   :  { %8024 = vmatmul.f32.vlgmr.msrb.gmra.mxu0 %v7949_v60  ;;  %8202 = vmatpush.msra.mxu1 %v11442_v23 }
0x1852   :  { %8105 = vmatpush.msra.mxu3 %v11439_v11  ;;  %7947 = vmatpush.msrb.mxu2 %v11440_v16 }
0x1853   :  { %8051 = vmatmul.f32.vlgmr.msrb.gmra.mxu1 %v7950_v14  ;;  %8171 = vmatpush.msra.mxu0 %v11447_v55 }
0x1854   :  { %8070 = vmatpush.msra.mxu2 %v11443_v21  ;;  %8107 = vmatpush.msra.mxu3 %v11440_v16 }
0x1855   :  { %8208 = vmatpush.msra.mxu1 %v11444_v30  ;;  %8173 = vmatpush.msra.mxu0 %v11451_v6 }
0x1856   :  { %8074 = vmatpush.msra.mxu2 %v11445_v51  ;;  %8269 = vmatpush.msrb.mxu3 %v11441_v17 }
0x1857   :  { %8214 = vmatpush.msra.mxu1 %v11446_v27  ;;  %7953 = vmatmul.f32.vlgmr.msrb.gmra.mxu2 %v7952_v40 }
0x1858   :  { %8109 = vmatmul.f32.vlgmr.msra.gmra.mxu3 %v7948_v2  ;;  %8078 = vmatpush.msra.mxu2 %v11448_v36 }
0x1859   :  { %8220 = vmatpush.msra.mxu1 %v11449_v35  ;;  %8271 = vmatpush.msrb.mxu3 %v11447_v55 }
0x185a   :  { %8082 = vmatpush.msra.mxu2 %v11450_v46  ;;  %8175 = vmatpush.msra.mxu0 %v11453_v41 }
0x185b   :  { %8329 = vmatpush.msrb.mxu1 %v11441_v17  ;;  %8273 = vmatpush.msrb.mxu3 %v11451_v6 }
0x185c   :  { %8240 = vmatpush.msrb.mxu2 %v11452_v48  ;;  %8298 = vmatpush.msrb.mxu0 %v11455_v43 }
0x185d   :  { %8331 = vmatpush.msrb.mxu1 %v11447_v55  ;;  %8275 = vmatpush.msrb.mxu3 %v11453_v41 }
0x185e   :  { %8243 = vmatpush.msrb.mxu2 %v11454_v44  ;;  %8302 = vmatpush.msrb.mxu0 %v11458_v33 }
0x185f   :  { %8333 = vmatpush.msrb.mxu1 %v11451_v6  ;;  %8084 = vmatmul.f32.vlgmr.msra.gmra.mxu2 %v7948_v2 }
0x1860   :  { %8391 = vmatpush.msra.mxu3 %v11456_v59  ;;  %8246 = vmatpush.msrb.mxu2 %v11457_v50 }
0x1861   :  { %8335 = vmatpush.msrb.mxu1 %v11453_v41  ;;  %8306 = vmatpush.msrb.mxu0 %v11461_v42 }
0x1862   :  { %8397 = vmatpush.msra.mxu3 %v11459_v9  ;;  %8249 = vmatpush.msrb.mxu2 %v11460_v18 }
0x1863   :  { %8310 = vmatpush.msrb.mxu0 %v11463_v31 }
0x1864   :  { %8403 = vmatpush.msra.mxu3 %v11462_v3  ;;  %8358 = vmatpush.msra.mxu2 %v11174_v47 }
0x1866   :  { %8409 = vmatpush.msra.mxu3 %v11464_v8  ;;  %8360 = vmatpush.msra.mxu2 %v11177_v61 }
0x1868   :  { %8362 = vmatpush.msra.mxu2 %v11180_v12 }
0x186a   :  { %8364 = vmatpush.msra.mxu2 %v11183_v19 }
0x18b6   :  { %v7647_v5 = vpop.f32.mrf.mxu0 }
0x18b8   :  { %v7674_v58 = vpop.f32.mrf.mxu1 }
0x18ba   :  { %v7617_v57 = vpop.f32.mrf.mxu3 }
0x18be   :  { %v7763_v0 = vpop.f32.mrf.mxu0 }
0x18c0   :  { %v7804_v29 = vpop.f32.mrf.mxu1 }
0x18c1   :  { %v7805_v60 = vadd.f32 %v7804_v29, %v7763_v0 }
0x18c2   :  { %v7576_v26 = vpop.f32.mrf.mxu2  ;;  %v7732_v24 = vpop.f32.mrf.mxu3 }
0x18c3   :  { %v7577_v45 = vadd.f32 %v10841_v22, %v7576_v26 }
0x18c5   :  { %v7618_v34 = vadd.f32 %v7617_v57, %v7577_v45 }
0x18c6   :  { %v7894_v14 = vpop.f32.mrf.mxu0 }
0x18c7   :  { %v7648_v7 = vadd.f32 %v7647_v5, %v7618_v34 }
0x18c8   :  { %v7919_v17 = vpop.f32.mrf.mxu1 }
0x18c9   :  { %v7675_v1 = vadd.f32 %v7674_v58, %v7648_v7 }
0x18ca   :  { %v7707_v54 = vpop.f32.mrf.mxu2  ;;  %v7861_v2 = vpop.f32.mrf.mxu3 }
0x18cb   :  { %v7708_v62 = vadd.f32 %v7707_v54, %v7675_v1 }
0x18cd   :  { %v7733_v39 = vadd.f32 %v7732_v24, %v7708_v62 }
0x18ce   :  { %v8025_v27 = vpop.f32.mrf.mxu0 }
0x18cf   :  { %8615 = vst [vmem:[%s10900_s11 + $0xc] sm:$0x3] %v7733_v39 }
0x18d0   :  { %v8052_v36 = vpop.f32.mrf.mxu1 }
0x18d2   :  { %v7834_v28 = vpop.f32.mrf.mxu2  ;;  %v7995_v21 = vpop.f32.mrf.mxu3 }
0x18d3   :  { %v7835_v11 = vadd.f32 %v7834_v28, %v7805_v60 }
0x18d5   :  { %v7862_v16 = vadd.f32 %v7861_v2, %v7835_v11 }
0x18d7   :  { %v7895_v20 = vadd.f32 %v7894_v14, %v7862_v16 }
0x18d9   :  { %v7920_v23 = vadd.f32 %v7919_v17, %v7895_v20 }
0x18da   :  { %v7954_v30 = vpop.f32.mrf.mxu2 }
0x18db   :  { %v7955_v40 = vadd.f32 %v7954_v30, %v7920_v23  ;;  %v8110_v48 = vpop.f32.mrf.mxu3 }
0x18dd   :  { %v7996_v51 = vadd.f32 %v7995_v21, %v7955_v40 }
0x18df   :  { %v8026_v55 = vadd.f32 %v8025_v27, %v7996_v51 }
0x18e1   :  { %v8053_v35 = vadd.f32 %v8052_v36, %v8026_v55 }
0x18e2   :  { %v8085_v46 = vpop.f32.mrf.mxu2 }
0x18e3   :  { %v8086_v6 = vadd.f32 %v8085_v46, %v8053_v35 }
0x18e5   :  { %v8111_v41 = vadd.f32 %v8110_v48, %v8086_v6 }
0x18e7   :  { %v8113_v44 = vadd.f32 %v10690_v15, %v8111_v41 }
0x18e9   :  { %8756 = vtanh.f32 %v8113_v44  ;;  %v8616_v59 = vmul.f32 -1.442695, %v8113_v44 }
0x18eb   :  { %8758 = vpow2.f32 %v8616_v59 }
0x18ef   :  { %v8757_v43 = vpop.eup %8756 }
0x18f0   :  { %8136 = vrot.lane.b32.xlu0 %v8757_v43, %s8960_s19 }
0x18f1   :  { %v8759_v50 = vpop.eup %8758 }
0x18f2   :  { %v8117_v33 = vadd.f32 1.0, %v8759_v50 }
0x18f4   :  { %8760 = vrcp.f32 %v8117_v33  ;;  %v8129_v8 = vand.u32 2147483648, %v8117_v33  ;;  %vm8123_vm3 = vweird.f32 %v8117_v33  ;;  %v8127_v57 = vand.u32 2147483647, %v8117_v33 }
0x18f6   :  { %v8130_v5 = vor.u32 1.1754944e-38, %v8129_v8  ;;  %vm8128_vm5 = vcmp.eq.f32.partialorder %v8127_v57, 8.507059e+37 }
0x18fa   :  { %v8761_v9 = vpop.eup %8760 }
0x18fb   :  { %v8119_v18 = vmul.f32 %v8761_v9, %v8117_v33  ;;  %vm8124_vm2 = vweird.f32 %v8761_v9 }
0x18fc   :  { %vm8125_vm4 = vmor %vm8123_vm3, %vm8124_vm2 }
0x18fd   :  { %v8120_v42 = vsub.f32 1.0, %v8119_v18 }
0x18ff   :  { %v8121_v3 = vmul.f32 %v8761_v9, %v8120_v42 }
0x1901   :  { %v8122_v31 = vadd.f32 %v8761_v9, %v8121_v3 }
0x1903   :  { %v8126_v15 = vsel %vm8125_vm4, %v8761_v9, %v8122_v31 }
0x1904   :  { %v8131_v26 = vsel %vm8128_vm5, %v8130_v5, %v8126_v15 }
0x1905   :  { %v8134_v34 = vmul.f32 %v8131_v26, %v10698_v32 }
0x1962   :  { %v8137_v58 = vpop.permute.xlu0 %8136 }
0x1963   :  { %v8139_v45 = vmul.f32 %v8137_v58, %v8131_v26 }
0x1965   :  { %8141 = vrot.lane.b32.xlu1 %v8139_v45, %s8960_s19 }
0x196d   :  { %8532 = vrot.lane.b32.xlu1 %v10738_v56, %s8961_s20 }
0x19d7   :  { %v8142_v24 = vpop.permute.xlu1 %8141 }
0x19d8   :  { %v8144_v7 = vadd.f32 %v8142_v24, %v8134_v34 }
0x19da   :  { %8762 = vtanh.f32 %v8144_v7 }
0x19df   :  { %v8533_v1 = vpop.permute.xlu1 %8532 }
0x19e0   :  { %v8763_v0 = vpop.eup %8762  ;;  %8536 = vst.msk [vmem:[#allocation11 - $0x6] sm:$0xc0] %vm8535_vm7, %v8533_v1 }
0x19e1   :  { %8147 = vrot.lane.b32.xlu2 %v8763_v0, %s8960_s19 }
0x19e9   :  { %8538 = vrot.lane.b32.xlu2 %v10705_v10, %s8962_s10 }
0x1a3b   :  { %v8148_v54 = vpop.permute.xlu2 %8147 }
0x1a3c   :  { %v8150_v62 = vmul.f32 %v8148_v54, %v8131_v26 }
0x1a3e   :  { %8152 = vrot.lane.b32.xlu0 %v8150_v62, %s8961_s20  ;;  %s8963_s20 = smov [#allocation11]  }
0x1a3f   :  { %s8558_s15 = sshll.u32 %s8963_s20, 4  ;;  %s8559_s15 = int_to_ptr.vmem [resolvable:$true] %s8558_s15 }
0x1a43   :  { %v8539_v29 = vpop.permute.xlu2 %8538 }
0x1a44   :  { %8541 = vst.msk [vmem:[#allocation12 - $0x6] sm:$0xc0] %vm8535_vm7, %v8539_v29 }
0x1a46   :  { %8547 = vrot.lane.b32.xlu0 %v8144_v7, %s8962_s10 }
0x1ab0   :  { %v8153_v32 = vpop.permute.xlu0 %8152 }
0x1ab1   :  { %v8154_v56 = vsel %vm339_vm6, %v8153_v32, 0  ;;  %8545 = vst.msk [vmem:[#allocation11 + $0x2] sm:$0x3] %vm8544_vm8, %v8153_v32 }
0x1ab2   :  { %v8176_v39 = vand.u32 4294901760, %v8154_v56  ;;  %8566 = dma.vmem_to_hbm [thread:$0]  %s8559_s15, 64, %s8561_s16, [#allocation4], %s8960_s19, %s8960_s19, %s8965_s0  }
0x1ab4   :  { %v8177_v2 = vsub.f32 %v8154_v56, %v8176_v39  ;;  %8222 = vmatmul.f32.vlgmr.msra.gmra.mxu1 %v8176_v39 }
0x1ab5   :  { %8458 = vmatpush.msra.mxu1 %v11174_v47 }
0x1ab6   :  { %v8178_v60 = vand.u32 4294901760, %v8177_v2  ;;  %8252 = vmatmul.f32.vlgmr.msrb.gmra.mxu2 %v8177_v2 }
0x1ab7   :  { %8460 = vmatpush.msra.mxu1 %v11177_v61  ;;  %8487 = vmatpush.msrb.mxu2 %v11190_v49 }
0x1ab8   :  { %v8179_v10 = vsub.f32 %v8177_v2, %v8178_v60  ;;  %8279 = vmatmul.f32.vlgmr.msrb.gmra.mxu3 %v8178_v60  ;;  %v8548_v28 = vpop.permute.xlu0 %8547 }
0x1ab9   :  { %8551 = vst.msk [vmem:[#allocation12 + $0x2] sm:$0x3] %vm8544_vm8, %v8548_v28  ;;  %8462 = vmatpush.msra.mxu1 %v11180_v12  ;;  %8518 = vmatpush.msrb.mxu3 %v11174_v47 }
0x1aba   :  { %v8180_v11 = vand.u32 4294901760, %v8179_v10  ;;  %8491 = vmatpush.msrb.mxu2 %v11191_v37  ;;  %8579 = dma.vmem_to_hbm [thread:$0]  %s8572_s3, 64, %s8574_s22, [#allocation13], %s8960_s19, %s8960_s19, %s8965_s0  }
0x1abb   :  { %8464 = vmatpush.msra.mxu1 %v11183_v19  ;;  %8520 = vmatpush.msrb.mxu3 %v11177_v61 }
0x1abc   :  { %8181 = vmatmul.f32.vlgmr.msra.gmra.mxu0 %v8180_v11  ;;  %8337 = vmatmul.f32.vlgmr.msrb.gmra.mxu1 %v8176_v39 }
0x1abd   :  { %8429 = vmatpush.msra.mxu0 %v11192_v52  ;;  %8522 = vmatpush.msrb.mxu3 %v11180_v12 }
0x1abe   :  { %8495 = vmatpush.msrb.mxu2 %v11194_v13 }
0x1abf   :  { %8432 = vmatpush.msra.mxu0 %v11237_v53  ;;  %8524 = vmatpush.msrb.mxu3 %v11183_v19 }
0x1ac0   :  { %8499 = vmatpush.msrb.mxu2 %v11239_v63 }
0x1ac1   :  { %8435 = vmatpush.msra.mxu0 %v11240_v4 }
0x1ac3   :  { %8438 = vmatpush.msra.mxu0 %v11242_v38 }
0x1ac4   :  { %8312 = vmatmul.f32.vlgmr.msrb.gmra.mxu0 %v8176_v39 }
0x1b31   :  { %v8223_v47 = vpop.f32.mrf.mxu1 }
0x1b39   :  { %v8182_v61 = vpop.f32.mrf.mxu0  ;;  %v8253_v52 = vpop.f32.mrf.mxu2 }
0x1b3a   :  { %v8183_v49 = vadd.f32 %v10756_v25, %v8182_v61  ;;  %v8338_v17 = vpop.f32.mrf.mxu1 }
0x1b3b   :  { %v8280_v14 = vpop.f32.mrf.mxu3 }
0x1b3c   :  { %v8224_v37 = vadd.f32 %v8223_v47, %v8183_v49 }
0x1b3e   :  { %v8254_v12 = vadd.f32 %v8253_v52, %v8224_v37 }
0x1b40   :  { %v8281_v13 = vadd.f32 %v8280_v14, %v8254_v12 }
0x1b41   :  { %v8313_v16 = vpop.f32.mrf.mxu0 }
0x1b42   :  { %v8314_v53 = vadd.f32 %v8313_v16, %v8281_v13 }
0x1b44   :  { %v8339_v19 = vadd.f32 %v8338_v17, %v8314_v53 }
0x1b46   :  { %v8341_v20 = vmax.f32 %v8339_v19, 0.0 }
0x1b48   :  { %v8343_v63 = vsel %vm339_vm6, %v8341_v20, 0 }
0x1b49   :  { %v8365_v4 = vand.u32 4294901760, %v8343_v63 }
0x1b4b   :  { %v8366_v23 = vsub.f32 %v8343_v63, %v8365_v4  ;;  %8411 = vmatmul.f32.vlgmr.msra.gmra.mxu3 %v8365_v4 }
0x1b4d   :  { %v8367_v38 = vand.u32 4294901760, %v8366_v23  ;;  %8441 = vmatmul.f32.vlgmr.msra.gmra.mxu0 %v8366_v23 }
0x1b4f   :  { %v8368_v21 = vsub.f32 %v8366_v23, %v8367_v38  ;;  %8468 = vmatmul.f32.vlgmr.msra.gmra.mxu1 %v8367_v38 }
0x1b51   :  { %v8369_v25 = vand.u32 4294901760, %v8368_v21 }
0x1b53   :  { %8370 = vmatmul.f32.vlgmr.msra.gmra.mxu2 %v8369_v25  ;;  %8526 = vmatmul.f32.vlgmr.msrb.gmra.mxu3 %v8365_v4 }
0x1b5b   :  { %8501 = vmatmul.f32.vlgmr.msrb.gmra.mxu2 %v8365_v4 }
0x1bca   :  { %v8442_v55 = vpop.f32.mrf.mxu0 }
0x1bcc   :  { %v8469_v35 = vpop.f32.mrf.mxu1 }
0x1bce   :  { %v8412_v30 = vpop.f32.mrf.mxu3 }
0x1bd6   :  { %v8371_v40 = vpop.f32.mrf.mxu2  ;;  %v8527_v41 = vpop.f32.mrf.mxu3 }
0x1bd7   :  { %v8372_v51 = vadd.f32 %v10841_v22, %v8371_v40 }
0x1bd9   :  { %v8413_v27 = vadd.f32 %v8412_v30, %v8372_v51 }
0x1bdb   :  { %v8443_v36 = vadd.f32 %v8442_v55, %v8413_v27 }
0x1bdd   :  { %v8470_v46 = vadd.f32 %v8469_v35, %v8443_v36 }
0x1bde   :  { %v8502_v6 = vpop.f32.mrf.mxu2 }
0x1bdf   :  { %v8503_v48 = vadd.f32 %v8502_v6, %v8470_v46 }
0x1be1   :  { %v8528_v44 = vadd.f32 %v8527_v41, %v8503_v48 }
0x1be3   :  { %8617 = vst [vmem:[%s10900_s11 + $0xe] sm:$0x3] %v8528_v44 }
0x1be4   :  { %8948 = dma.done.wait [#allocation4], 64  }
0x1be5   :  { %8949 = vsyncadd [#allocation4], 4294967232 }
0x1be6   :  { %8950 = dma.done.wait [#allocation13], 64  }
0x1be7   :  { %8951 = vsyncadd [#allocation13], 4294967232 }
0x1be8   :  { %8590 = vsyncpa [#allocation3], 1 }
0x1be9   :  { %8591 = vsyncpa [#allocation6], 1 }
0x1bea   :  { %8592 = vsyncpa [#allocation9], 1 }
0x1beb   :  { %8593 = vsyncpa [#allocation4], 1 }
0x1bec   :  { %8594 = vsyncpa [#allocation13], 1 }

</bundles_post_ra>
